<compile_context>
chip_gen: v6e
topology: v6e:2x2x1
jax: 0.10.0
libtpu: 0.0.40
codegen_flags: <defaults>
</compile_context>

<pallas_src>
import jax
import jax.numpy as jnp
from jax import lax
from jax.experimental import pallas as pl
from jax.experimental.pallas import tpu as pltpu


_UNROLL_T = 32   # fully unroll the time recurrence up to this length


def _round_up(n, m):
    return (n + m - 1) // m * m


def _retain_kernel(
    x_ref,                                   # (T, TB, F) time-major input tile (matmul dtype)
    wia_ref, wha_ref, bia_ref, bhna_ref,     # alpha GRU (gate-packed; r/z recurrent bias folded into bia)
    wib_ref, whb_ref, bib_ref, bhnb_ref,     # beta GRU
    wa_ref, wb_ref, bb_ref,                  # alpha_li weight (b_alpha dropped), beta_li weight/bias
    out_ref,                                 # (TB, F) f32
    gia, gib,                                # scratch: packed input projections (T, TB, 3*FP), matmul dtype
    h_out,                                   # scratch: beta GRU outputs (T, TB, F), matmul dtype
    logit,                                   # scratch: alpha logits (T, TB, 1) f32
):
    T, TB, F = x_ref.shape
    FP = wia_ref.shape[1] // 3               # per-gate block width (F if 3F<=128, else round_up(F,128))
    mm_dtype = wia_ref.dtype                 # MXU operand / scratch storage dtype

    # ---- fused input-to-hidden projections: ONE matmul per GRU (biases, incl.
    #      folded r/z recurrent biases, added once; f32 accumulate) ----
    xf = x_ref[...].reshape(T * TB, F)
    gia[...] = (jnp.dot(xf, wia_ref[...], preferred_element_type=jnp.float32)
                + bia_ref[...]).astype(mm_dtype).reshape(T, TB, 3 * FP)
    gib[...] = (jnp.dot(xf, wib_ref[...], preferred_element_type=jnp.float32)
                + bib_ref[...]).astype(mm_dtype).reshape(T, TB, 3 * FP)

    # ---- small f32 operands: broadcast ONCE (JAX does not CSE broadcast_in_dim) ----
    wa_b = jnp.broadcast_to(wa_ref[...], (TB, F))        # alpha_li weight row
    bhn_a = jnp.broadcast_to(bhna_ref[...], (TB, F))     # n-gate recurrent bias (alpha GRU)
    bhn_b = jnp.broadcast_to(bhnb_ref[...], (TB, F))     # n-gate recurrent bias (beta GRU)

    def gate(v, k):                          # k-th gate block, truncated to F lanes
        return v[:, k * FP:k * FP + F]

    def cell(h, gi, wh_ref, bhn):
        # ONE (TB,F)x(F,3*FP) recurrent matmul per GRU per step.  Recurrent
        # weights are re-loaded from VMEM every step (no vreg pinning).
        gh = jnp.dot(h.astype(mm_dtype), wh_ref[...],
                     preferred_element_type=jnp.float32)
        gi = gi.astype(jnp.float32)
        r = jax.nn.sigmoid(gate(gi, 0) + gate(gh, 0))    # bh_r folded into gi
        z = jax.nn.sigmoid(gate(gi, 1) + gate(gh, 1))    # bh_z folded into gi
        n = jnp.tanh(gate(gi, 2) + r * (gate(gh, 2) + bhn))
        return (1.0 - z) * n + z * h

    def step(s, h_a, h_b):
        ti = T - 1 - s                       # reversed time: rx[s] == x[T-1-s]
        h_a = cell(h_a, gia[ti], wha_ref, bhn_a)
        h_b = cell(h_b, gib[ti], whb_ref, bhn_b)
        h_out[s] = h_b.astype(mm_dtype)
        # alpha logit computed in-loop (lane reduce); b_alpha is softmax-invariant.
        logit[s] = jnp.sum(h_a * wa_b, axis=-1, keepdims=True)
        return h_a, h_b

    h0 = jnp.zeros((TB, F), jnp.float32)
    if T <= _UNROLL_T:
        # fully unrolled: lets the scheduler interleave the two independent GRU chains
        h_a, h_b = h0, h0
        for s in range(T):
            h_a, h_b = step(s, h_a, h_b)
    else:
        lax.fori_loop(0, T, lambda s, c: step(s, *c), (h0, h0), unroll=4)

    # ---- alpha = softmax over time of stored logits ----
    lg = logit[...]                          # (T, TB, 1) f32
    m = jnp.max(lg, axis=0, keepdims=True)
    e = jnp.exp(lg - m)
    alpha = e / jnp.sum(e, axis=0, keepdims=True)

    # ---- beta = tanh(Linear(h)) as one big (T*TB,F) x (F,F) matmul ----
    hflat = h_out[...].reshape(T * TB, F)
    beta = jnp.tanh(jnp.dot(hflat, wb_ref[...], preferred_element_type=jnp.float32)
                    + bb_ref[...]).reshape(T, TB, F)

    # ---- context vector: sum over time (x in original, non-reversed order) ----
    out_ref[...] = jnp.sum(alpha * beta * x_ref[...].astype(jnp.float32), axis=0)


def init_params(key, feature_size):
    """Deterministic synthetic params, PyTorch default init shapes."""
    F = feature_size
    k = 1.0 / (F ** 0.5)
    keys = jax.random.split(key, 12)
    u = lambda kk, shape: jax.random.uniform(kk, shape, jnp.float32, -k, k)
    return dict(
        w_ih_a=u(keys[0], (3 * F, F)), w_hh_a=u(keys[1], (3 * F, F)),
        b_ih_a=u(keys[2], (3 * F,)),   b_hh_a=u(keys[3], (3 * F,)),
        w_ih_b=u(keys[4], (3 * F, F)), w_hh_b=u(keys[5], (3 * F, F)),
        b_ih_b=u(keys[6], (3 * F,)),   b_hh_b=u(keys[7], (3 * F,)),
        w_alpha=u(keys[8], (1, F)),    b_alpha=u(keys[9], (1,)),
        w_beta=u(keys[10], (F, F)),    b_beta=u(keys[11], (F,)),
    )


def _pack_gates(w, FP, dtype):
    """(3F,F) rows [r;z;n] -> (F, 3*FP) cols [r|z|n] at FP-offset blocks."""
    F = w.shape[1]
    out = jnp.zeros((F, 3 * FP), jnp.float32)
    for g in range(3):
        out = out.at[:, g * FP:g * FP + F].set(w[g * F:(g + 1) * F].T)
    return out.astype(dtype)


def _pack_bias_folded(bi, bh, FP):
    """Fold r/z recurrent biases into the input bias; keep n-gate bh separate."""
    F = bi.shape[0] // 3
    out = jnp.zeros((1, 3 * FP), jnp.float32)
    for g in range(3):
        v = bi[g * F:(g + 1) * F]
        if g < 2:                            # r and z gates: bi + bh (safe to fold)
            v = v + bh[g * F:(g + 1) * F]
        out = out.at[0, g * FP:g * FP + F].set(v)
    bhn = bh[2 * F:].reshape(1, F).astype(jnp.float32)
    return out, bhn


def _vmem_footprint(T, TB, F, FP, mm_bytes):
    """Tile-padded VMEM bytes (double-buffered I/O + single-buffered scratch)."""
    def pad2(r, c, b):
        return _round_up(max(r, 1), 8) * _round_up(max(c, 1), 128) * b
    x_tile = 2 * T * pad2(TB, F, mm_bytes)
    weights = 2 * (4 * pad2(F, 3 * FP, mm_bytes)           # wia/wha/wib/whb
                   + pad2(F, F, mm_bytes)                  # wb
                   + 2 * pad2(1, 3 * FP, 4)                # bia/bib
                   + 4 * pad2(1, F, 4))                    # bhn_a/bhn_b/wa/bb
    out_tile = 2 * pad2(TB, F, 4)
    scratch = (2 * T * pad2(TB, 3 * FP, mm_bytes)          # gia/gib
               + T * pad2(TB, F, mm_bytes)                 # h_out
               + T * pad2(TB, 1, 4))                       # logits
    return x_tile + weights + out_tile + scratch


def _vmem_budget():
    try:
        cap = int(pltpu.get_tpu_info().vmem_capacity_bytes)
    except Exception:
        cap = 64 * 2 ** 20      # conservative fallback: v7x per-core capacity
    return int(cap * 0.75)      # ~25% headroom for Mosaic internal scratch


def retain_forward_pallas(x, p, *, batch_block=None, matmul_dtype=jnp.bfloat16):
    """x: (B, T, F) batch-first, like the PyTorch module. Returns (B, F) f32."""
    B, T, F = x.shape
    # tight gate packing when all three gates fit one 128-lane tile
    FP = F if 3 * F <= 128 else _round_up(F, 128)
    mm_bytes = jnp.dtype(matmul_dtype).itemsize
    budget = _vmem_budget()

    # ---- batch tile: up to MXU height (128 rows), multiple of 8, >=2 grid
    #      steps when the batch allows it, shrunk until VMEM fits. ----
    B8 = _round_up(B, 8)
    if batch_block is not None:
        TB = _round_up(max(1, min(batch_block, B8)), 8)
    else:
        TB = min(B8, 128)
        if B8 >= 16 and B8 // TB < 2:        # ensure >=2 grid steps (v7x megacore)
            TB = _round_up(-(-B8 // 2), 8)
    while TB > 8 and _vmem_footprint(T, TB, F, FP, mm_bytes) > budget:
        TB = _round_up(-(-TB // 2), 8)
    B_pad = _round_up(B, TB)

    x_tm = jnp.transpose(x, (1, 0, 2)).astype(matmul_dtype)   # (T, B, F) time-major
    if B_pad != B:
        x_tm = jnp.pad(x_tm, ((0, 0), (0, B_pad - B), (0, 0)))

    wia = _pack_gates(p["w_ih_a"], FP, matmul_dtype)
    wha = _pack_gates(p["w_hh_a"], FP, matmul_dtype)
    wib = _pack_gates(p["w_ih_b"], FP, matmul_dtype)
    whb = _pack_gates(p["w_hh_b"], FP, matmul_dtype)
    bia, bhn_a = _pack_bias_folded(p["b_ih_a"], p["b_hh_a"], FP)
    bib, bhn_b = _pack_bias_folded(p["b_ih_b"], p["b_hh_b"], FP)
    wa = p["w_alpha"].reshape(1, F).astype(jnp.float32)
    # b_alpha intentionally dropped: softmax over time is invariant to a constant offset.
    wb = p["w_beta"].T.astype(matmul_dtype)
    bb = p["b_beta"].reshape(1, F).astype(jnp.float32)

    in_specs = [
        pl.BlockSpec((T, TB, F), lambda i: (0, i, 0)),       # x (time-major batch tile)
        pl.BlockSpec((F, 3 * FP), lambda i: (0, 0)),          # wia
        pl.BlockSpec((F, 3 * FP), lambda i: (0, 0)),          # wha
        pl.BlockSpec((1, 3 * FP), lambda i: (0, 0)),          # bia (r/z recurrent bias folded in)
        pl.BlockSpec((1, F), lambda i: (0, 0)),               # bhn_a
        pl.BlockSpec((F, 3 * FP), lambda i: (0, 0)),          # wib
        pl.BlockSpec((F, 3 * FP), lambda i: (0, 0)),          # whb
        pl.BlockSpec((1, 3 * FP), lambda i: (0, 0)),          # bib
        pl.BlockSpec((1, F), lambda i: (0, 0)),               # bhn_b
        pl.BlockSpec((1, F), lambda i: (0, 0)),               # wa
        pl.BlockSpec((F, F), lambda i: (0, 0)),               # wb
        pl.BlockSpec((1, F), lambda i: (0, 0)),               # bb
    ]
    out_spec = pl.BlockSpec((TB, F), lambda i: (i, 0))
    scratch = [
        pltpu.VMEM((T, TB, 3 * FP), matmul_dtype),            # alpha input projections
        pltpu.VMEM((T, TB, 3 * FP), matmul_dtype),            # beta input projections
        pltpu.VMEM((T, TB, F), matmul_dtype),                 # beta GRU outputs
        pltpu.VMEM((T, TB, 1), jnp.float32),                  # alpha logits
    ]

    footprint = _vmem_footprint(T, TB, F, FP, mm_bytes)
    vmem_limit = int(min(budget, max(32 * 2 ** 20, int(footprint * 1.5))))

    out_pad = pl.pallas_call(
        _retain_kernel,
        out_shape=jax.ShapeDtypeStruct((B_pad, F), jnp.float32),
        grid=(B_pad // TB,),
        in_specs=in_specs,
        out_specs=out_spec,
        scratch_shapes=scratch,
        compiler_params=pltpu.CompilerParams(
            dimension_semantics=("parallel",),
            vmem_limit_bytes=vmem_limit,
        ),
    )(x_tm, wia, wha, bia, bhn_a, wib, whb, bib, bhn_b, wa, wb, bb)
    return out_pad[:B]


def retain_forward_ref(x, p):
    """Pure-JAX f32 reference matching the PyTorch forward (mask=None, eval mode)."""
    B, T, F = x.shape
    rx = x[:, ::-1, :]
    hp = lax.Precision.HIGHEST

    def gru(xs, Wi, Wh, bi, bh):
        def cell(h, xt):
            gi = jnp.dot(xt, Wi.T, precision=hp) + bi
            gh = jnp.dot(h, Wh.T, precision=hp) + bh
            r = jax.nn.sigmoid(gi[:, :F] + gh[:, :F])
            z = jax.nn.sigmoid(gi[:, F:2 * F] + gh[:, F:2 * F])
            n = jnp.tanh(gi[:, 2 * F:] + r * gh[:, 2 * F:])
            h_new = (1.0 - z) * n + z * h
            return h_new, h_new
        h0 = jnp.zeros((B, F), jnp.float32)
        _, hs = lax.scan(cell, h0, jnp.swapaxes(xs, 0, 1))
        return jnp.swapaxes(hs, 0, 1)                        # (B, T, F)

    g = gru(rx, p["w_ih_a"], p["w_hh_a"], p["b_ih_a"], p["b_hh_a"])
    h = gru(rx, p["w_ih_b"], p["w_hh_b"], p["b_ih_b"], p["b_hh_b"])
    attn_alpha = jax.nn.softmax(jnp.dot(g, p["w_alpha"].T, precision=hp)
                                + p["b_alpha"], axis=1)      # (B, T, 1)
    attn_beta = jnp.tanh(jnp.dot(h, p["w_beta"].T, precision=hp) + p["b_beta"])
    return jnp.sum(attn_alpha * attn_beta * x, axis=1)       # (B, F)


if __name__ == "__main__":
    key = jax.random.PRNGKey(0)
    kx1, kx2, kp = jax.random.split(key, 3)

    # Case 1: small shapes, f32 MXU operands, fully-unrolled recurrence (tight check).
    B1, T1, F1 = 2, 8, 32
    x1 = jax.random.normal(kx1, (B1, T1, F1), jnp.float32)
    p1 = init_params(kp, F1)
    out1 = jax.block_until_ready(retain_forward_pallas(x1, p1, matmul_dtype=jnp.float32))
    ref1 = retain_forward_ref(x1, p1)
    assert out1.shape == (B1, F1), out1.shape
    assert jnp.allclose(out1, ref1, atol=2e-3, rtol=2e-3), (out1, ref1)

    # Case 2: long sequence -> lax.fori_loop path; multi-tile batch grid with padding
    # (B=20 -> TB=16, 2 grid steps); f32 MXU operands for a tight check of that path.
    B2, T2, F2 = 20, 40, 32
    x2 = jax.random.normal(kx2, (B2, T2, F2), jnp.float32)
    p2 = init_params(jax.random.fold_in(kp, 1), F2)
    out2 = jax.block_until_ready(retain_forward_pallas(x2, p2, matmul_dtype=jnp.float32))
    ref2 = retain_forward_ref(x2, p2)
    assert out2.shape == (B2, F2), out2.shape
    assert jnp.allclose(out2, ref2, atol=1e-2, rtol=1e-2), (out2, ref2)

    # Case 3: default bf16 MXU operands / bf16 scratch (performance path) -> loose check.
    out3 = jax.block_until_ready(retain_forward_pallas(x2, p2))
    assert out3.shape == (B2, F2), out3.shape
    assert jnp.allclose(out3, ref2, atol=3e-2, rtol=3e-2), (out3, ref2)

    print("KERNEL_OK")
</pallas_src>

<mosaic_0001>
module attributes {stable_mosaic.version = 11 : i64} {
  func.func @_retain_kernel(%arg0: i32, %arg1: memref<8x8x32xf32, #tpu.memory_space<vmem>>, %arg2: memref<32x96xf32, #tpu.memory_space<vmem>>, %arg3: memref<32x96xf32, #tpu.memory_space<vmem>>, %arg4: memref<1x96xf32, #tpu.memory_space<vmem>>, %arg5: memref<1x32xf32, #tpu.memory_space<vmem>>, %arg6: memref<32x96xf32, #tpu.memory_space<vmem>>, %arg7: memref<32x96xf32, #tpu.memory_space<vmem>>, %arg8: memref<1x96xf32, #tpu.memory_space<vmem>>, %arg9: memref<1x32xf32, #tpu.memory_space<vmem>>, %arg10: memref<1x32xf32, #tpu.memory_space<vmem>>, %arg11: memref<32x32xf32, #tpu.memory_space<vmem>>, %arg12: memref<1x32xf32, #tpu.memory_space<vmem>>, %arg13: memref<8x32xf32, #tpu.memory_space<vmem>>, %arg14: memref<8x8x96xf32, #tpu.memory_space<vmem>>, %arg15: memref<8x8x96xf32, #tpu.memory_space<vmem>>, %arg16: memref<8x8x32xf32, #tpu.memory_space<vmem>>, %arg17: memref<8x8x1xf32, #tpu.memory_space<vmem>>) attributes {dimension_semantics = [#tpu.dimension_semantics<parallel>], iteration_bounds = array<i64: 1>, scalar_prefetch = 0 : i64, scratch_operands = 4 : i64, tpu.core_type = #tpu.core_type<tc>, window_params = [{transform_indices = @transform_0, window_bounds = array<i64: 8, 8, 32>}, {pipeline_mode = #tpu.pipeline_mode<synchronous>, transform_indices = @transform_1, window_bounds = array<i64: 32, 96>}, {pipeline_mode = #tpu.pipeline_mode<synchronous>, transform_indices = @transform_2, window_bounds = array<i64: 32, 96>}, {pipeline_mode = #tpu.pipeline_mode<synchronous>, transform_indices = @transform_3, window_bounds = array<i64: 1, 96>}, {pipeline_mode = #tpu.pipeline_mode<synchronous>, transform_indices = @transform_4, window_bounds = array<i64: 1, 32>}, {pipeline_mode = #tpu.pipeline_mode<synchronous>, transform_indices = @transform_5, window_bounds = array<i64: 32, 96>}, {pipeline_mode = #tpu.pipeline_mode<synchronous>, transform_indices = @transform_6, window_bounds = array<i64: 32, 96>}, {pipeline_mode = #tpu.pipeline_mode<synchronous>, transform_indices = @transform_7, window_bounds = array<i64: 1, 96>}, {pipeline_mode = #tpu.pipeline_mode<synchronous>, transform_indices = @transform_8, window_bounds = array<i64: 1, 32>}, {pipeline_mode = #tpu.pipeline_mode<synchronous>, transform_indices = @transform_9, window_bounds = array<i64: 1, 32>}, {pipeline_mode = #tpu.pipeline_mode<synchronous>, transform_indices = @transform_10, window_bounds = array<i64: 32, 32>}, {pipeline_mode = #tpu.pipeline_mode<synchronous>, transform_indices = @transform_11, window_bounds = array<i64: 1, 32>}, {transform_indices = @transform_12, window_bounds = array<i64: 8, 32>}]} {
    %c0 = arith.constant 0 : index
    %c0_0 = arith.constant 0 : index
    %c0_1 = arith.constant 0 : index
    %0 = vector.load %arg1[%c0, %c0_0, %c0_1] : memref<8x8x32xf32, #tpu.memory_space<vmem>>, vector<8x8x32xf32>
    %1 = vector.shape_cast %0 : vector<8x8x32xf32> to vector<64x32xf32>
    %c0_2 = arith.constant 0 : index
    %c0_3 = arith.constant 0 : index
    %2 = vector.load %arg2[%c0_2, %c0_3] : memref<32x96xf32, #tpu.memory_space<vmem>>, vector<32x96xf32>
    %cst = arith.constant dense<0.000000e+00> : vector<64x96xf32>
    %3 = tpu.matmul %1, %2, %cst {dimension_numbers = #tpu.dot_dimension_numbers<[1], [0], [0], [1], [0, 0, 1, 1], [], []>} : vector<64x32xf32>, vector<32x96xf32>, vector<64x96xf32> -> vector<64x96xf32>
    %c0_4 = arith.constant 0 : index
    %c0_5 = arith.constant 0 : index
    %4 = vector.load %arg4[%c0_4, %c0_5] : memref<1x96xf32, #tpu.memory_space<vmem>>, vector<1x96xf32>
    %5 = vector.broadcast %4 : vector<1x96xf32> to vector<64x96xf32>
    %6 = arith.addf %3, %5 : vector<64x96xf32>
    %7 = vector.shape_cast %6 : vector<64x96xf32> to vector<8x8x96xf32>
    %c0_6 = arith.constant 0 : index
    %c0_7 = arith.constant 0 : index
    %c0_8 = arith.constant 0 : index
    %8 = vector.load %arg14[%c0_6, %c0_7, %c0_8] : memref<8x8x96xf32, #tpu.memory_space<vmem>>, vector<8x8x96xf32>
    tpu.vector_store %arg14[%c0_6, %c0_7, %c0_8], %7 {strides = array<i32>} : memref<8x8x96xf32, #tpu.memory_space<vmem>>, vector<8x8x96xf32>,
    %c0_9 = arith.constant 0 : index
    %c0_10 = arith.constant 0 : index
    %9 = vector.load %arg6[%c0_9, %c0_10] : memref<32x96xf32, #tpu.memory_space<vmem>>, vector<32x96xf32>
    %cst_11 = arith.constant dense<0.000000e+00> : vector<64x96xf32>
    %10 = tpu.matmul %1, %9, %cst_11 {dimension_numbers = #tpu.dot_dimension_numbers<[1], [0], [0], [1], [0, 0, 1, 1], [], []>} : vector<64x32xf32>, vector<32x96xf32>, vector<64x96xf32> -> vector<64x96xf32>
    %c0_12 = arith.constant 0 : index
    %c0_13 = arith.constant 0 : index
    %11 = vector.load %arg8[%c0_12, %c0_13] : memref<1x96xf32, #tpu.memory_space<vmem>>, vector<1x96xf32>
    %12 = vector.broadcast %11 : vector<1x96xf32> to vector<64x96xf32>
    %13 = arith.addf %10, %12 : vector<64x96xf32>
    %14 = vector.shape_cast %13 : vector<64x96xf32> to vector<8x8x96xf32>
    %c0_14 = arith.constant 0 : index
    %c0_15 = arith.constant 0 : index
    %c0_16 = arith.constant 0 : index
    %15 = vector.load %arg15[%c0_14, %c0_15, %c0_16] : memref<8x8x96xf32, #tpu.memory_space<vmem>>, vector<8x8x96xf32>
    tpu.vector_store %arg15[%c0_14, %c0_15, %c0_16], %14 {strides = array<i32>} : memref<8x8x96xf32, #tpu.memory_space<vmem>>, vector<8x8x96xf32>,
    %c0_17 = arith.constant 0 : index
    %c0_18 = arith.constant 0 : index
    %16 = vector.load %arg10[%c0_17, %c0_18] : memref<1x32xf32, #tpu.memory_space<vmem>>, vector<1x32xf32>
    %17 = vector.shape_cast %16 : vector<1x32xf32> to vector<1x32xf32>
    %18 = vector.broadcast %17 : vector<1x32xf32> to vector<8x32xf32>
    %c0_19 = arith.constant 0 : index
    %c0_20 = arith.constant 0 : index
    %19 = vector.load %arg5[%c0_19, %c0_20] : memref<1x32xf32, #tpu.memory_space<vmem>>, vector<1x32xf32>
    %20 = vector.shape_cast %19 : vector<1x32xf32> to vector<1x32xf32>
    %21 = vector.broadcast %20 : vector<1x32xf32> to vector<8x32xf32>
    %c0_21 = arith.constant 0 : index
    %c0_22 = arith.constant 0 : index
    %22 = vector.load %arg9[%c0_21, %c0_22] : memref<1x32xf32, #tpu.memory_space<vmem>>, vector<1x32xf32>
    %23 = vector.shape_cast %22 : vector<1x32xf32> to vector<1x32xf32>
    %24 = vector.broadcast %23 : vector<1x32xf32> to vector<8x32xf32>
    %cst_23 = arith.constant 0.000000e+00 : f32
    %25 = vector.broadcast %cst_23 : f32 to vector<8x32xf32>
    %c7 = arith.constant 7 : index
    %c0_24 = arith.constant 0 : index
    %c0_25 = arith.constant 0 : index
    %26 = vector.load %arg14[%c7, %c0_24, %c0_25] : memref<8x8x96xf32, #tpu.memory_space<vmem>>, vector<1x8x96xf32>
    %27 = vector.shape_cast %26 : vector<1x8x96xf32> to vector<8x96xf32>
    %c0_26 = arith.constant 0 : index
    %c0_27 = arith.constant 0 : index
    %28 = vector.load %arg3[%c0_26, %c0_27] : memref<32x96xf32, #tpu.memory_space<vmem>>, vector<32x96xf32>
    %cst_28 = arith.constant dense<0.000000e+00> : vector<8x96xf32>
    %29 = tpu.matmul %25, %28, %cst_28 {dimension_numbers = #tpu.dot_dimension_numbers<[1], [0], [0], [1], [0, 0, 1, 1], [], []>} : vector<8x32xf32>, vector<32x96xf32>, vector<8x96xf32> -> vector<8x96xf32>
    %30 = vector.extract_strided_slice %27 {offsets = [0, 0], sizes = [8, 32], strides = [1, 1]} : vector<8x96xf32> to vector<8x32xf32>
    %31 = vector.extract_strided_slice %29 {offsets = [0, 0], sizes = [8, 32], strides = [1, 1]} : vector<8x96xf32> to vector<8x32xf32>
    %32 = arith.addf %30, %31 : vector<8x32xf32>
    %33 = arith.negf %32 : vector<8x32xf32>
    %34 = math.exp %33 : vector<8x32xf32>
    %cst_29 = arith.constant 1.000000e+00 : f32
    %35 = vector.broadcast %cst_29 : f32 to vector<8x32xf32>
    %36 = arith.addf %35, %34 : vector<8x32xf32>
    %37 = arith.divf %35, %36 : vector<8x32xf32>
    %38 = vector.extract_strided_slice %27 {offsets = [0, 32], sizes = [8, 32], strides = [1, 1]} : vector<8x96xf32> to vector<8x32xf32>
    %39 = vector.extract_strided_slice %29 {offsets = [0, 32], sizes = [8, 32], strides = [1, 1]} : vector<8x96xf32> to vector<8x32xf32>
    %40 = arith.addf %38, %39 : vector<8x32xf32>
    %41 = arith.negf %40 : vector<8x32xf32>
    %42 = math.exp %41 : vector<8x32xf32>
    %cst_30 = arith.constant 1.000000e+00 : f32
    %43 = vector.broadcast %cst_30 : f32 to vector<8x32xf32>
    %44 = arith.addf %43, %42 : vector<8x32xf32>
    %45 = arith.divf %43, %44 : vector<8x32xf32>
    %46 = vector.extract_strided_slice %27 {offsets = [0, 64], sizes = [8, 32], strides = [1, 1]} : vector<8x96xf32> to vector<8x32xf32>
    %47 = vector.extract_strided_slice %29 {offsets = [0, 64], sizes = [8, 32], strides = [1, 1]} : vector<8x96xf32> to vector<8x32xf32>
    %48 = arith.addf %47, %21 : vector<8x32xf32>
    %49 = arith.mulf %37, %48 : vector<8x32xf32>
    %50 = arith.addf %46, %49 : vector<8x32xf32>
    %51 = math.tanh %50 : vector<8x32xf32>
    %cst_31 = arith.constant 1.000000e+00 : f32
    %52 = vector.broadcast %cst_31 : f32 to vector<8x32xf32>
    %53 = arith.subf %52, %45 : vector<8x32xf32>
    %54 = arith.mulf %53, %51 : vector<8x32xf32>
    %55 = arith.mulf %45, %25 : vector<8x32xf32>
    %56 = arith.addf %54, %55 : vector<8x32xf32>
    %c7_32 = arith.constant 7 : index
    %c0_33 = arith.constant 0 : index
    %c0_34 = arith.constant 0 : index
    %57 = vector.load %arg15[%c7_32, %c0_33, %c0_34] : memref<8x8x96xf32, #tpu.memory_space<vmem>>, vector<1x8x96xf32>
    %58 = vector.shape_cast %57 : vector<1x8x96xf32> to vector<8x96xf32>
    %c0_35 = arith.constant 0 : index
    %c0_36 = arith.constant 0 : index
    %59 = vector.load %arg7[%c0_35, %c0_36] : memref<32x96xf32, #tpu.memory_space<vmem>>, vector<32x96xf32>
    %cst_37 = arith.constant dense<0.000000e+00> : vector<8x96xf32>
    %60 = tpu.matmul %25, %59, %cst_37 {dimension_numbers = #tpu.dot_dimension_numbers<[1], [0], [0], [1], [0, 0, 1, 1], [], []>} : vector<8x32xf32>, vector<32x96xf32>, vector<8x96xf32> -> vector<8x96xf32>
    %61 = vector.extract_strided_slice %58 {offsets = [0, 0], sizes = [8, 32], strides = [1, 1]} : vector<8x96xf32> to vector<8x32xf32>
    %62 = vector.extract_strided_slice %60 {offsets = [0, 0], sizes = [8, 32], strides = [1, 1]} : vector<8x96xf32> to vector<8x32xf32>
    %63 = arith.addf %61, %62 : vector<8x32xf32>
    %64 = arith.negf %63 : vector<8x32xf32>
    %65 = math.exp %64 : vector<8x32xf32>
    %cst_38 = arith.constant 1.000000e+00 : f32
    %66 = vector.broadcast %cst_38 : f32 to vector<8x32xf32>
    %67 = arith.addf %66, %65 : vector<8x32xf32>
    %68 = arith.divf %66, %67 : vector<8x32xf32>
    %69 = vector.extract_strided_slice %58 {offsets = [0, 32], sizes = [8, 32], strides = [1, 1]} : vector<8x96xf32> to vector<8x32xf32>
    %70 = vector.extract_strided_slice %60 {offsets = [0, 32], sizes = [8, 32], strides = [1, 1]} : vector<8x96xf32> to vector<8x32xf32>
    %71 = arith.addf %69, %70 : vector<8x32xf32>
    %72 = arith.negf %71 : vector<8x32xf32>
    %73 = math.exp %72 : vector<8x32xf32>
    %cst_39 = arith.constant 1.000000e+00 : f32
    %74 = vector.broadcast %cst_39 : f32 to vector<8x32xf32>
    %75 = arith.addf %74, %73 : vector<8x32xf32>
    %76 = arith.divf %74, %75 : vector<8x32xf32>
    %77 = vector.extract_strided_slice %58 {offsets = [0, 64], sizes = [8, 32], strides = [1, 1]} : vector<8x96xf32> to vector<8x32xf32>
    %78 = vector.extract_strided_slice %60 {offsets = [0, 64], sizes = [8, 32], strides = [1, 1]} : vector<8x96xf32> to vector<8x32xf32>
    %79 = arith.addf %78, %24 : vector<8x32xf32>
    %80 = arith.mulf %68, %79 : vector<8x32xf32>
    %81 = arith.addf %77, %80 : vector<8x32xf32>
    %82 = math.tanh %81 : vector<8x32xf32>
    %cst_40 = arith.constant 1.000000e+00 : f32
    %83 = vector.broadcast %cst_40 : f32 to vector<8x32xf32>
    %84 = arith.subf %83, %76 : vector<8x32xf32>
    %85 = arith.mulf %84, %82 : vector<8x32xf32>
    %86 = arith.mulf %76, %25 : vector<8x32xf32>
    %87 = arith.addf %85, %86 : vector<8x32xf32>
    %c0_41 = arith.constant 0 : index
    %c0_42 = arith.constant 0 : index
    %c0_43 = arith.constant 0 : index
    %88 = vector.load %arg16[%c0_41, %c0_42, %c0_43] : memref<8x8x32xf32, #tpu.memory_space<vmem>>, vector<1x8x32xf32>
    %89 = vector.shape_cast %88 : vector<1x8x32xf32> to vector<8x32xf32>
    %90 = vector.shape_cast %87 : vector<8x32xf32> to vector<1x8x32xf32>
    tpu.vector_store %arg16[%c0_41, %c0_42, %c0_43], %90 {strides = array<i32>} : memref<8x8x32xf32, #tpu.memory_space<vmem>>, vector<1x8x32xf32>,
    %91 = arith.mulf %56, %18 : vector<8x32xf32>
    %cst_44 = arith.constant dense<0.000000e+00> : vector<8xf32>
    %92 = vector.multi_reduction <add>, %91, %cst_44 [1] : vector<8x32xf32> to vector<8xf32>
    %93 = vector.shape_cast %92 : vector<8xf32> to vector<8x1xf32>
    %c0_45 = arith.constant 0 : index
    %c0_46 = arith.constant 0 : index
    %c0_47 = arith.constant 0 : index
    %94 = vector.load %arg17[%c0_45, %c0_46, %c0_47] : memref<8x8x1xf32, #tpu.memory_space<vmem>>, vector<1x8x1xf32>
    %95 = vector.shape_cast %94 : vector<1x8x1xf32> to vector<8x1xf32>
    %96 = vector.shape_cast %93 : vector<8x1xf32> to vector<1x8x1xf32>
    tpu.vector_store %arg17[%c0_45, %c0_46, %c0_47], %96 {strides = array<i32>} : memref<8x8x1xf32, #tpu.memory_space<vmem>>, vector<1x8x1xf32>,
    %c6 = arith.constant 6 : index
    %c0_48 = arith.constant 0 : index
    %c0_49 = arith.constant 0 : index
    %97 = vector.load %arg14[%c6, %c0_48, %c0_49] : memref<8x8x96xf32, #tpu.memory_space<vmem>>, vector<1x8x96xf32>
    %98 = vector.shape_cast %97 : vector<1x8x96xf32> to vector<8x96xf32>
    %c0_50 = arith.constant 0 : index
    %c0_51 = arith.constant 0 : index
    %99 = vector.load %arg3[%c0_50, %c0_51] : memref<32x96xf32, #tpu.memory_space<vmem>>, vector<32x96xf32>
    %cst_52 = arith.constant dense<0.000000e+00> : vector<8x96xf32>
    %100 = tpu.matmul %56, %99, %cst_52 {dimension_numbers = #tpu.dot_dimension_numbers<[1], [0], [0], [1], [0, 0, 1, 1], [], []>} : vector<8x32xf32>, vector<32x96xf32>, vector<8x96xf32> -> vector<8x96xf32>
    %101 = vector.extract_strided_slice %98 {offsets = [0, 0], sizes = [8, 32], strides = [1, 1]} : vector<8x96xf32> to vector<8x32xf32>
    %102 = vector.extract_strided_slice %100 {offsets = [0, 0], sizes = [8, 32], strides = [1, 1]} : vector<8x96xf32> to vector<8x32xf32>
    %103 = arith.addf %101, %102 : vector<8x32xf32>
    %104 = arith.negf %103 : vector<8x32xf32>
    %105 = math.exp %104 : vector<8x32xf32>
    %cst_53 = arith.constant 1.000000e+00 : f32
    %106 = vector.broadcast %cst_53 : f32 to vector<8x32xf32>
    %107 = arith.addf %106, %105 : vector<8x32xf32>
    %108 = arith.divf %106, %107 : vector<8x32xf32>
    %109 = vector.extract_strided_slice %98 {offsets = [0, 32], sizes = [8, 32], strides = [1, 1]} : vector<8x96xf32> to vector<8x32xf32>
    %110 = vector.extract_strided_slice %100 {offsets = [0, 32], sizes = [8, 32], strides = [1, 1]} : vector<8x96xf32> to vector<8x32xf32>
    %111 = arith.addf %109, %110 : vector<8x32xf32>
    %112 = arith.negf %111 : vector<8x32xf32>
    %113 = math.exp %112 : vector<8x32xf32>
    %cst_54 = arith.constant 1.000000e+00 : f32
    %114 = vector.broadcast %cst_54 : f32 to vector<8x32xf32>
    %115 = arith.addf %114, %113 : vector<8x32xf32>
    %116 = arith.divf %114, %115 : vector<8x32xf32>
    %117 = vector.extract_strided_slice %98 {offsets = [0, 64], sizes = [8, 32], strides = [1, 1]} : vector<8x96xf32> to vector<8x32xf32>
    %118 = vector.extract_strided_slice %100 {offsets = [0, 64], sizes = [8, 32], strides = [1, 1]} : vector<8x96xf32> to vector<8x32xf32>
    %119 = arith.addf %118, %21 : vector<8x32xf32>
    %120 = arith.mulf %108, %119 : vector<8x32xf32>
    %121 = arith.addf %117, %120 : vector<8x32xf32>
    %122 = math.tanh %121 : vector<8x32xf32>
    %cst_55 = arith.constant 1.000000e+00 : f32
    %123 = vector.broadcast %cst_55 : f32 to vector<8x32xf32>
    %124 = arith.subf %123, %116 : vector<8x32xf32>
    %125 = arith.mulf %124, %122 : vector<8x32xf32>
    %126 = arith.mulf %116, %56 : vector<8x32xf32>
    %127 = arith.addf %125, %126 : vector<8x32xf32>
    %c6_56 = arith.constant 6 : index
    %c0_57 = arith.constant 0 : index
    %c0_58 = arith.constant 0 : index
    %128 = vector.load %arg15[%c6_56, %c0_57, %c0_58] : memref<8x8x96xf32, #tpu.memory_space<vmem>>, vector<1x8x96xf32>
    %129 = vector.shape_cast %128 : vector<1x8x96xf32> to vector<8x96xf32>
    %c0_59 = arith.constant 0 : index
    %c0_60 = arith.constant 0 : index
    %130 = vector.load %arg7[%c0_59, %c0_60] : memref<32x96xf32, #tpu.memory_space<vmem>>, vector<32x96xf32>
    %cst_61 = arith.constant dense<0.000000e+00> : vector<8x96xf32>
    %131 = tpu.matmul %87, %130, %cst_61 {dimension_numbers = #tpu.dot_dimension_numbers<[1], [0], [0], [1], [0, 0, 1, 1], [], []>} : vector<8x32xf32>, vector<32x96xf32>, vector<8x96xf32> -> vector<8x96xf32>
    %132 = vector.extract_strided_slice %129 {offsets = [0, 0], sizes = [8, 32], strides = [1, 1]} : vector<8x96xf32> to vector<8x32xf32>
    %133 = vector.extract_strided_slice %131 {offsets = [0, 0], sizes = [8, 32], strides = [1, 1]} : vector<8x96xf32> to vector<8x32xf32>
    %134 = arith.addf %132, %133 : vector<8x32xf32>
    %135 = arith.negf %134 : vector<8x32xf32>
    %136 = math.exp %135 : vector<8x32xf32>
    %cst_62 = arith.constant 1.000000e+00 : f32
    %137 = vector.broadcast %cst_62 : f32 to vector<8x32xf32>
    %138 = arith.addf %137, %136 : vector<8x32xf32>
    %139 = arith.divf %137, %138 : vector<8x32xf32>
    %140 = vector.extract_strided_slice %129 {offsets = [0, 32], sizes = [8, 32], strides = [1, 1]} : vector<8x96xf32> to vector<8x32xf32>
    %141 = vector.extract_strided_slice %131 {offsets = [0, 32], sizes = [8, 32], strides = [1, 1]} : vector<8x96xf32> to vector<8x32xf32>
    %142 = arith.addf %140, %141 : vector<8x32xf32>
    %143 = arith.negf %142 : vector<8x32xf32>
    %144 = math.exp %143 : vector<8x32xf32>
    %cst_63 = arith.constant 1.000000e+00 : f32
    %145 = vector.broadcast %cst_63 : f32 to vector<8x32xf32>
    %146 = arith.addf %145, %144 : vector<8x32xf32>
    %147 = arith.divf %145, %146 : vector<8x32xf32>
    %148 = vector.extract_strided_slice %129 {offsets = [0, 64], sizes = [8, 32], strides = [1, 1]} : vector<8x96xf32> to vector<8x32xf32>
    %149 = vector.extract_strided_slice %131 {offsets = [0, 64], sizes = [8, 32], strides = [1, 1]} : vector<8x96xf32> to vector<8x32xf32>
    %150 = arith.addf %149, %24 : vector<8x32xf32>
    %151 = arith.mulf %139, %150 : vector<8x32xf32>
    %152 = arith.addf %148, %151 : vector<8x32xf32>
    %153 = math.tanh %152 : vector<8x32xf32>
    %cst_64 = arith.constant 1.000000e+00 : f32
    %154 = vector.broadcast %cst_64 : f32 to vector<8x32xf32>
    %155 = arith.subf %154, %147 : vector<8x32xf32>
    %156 = arith.mulf %155, %153 : vector<8x32xf32>
    %157 = arith.mulf %147, %87 : vector<8x32xf32>
    %158 = arith.addf %156, %157 : vector<8x32xf32>
    %c1 = arith.constant 1 : index
    %c0_65 = arith.constant 0 : index
    %c0_66 = arith.constant 0 : index
    %159 = vector.load %arg16[%c1, %c0_65, %c0_66] : memref<8x8x32xf32, #tpu.memory_space<vmem>>, vector<1x8x32xf32>
    %160 = vector.shape_cast %159 : vector<1x8x32xf32> to vector<8x32xf32>
    %161 = vector.shape_cast %158 : vector<8x32xf32> to vector<1x8x32xf32>
    tpu.vector_store %arg16[%c1, %c0_65, %c0_66], %161 {strides = array<i32>} : memref<8x8x32xf32, #tpu.memory_space<vmem>>, vector<1x8x32xf32>,
    %162 = arith.mulf %127, %18 : vector<8x32xf32>
    %cst_67 = arith.constant dense<0.000000e+00> : vector<8xf32>
    %163 = vector.multi_reduction <add>, %162, %cst_67 [1] : vector<8x32xf32> to vector<8xf32>
    %164 = vector.shape_cast %163 : vector<8xf32> to vector<8x1xf32>
    %c1_68 = arith.constant 1 : index
    %c0_69 = arith.constant 0 : index
    %c0_70 = arith.constant 0 : index
    %165 = vector.load %arg17[%c1_68, %c0_69, %c0_70] : memref<8x8x1xf32, #tpu.memory_space<vmem>>, vector<1x8x1xf32>
    %166 = vector.shape_cast %165 : vector<1x8x1xf32> to vector<8x1xf32>
    %167 = vector.shape_cast %164 : vector<8x1xf32> to vector<1x8x1xf32>
    tpu.vector_store %arg17[%c1_68, %c0_69, %c0_70], %167 {strides = array<i32>} : memref<8x8x1xf32, #tpu.memory_space<vmem>>, vector<1x8x1xf32>,
    %c5 = arith.constant 5 : index
    %c0_71 = arith.constant 0 : index
    %c0_72 = arith.constant 0 : index
    %168 = vector.load %arg14[%c5, %c0_71, %c0_72] : memref<8x8x96xf32, #tpu.memory_space<vmem>>, vector<1x8x96xf32>
    %169 = vector.shape_cast %168 : vector<1x8x96xf32> to vector<8x96xf32>
    %c0_73 = arith.constant 0 : index
    %c0_74 = arith.constant 0 : index
    %170 = vector.load %arg3[%c0_73, %c0_74] : memref<32x96xf32, #tpu.memory_space<vmem>>, vector<32x96xf32>
    %cst_75 = arith.constant dense<0.000000e+00> : vector<8x96xf32>
    %171 = tpu.matmul %127, %170, %cst_75 {dimension_numbers = #tpu.dot_dimension_numbers<[1], [0], [0], [1], [0, 0, 1, 1], [], []>} : vector<8x32xf32>, vector<32x96xf32>, vector<8x96xf32> -> vector<8x96xf32>
    %172 = vector.extract_strided_slice %169 {offsets = [0, 0], sizes = [8, 32], strides = [1, 1]} : vector<8x96xf32> to vector<8x32xf32>
    %173 = vector.extract_strided_slice %171 {offsets = [0, 0], sizes = [8, 32], strides = [1, 1]} : vector<8x96xf32> to vector<8x32xf32>
    %174 = arith.addf %172, %173 : vector<8x32xf32>
    %175 = arith.negf %174 : vector<8x32xf32>
    %176 = math.exp %175 : vector<8x32xf32>
    %cst_76 = arith.constant 1.000000e+00 : f32
    %177 = vector.broadcast %cst_76 : f32 to vector<8x32xf32>
    %178 = arith.addf %177, %176 : vector<8x32xf32>
    %179 = arith.divf %177, %178 : vector<8x32xf32>
    %180 = vector.extract_strided_slice %169 {offsets = [0, 32], sizes = [8, 32], strides = [1, 1]} : vector<8x96xf32> to vector<8x32xf32>
    %181 = vector.extract_strided_slice %171 {offsets = [0, 32], sizes = [8, 32], strides = [1, 1]} : vector<8x96xf32> to vector<8x32xf32>
    %182 = arith.addf %180, %181 : vector<8x32xf32>
    %183 = arith.negf %182 : vector<8x32xf32>
    %184 = math.exp %183 : vector<8x32xf32>
    %cst_77 = arith.constant 1.000000e+00 : f32
    %185 = vector.broadcast %cst_77 : f32 to vector<8x32xf32>
    %186 = arith.addf %185, %184 : vector<8x32xf32>
    %187 = arith.divf %185, %186 : vector<8x32xf32>
    %188 = vector.extract_strided_slice %169 {offsets = [0, 64], sizes = [8, 32], strides = [1, 1]} : vector<8x96xf32> to vector<8x32xf32>
    %189 = vector.extract_strided_slice %171 {offsets = [0, 64], sizes = [8, 32], strides = [1, 1]} : vector<8x96xf32> to vector<8x32xf32>
    %190 = arith.addf %189, %21 : vector<8x32xf32>
    %191 = arith.mulf %179, %190 : vector<8x32xf32>
    %192 = arith.addf %188, %191 : vector<8x32xf32>
    %193 = math.tanh %192 : vector<8x32xf32>
    %cst_78 = arith.constant 1.000000e+00 : f32
    %194 = vector.broadcast %cst_78 : f32 to vector<8x32xf32>
    %195 = arith.subf %194, %187 : vector<8x32xf32>
    %196 = arith.mulf %195, %193 : vector<8x32xf32>
    %197 = arith.mulf %187, %127 : vector<8x32xf32>
    %198 = arith.addf %196, %197 : vector<8x32xf32>
    %c5_79 = arith.constant 5 : index
    %c0_80 = arith.constant 0 : index
    %c0_81 = arith.constant 0 : index
    %199 = vector.load %arg15[%c5_79, %c0_80, %c0_81] : memref<8x8x96xf32, #tpu.memory_space<vmem>>, vector<1x8x96xf32>
    %200 = vector.shape_cast %199 : vector<1x8x96xf32> to vector<8x96xf32>
    %c0_82 = arith.constant 0 : index
    %c0_83 = arith.constant 0 : index
    %201 = vector.load %arg7[%c0_82, %c0_83] : memref<32x96xf32, #tpu.memory_space<vmem>>, vector<32x96xf32>
    %cst_84 = arith.constant dense<0.000000e+00> : vector<8x96xf32>
    %202 = tpu.matmul %158, %201, %cst_84 {dimension_numbers = #tpu.dot_dimension_numbers<[1], [0], [0], [1], [0, 0, 1, 1], [], []>} : vector<8x32xf32>, vector<32x96xf32>, vector<8x96xf32> -> vector<8x96xf32>
    %203 = vector.extract_strided_slice %200 {offsets = [0, 0], sizes = [8, 32], strides = [1, 1]} : vector<8x96xf32> to vector<8x32xf32>
    %204 = vector.extract_strided_slice %202 {offsets = [0, 0], sizes = [8, 32], strides = [1, 1]} : vector<8x96xf32> to vector<8x32xf32>
    %205 = arith.addf %203, %204 : vector<8x32xf32>
    %206 = arith.negf %205 : vector<8x32xf32>
    %207 = math.exp %206 : vector<8x32xf32>
    %cst_85 = arith.constant 1.000000e+00 : f32
    %208 = vector.broadcast %cst_85 : f32 to vector<8x32xf32>
    %209 = arith.addf %208, %207 : vector<8x32xf32>
    %210 = arith.divf %208, %209 : vector<8x32xf32>
    %211 = vector.extract_strided_slice %200 {offsets = [0, 32], sizes = [8, 32], strides = [1, 1]} : vector<8x96xf32> to vector<8x32xf32>
    %212 = vector.extract_strided_slice %202 {offsets = [0, 32], sizes = [8, 32], strides = [1, 1]} : vector<8x96xf32> to vector<8x32xf32>
    %213 = arith.addf %211, %212 : vector<8x32xf32>
    %214 = arith.negf %213 : vector<8x32xf32>
    %215 = math.exp %214 : vector<8x32xf32>
    %cst_86 = arith.constant 1.000000e+00 : f32
    %216 = vector.broadcast %cst_86 : f32 to vector<8x32xf32>
    %217 = arith.addf %216, %215 : vector<8x32xf32>
    %218 = arith.divf %216, %217 : vector<8x32xf32>
    %219 = vector.extract_strided_slice %200 {offsets = [0, 64], sizes = [8, 32], strides = [1, 1]} : vector<8x96xf32> to vector<8x32xf32>
    %220 = vector.extract_strided_slice %202 {offsets = [0, 64], sizes = [8, 32], strides = [1, 1]} : vector<8x96xf32> to vector<8x32xf32>
    %221 = arith.addf %220, %24 : vector<8x32xf32>
    %222 = arith.mulf %210, %221 : vector<8x32xf32>
    %223 = arith.addf %219, %222 : vector<8x32xf32>
    %224 = math.tanh %223 : vector<8x32xf32>
    %cst_87 = arith.constant 1.000000e+00 : f32
    %225 = vector.broadcast %cst_87 : f32 to vector<8x32xf32>
    %226 = arith.subf %225, %218 : vector<8x32xf32>
    %227 = arith.mulf %226, %224 : vector<8x32xf32>
    %228 = arith.mulf %218, %158 : vector<8x32xf32>
    %229 = arith.addf %227, %228 : vector<8x32xf32>
    %c2 = arith.constant 2 : index
    %c0_88 = arith.constant 0 : index
    %c0_89 = arith.constant 0 : index
    %230 = vector.load %arg16[%c2, %c0_88, %c0_89] : memref<8x8x32xf32, #tpu.memory_space<vmem>>, vector<1x8x32xf32>
    %231 = vector.shape_cast %230 : vector<1x8x32xf32> to vector<8x32xf32>
    %232 = vector.shape_cast %229 : vector<8x32xf32> to vector<1x8x32xf32>
    tpu.vector_store %arg16[%c2, %c0_88, %c0_89], %232 {strides = array<i32>} : memref<8x8x32xf32, #tpu.memory_space<vmem>>, vector<1x8x32xf32>,
    %233 = arith.mulf %198, %18 : vector<8x32xf32>
    %cst_90 = arith.constant dense<0.000000e+00> : vector<8xf32>
    %234 = vector.multi_reduction <add>, %233, %cst_90 [1] : vector<8x32xf32> to vector<8xf32>
    %235 = vector.shape_cast %234 : vector<8xf32> to vector<8x1xf32>
    %c2_91 = arith.constant 2 : index
    %c0_92 = arith.constant 0 : index
    %c0_93 = arith.constant 0 : index
    %236 = vector.load %arg17[%c2_91, %c0_92, %c0_93] : memref<8x8x1xf32, #tpu.memory_space<vmem>>, vector<1x8x1xf32>
    %237 = vector.shape_cast %236 : vector<1x8x1xf32> to vector<8x1xf32>
    %238 = vector.shape_cast %235 : vector<8x1xf32> to vector<1x8x1xf32>
    tpu.vector_store %arg17[%c2_91, %c0_92, %c0_93], %238 {strides = array<i32>} : memref<8x8x1xf32, #tpu.memory_space<vmem>>, vector<1x8x1xf32>,
    %c4 = arith.constant 4 : index
    %c0_94 = arith.constant 0 : index
    %c0_95 = arith.constant 0 : index
    %239 = vector.load %arg14[%c4, %c0_94, %c0_95] : memref<8x8x96xf32, #tpu.memory_space<vmem>>, vector<1x8x96xf32>
    %240 = vector.shape_cast %239 : vector<1x8x96xf32> to vector<8x96xf32>
    %c0_96 = arith.constant 0 : index
    %c0_97 = arith.constant 0 : index
    %241 = vector.load %arg3[%c0_96, %c0_97] : memref<32x96xf32, #tpu.memory_space<vmem>>, vector<32x96xf32>
    %cst_98 = arith.constant dense<0.000000e+00> : vector<8x96xf32>
    %242 = tpu.matmul %198, %241, %cst_98 {dimension_numbers = #tpu.dot_dimension_numbers<[1], [0], [0], [1], [0, 0, 1, 1], [], []>} : vector<8x32xf32>, vector<32x96xf32>, vector<8x96xf32> -> vector<8x96xf32>
    %243 = vector.extract_strided_slice %240 {offsets = [0, 0], sizes = [8, 32], strides = [1, 1]} : vector<8x96xf32> to vector<8x32xf32>
    %244 = vector.extract_strided_slice %242 {offsets = [0, 0], sizes = [8, 32], strides = [1, 1]} : vector<8x96xf32> to vector<8x32xf32>
    %245 = arith.addf %243, %244 : vector<8x32xf32>
    %246 = arith.negf %245 : vector<8x32xf32>
    %247 = math.exp %246 : vector<8x32xf32>
    %cst_99 = arith.constant 1.000000e+00 : f32
    %248 = vector.broadcast %cst_99 : f32 to vector<8x32xf32>
    %249 = arith.addf %248, %247 : vector<8x32xf32>
    %250 = arith.divf %248, %249 : vector<8x32xf32>
    %251 = vector.extract_strided_slice %240 {offsets = [0, 32], sizes = [8, 32], strides = [1, 1]} : vector<8x96xf32> to vector<8x32xf32>
    %252 = vector.extract_strided_slice %242 {offsets = [0, 32], sizes = [8, 32], strides = [1, 1]} : vector<8x96xf32> to vector<8x32xf32>
    %253 = arith.addf %251, %252 : vector<8x32xf32>
    %254 = arith.negf %253 : vector<8x32xf32>
    %255 = math.exp %254 : vector<8x32xf32>
    %cst_100 = arith.constant 1.000000e+00 : f32
    %256 = vector.broadcast %cst_100 : f32 to vector<8x32xf32>
    %257 = arith.addf %256, %255 : vector<8x32xf32>
    %258 = arith.divf %256, %257 : vector<8x32xf32>
    %259 = vector.extract_strided_slice %240 {offsets = [0, 64], sizes = [8, 32], strides = [1, 1]} : vector<8x96xf32> to vector<8x32xf32>
    %260 = vector.extract_strided_slice %242 {offsets = [0, 64], sizes = [8, 32], strides = [1, 1]} : vector<8x96xf32> to vector<8x32xf32>
    %261 = arith.addf %260, %21 : vector<8x32xf32>
    %262 = arith.mulf %250, %261 : vector<8x32xf32>
    %263 = arith.addf %259, %262 : vector<8x32xf32>
    %264 = math.tanh %263 : vector<8x32xf32>
    %cst_101 = arith.constant 1.000000e+00 : f32
    %265 = vector.broadcast %cst_101 : f32 to vector<8x32xf32>
    %266 = arith.subf %265, %258 : vector<8x32xf32>
    %267 = arith.mulf %266, %264 : vector<8x32xf32>
    %268 = arith.mulf %258, %198 : vector<8x32xf32>
    %269 = arith.addf %267, %268 : vector<8x32xf32>
    %c4_102 = arith.constant 4 : index
    %c0_103 = arith.constant 0 : index
    %c0_104 = arith.constant 0 : index
    %270 = vector.load %arg15[%c4_102, %c0_103, %c0_104] : memref<8x8x96xf32, #tpu.memory_space<vmem>>, vector<1x8x96xf32>
    %271 = vector.shape_cast %270 : vector<1x8x96xf32> to vector<8x96xf32>
    %c0_105 = arith.constant 0 : index
    %c0_106 = arith.constant 0 : index
    %272 = vector.load %arg7[%c0_105, %c0_106] : memref<32x96xf32, #tpu.memory_space<vmem>>, vector<32x96xf32>
    %cst_107 = arith.constant dense<0.000000e+00> : vector<8x96xf32>
    %273 = tpu.matmul %229, %272, %cst_107 {dimension_numbers = #tpu.dot_dimension_numbers<[1], [0], [0], [1], [0, 0, 1, 1], [], []>} : vector<8x32xf32>, vector<32x96xf32>, vector<8x96xf32> -> vector<8x96xf32>
    %274 = vector.extract_strided_slice %271 {offsets = [0, 0], sizes = [8, 32], strides = [1, 1]} : vector<8x96xf32> to vector<8x32xf32>
    %275 = vector.extract_strided_slice %273 {offsets = [0, 0], sizes = [8, 32], strides = [1, 1]} : vector<8x96xf32> to vector<8x32xf32>
    %276 = arith.addf %274, %275 : vector<8x32xf32>
    %277 = arith.negf %276 : vector<8x32xf32>
    %278 = math.exp %277 : vector<8x32xf32>
    %cst_108 = arith.constant 1.000000e+00 : f32
    %279 = vector.broadcast %cst_108 : f32 to vector<8x32xf32>
    %280 = arith.addf %279, %278 : vector<8x32xf32>
    %281 = arith.divf %279, %280 : vector<8x32xf32>
    %282 = vector.extract_strided_slice %271 {offsets = [0, 32], sizes = [8, 32], strides = [1, 1]} : vector<8x96xf32> to vector<8x32xf32>
    %283 = vector.extract_strided_slice %273 {offsets = [0, 32], sizes = [8, 32], strides = [1, 1]} : vector<8x96xf32> to vector<8x32xf32>
    %284 = arith.addf %282, %283 : vector<8x32xf32>
    %285 = arith.negf %284 : vector<8x32xf32>
    %286 = math.exp %285 : vector<8x32xf32>
    %cst_109 = arith.constant 1.000000e+00 : f32
    %287 = vector.broadcast %cst_109 : f32 to vector<8x32xf32>
    %288 = arith.addf %287, %286 : vector<8x32xf32>
    %289 = arith.divf %287, %288 : vector<8x32xf32>
    %290 = vector.extract_strided_slice %271 {offsets = [0, 64], sizes = [8, 32], strides = [1, 1]} : vector<8x96xf32> to vector<8x32xf32>
    %291 = vector.extract_strided_slice %273 {offsets = [0, 64], sizes = [8, 32], strides = [1, 1]} : vector<8x96xf32> to vector<8x32xf32>
    %292 = arith.addf %291, %24 : vector<8x32xf32>
    %293 = arith.mulf %281, %292 : vector<8x32xf32>
    %294 = arith.addf %290, %293 : vector<8x32xf32>
    %295 = math.tanh %294 : vector<8x32xf32>
    %cst_110 = arith.constant 1.000000e+00 : f32
    %296 = vector.broadcast %cst_110 : f32 to vector<8x32xf32>
    %297 = arith.subf %296, %289 : vector<8x32xf32>
    %298 = arith.mulf %297, %295 : vector<8x32xf32>
    %299 = arith.mulf %289, %229 : vector<8x32xf32>
    %300 = arith.addf %298, %299 : vector<8x32xf32>
    %c3 = arith.constant 3 : index
    %c0_111 = arith.constant 0 : index
    %c0_112 = arith.constant 0 : index
    %301 = vector.load %arg16[%c3, %c0_111, %c0_112] : memref<8x8x32xf32, #tpu.memory_space<vmem>>, vector<1x8x32xf32>
    %302 = vector.shape_cast %301 : vector<1x8x32xf32> to vector<8x32xf32>
    %303 = vector.shape_cast %300 : vector<8x32xf32> to vector<1x8x32xf32>
    tpu.vector_store %arg16[%c3, %c0_111, %c0_112], %303 {strides = array<i32>} : memref<8x8x32xf32, #tpu.memory_space<vmem>>, vector<1x8x32xf32>,
    %304 = arith.mulf %269, %18 : vector<8x32xf32>
    %cst_113 = arith.constant dense<0.000000e+00> : vector<8xf32>
    %305 = vector.multi_reduction <add>, %304, %cst_113 [1] : vector<8x32xf32> to vector<8xf32>
    %306 = vector.shape_cast %305 : vector<8xf32> to vector<8x1xf32>
    %c3_114 = arith.constant 3 : index
    %c0_115 = arith.constant 0 : index
    %c0_116 = arith.constant 0 : index
    %307 = vector.load %arg17[%c3_114, %c0_115, %c0_116] : memref<8x8x1xf32, #tpu.memory_space<vmem>>, vector<1x8x1xf32>
    %308 = vector.shape_cast %307 : vector<1x8x1xf32> to vector<8x1xf32>
    %309 = vector.shape_cast %306 : vector<8x1xf32> to vector<1x8x1xf32>
    tpu.vector_store %arg17[%c3_114, %c0_115, %c0_116], %309 {strides = array<i32>} : memref<8x8x1xf32, #tpu.memory_space<vmem>>, vector<1x8x1xf32>,
    %c3_117 = arith.constant 3 : index
    %c0_118 = arith.constant 0 : index
    %c0_119 = arith.constant 0 : index
    %310 = vector.load %arg14[%c3_117, %c0_118, %c0_119] : memref<8x8x96xf32, #tpu.memory_space<vmem>>, vector<1x8x96xf32>
    %311 = vector.shape_cast %310 : vector<1x8x96xf32> to vector<8x96xf32>
    %c0_120 = arith.constant 0 : index
    %c0_121 = arith.constant 0 : index
    %312 = vector.load %arg3[%c0_120, %c0_121] : memref<32x96xf32, #tpu.memory_space<vmem>>, vector<32x96xf32>
    %cst_122 = arith.constant dense<0.000000e+00> : vector<8x96xf32>
    %313 = tpu.matmul %269, %312, %cst_122 {dimension_numbers = #tpu.dot_dimension_numbers<[1], [0], [0], [1], [0, 0, 1, 1], [], []>} : vector<8x32xf32>, vector<32x96xf32>, vector<8x96xf32> -> vector<8x96xf32>
    %314 = vector.extract_strided_slice %311 {offsets = [0, 0], sizes = [8, 32], strides = [1, 1]} : vector<8x96xf32> to vector<8x32xf32>
    %315 = vector.extract_strided_slice %313 {offsets = [0, 0], sizes = [8, 32], strides = [1, 1]} : vector<8x96xf32> to vector<8x32xf32>
    %316 = arith.addf %314, %315 : vector<8x32xf32>
    %317 = arith.negf %316 : vector<8x32xf32>
    %318 = math.exp %317 : vector<8x32xf32>
    %cst_123 = arith.constant 1.000000e+00 : f32
    %319 = vector.broadcast %cst_123 : f32 to vector<8x32xf32>
    %320 = arith.addf %319, %318 : vector<8x32xf32>
    %321 = arith.divf %319, %320 : vector<8x32xf32>
    %322 = vector.extract_strided_slice %311 {offsets = [0, 32], sizes = [8, 32], strides = [1, 1]} : vector<8x96xf32> to vector<8x32xf32>
    %323 = vector.extract_strided_slice %313 {offsets = [0, 32], sizes = [8, 32], strides = [1, 1]} : vector<8x96xf32> to vector<8x32xf32>
    %324 = arith.addf %322, %323 : vector<8x32xf32>
    %325 = arith.negf %324 : vector<8x32xf32>
    %326 = math.exp %325 : vector<8x32xf32>
    %cst_124 = arith.constant 1.000000e+00 : f32
    %327 = vector.broadcast %cst_124 : f32 to vector<8x32xf32>
    %328 = arith.addf %327, %326 : vector<8x32xf32>
    %329 = arith.divf %327, %328 : vector<8x32xf32>
    %330 = vector.extract_strided_slice %311 {offsets = [0, 64], sizes = [8, 32], strides = [1, 1]} : vector<8x96xf32> to vector<8x32xf32>
    %331 = vector.extract_strided_slice %313 {offsets = [0, 64], sizes = [8, 32], strides = [1, 1]} : vector<8x96xf32> to vector<8x32xf32>
    %332 = arith.addf %331, %21 : vector<8x32xf32>
    %333 = arith.mulf %321, %332 : vector<8x32xf32>
    %334 = arith.addf %330, %333 : vector<8x32xf32>
    %335 = math.tanh %334 : vector<8x32xf32>
    %cst_125 = arith.constant 1.000000e+00 : f32
    %336 = vector.broadcast %cst_125 : f32 to vector<8x32xf32>
    %337 = arith.subf %336, %329 : vector<8x32xf32>
    %338 = arith.mulf %337, %335 : vector<8x32xf32>
    %339 = arith.mulf %329, %269 : vector<8x32xf32>
    %340 = arith.addf %338, %339 : vector<8x32xf32>
    %c3_126 = arith.constant 3 : index
    %c0_127 = arith.constant 0 : index
    %c0_128 = arith.constant 0 : index
    %341 = vector.load %arg15[%c3_126, %c0_127, %c0_128] : memref<8x8x96xf32, #tpu.memory_space<vmem>>, vector<1x8x96xf32>
    %342 = vector.shape_cast %341 : vector<1x8x96xf32> to vector<8x96xf32>
    %c0_129 = arith.constant 0 : index
    %c0_130 = arith.constant 0 : index
    %343 = vector.load %arg7[%c0_129, %c0_130] : memref<32x96xf32, #tpu.memory_space<vmem>>, vector<32x96xf32>
    %cst_131 = arith.constant dense<0.000000e+00> : vector<8x96xf32>
    %344 = tpu.matmul %300, %343, %cst_131 {dimension_numbers = #tpu.dot_dimension_numbers<[1], [0], [0], [1], [0, 0, 1, 1], [], []>} : vector<8x32xf32>, vector<32x96xf32>, vector<8x96xf32> -> vector<8x96xf32>
    %345 = vector.extract_strided_slice %342 {offsets = [0, 0], sizes = [8, 32], strides = [1, 1]} : vector<8x96xf32> to vector<8x32xf32>
    %346 = vector.extract_strided_slice %344 {offsets = [0, 0], sizes = [8, 32], strides = [1, 1]} : vector<8x96xf32> to vector<8x32xf32>
    %347 = arith.addf %345, %346 : vector<8x32xf32>
    %348 = arith.negf %347 : vector<8x32xf32>
    %349 = math.exp %348 : vector<8x32xf32>
    %cst_132 = arith.constant 1.000000e+00 : f32
    %350 = vector.broadcast %cst_132 : f32 to vector<8x32xf32>
    %351 = arith.addf %350, %349 : vector<8x32xf32>
    %352 = arith.divf %350, %351 : vector<8x32xf32>
    %353 = vector.extract_strided_slice %342 {offsets = [0, 32], sizes = [8, 32], strides = [1, 1]} : vector<8x96xf32> to vector<8x32xf32>
    %354 = vector.extract_strided_slice %344 {offsets = [0, 32], sizes = [8, 32], strides = [1, 1]} : vector<8x96xf32> to vector<8x32xf32>
    %355 = arith.addf %353, %354 : vector<8x32xf32>
    %356 = arith.negf %355 : vector<8x32xf32>
    %357 = math.exp %356 : vector<8x32xf32>
    %cst_133 = arith.constant 1.000000e+00 : f32
    %358 = vector.broadcast %cst_133 : f32 to vector<8x32xf32>
    %359 = arith.addf %358, %357 : vector<8x32xf32>
    %360 = arith.divf %358, %359 : vector<8x32xf32>
    %361 = vector.extract_strided_slice %342 {offsets = [0, 64], sizes = [8, 32], strides = [1, 1]} : vector<8x96xf32> to vector<8x32xf32>
    %362 = vector.extract_strided_slice %344 {offsets = [0, 64], sizes = [8, 32], strides = [1, 1]} : vector<8x96xf32> to vector<8x32xf32>
    %363 = arith.addf %362, %24 : vector<8x32xf32>
    %364 = arith.mulf %352, %363 : vector<8x32xf32>
    %365 = arith.addf %361, %364 : vector<8x32xf32>
    %366 = math.tanh %365 : vector<8x32xf32>
    %cst_134 = arith.constant 1.000000e+00 : f32
    %367 = vector.broadcast %cst_134 : f32 to vector<8x32xf32>
    %368 = arith.subf %367, %360 : vector<8x32xf32>
    %369 = arith.mulf %368, %366 : vector<8x32xf32>
    %370 = arith.mulf %360, %300 : vector<8x32xf32>
    %371 = arith.addf %369, %370 : vector<8x32xf32>
    %c4_135 = arith.constant 4 : index
    %c0_136 = arith.constant 0 : index
    %c0_137 = arith.constant 0 : index
    %372 = vector.load %arg16[%c4_135, %c0_136, %c0_137] : memref<8x8x32xf32, #tpu.memory_space<vmem>>, vector<1x8x32xf32>
    %373 = vector.shape_cast %372 : vector<1x8x32xf32> to vector<8x32xf32>
    %374 = vector.shape_cast %371 : vector<8x32xf32> to vector<1x8x32xf32>
    tpu.vector_store %arg16[%c4_135, %c0_136, %c0_137], %374 {strides = array<i32>} : memref<8x8x32xf32, #tpu.memory_space<vmem>>, vector<1x8x32xf32>,
    %375 = arith.mulf %340, %18 : vector<8x32xf32>
    %cst_138 = arith.constant dense<0.000000e+00> : vector<8xf32>
    %376 = vector.multi_reduction <add>, %375, %cst_138 [1] : vector<8x32xf32> to vector<8xf32>
    %377 = vector.shape_cast %376 : vector<8xf32> to vector<8x1xf32>
    %c4_139 = arith.constant 4 : index
    %c0_140 = arith.constant 0 : index
    %c0_141 = arith.constant 0 : index
    %378 = vector.load %arg17[%c4_139, %c0_140, %c0_141] : memref<8x8x1xf32, #tpu.memory_space<vmem>>, vector<1x8x1xf32>
    %379 = vector.shape_cast %378 : vector<1x8x1xf32> to vector<8x1xf32>
    %380 = vector.shape_cast %377 : vector<8x1xf32> to vector<1x8x1xf32>
    tpu.vector_store %arg17[%c4_139, %c0_140, %c0_141], %380 {strides = array<i32>} : memref<8x8x1xf32, #tpu.memory_space<vmem>>, vector<1x8x1xf32>,
    %c2_142 = arith.constant 2 : index
    %c0_143 = arith.constant 0 : index
    %c0_144 = arith.constant 0 : index
    %381 = vector.load %arg14[%c2_142, %c0_143, %c0_144] : memref<8x8x96xf32, #tpu.memory_space<vmem>>, vector<1x8x96xf32>
    %382 = vector.shape_cast %381 : vector<1x8x96xf32> to vector<8x96xf32>
    %c0_145 = arith.constant 0 : index
    %c0_146 = arith.constant 0 : index
    %383 = vector.load %arg3[%c0_145, %c0_146] : memref<32x96xf32, #tpu.memory_space<vmem>>, vector<32x96xf32>
    %cst_147 = arith.constant dense<0.000000e+00> : vector<8x96xf32>
    %384 = tpu.matmul %340, %383, %cst_147 {dimension_numbers = #tpu.dot_dimension_numbers<[1], [0], [0], [1], [0, 0, 1, 1], [], []>} : vector<8x32xf32>, vector<32x96xf32>, vector<8x96xf32> -> vector<8x96xf32>
    %385 = vector.extract_strided_slice %382 {offsets = [0, 0], sizes = [8, 32], strides = [1, 1]} : vector<8x96xf32> to vector<8x32xf32>
    %386 = vector.extract_strided_slice %384 {offsets = [0, 0], sizes = [8, 32], strides = [1, 1]} : vector<8x96xf32> to vector<8x32xf32>
    %387 = arith.addf %385, %386 : vector<8x32xf32>
    %388 = arith.negf %387 : vector<8x32xf32>
    %389 = math.exp %388 : vector<8x32xf32>
    %cst_148 = arith.constant 1.000000e+00 : f32
    %390 = vector.broadcast %cst_148 : f32 to vector<8x32xf32>
    %391 = arith.addf %390, %389 : vector<8x32xf32>
    %392 = arith.divf %390, %391 : vector<8x32xf32>
    %393 = vector.extract_strided_slice %382 {offsets = [0, 32], sizes = [8, 32], strides = [1, 1]} : vector<8x96xf32> to vector<8x32xf32>
    %394 = vector.extract_strided_slice %384 {offsets = [0, 32], sizes = [8, 32], strides = [1, 1]} : vector<8x96xf32> to vector<8x32xf32>
    %395 = arith.addf %393, %394 : vector<8x32xf32>
    %396 = arith.negf %395 : vector<8x32xf32>
    %397 = math.exp %396 : vector<8x32xf32>
    %cst_149 = arith.constant 1.000000e+00 : f32
    %398 = vector.broadcast %cst_149 : f32 to vector<8x32xf32>
    %399 = arith.addf %398, %397 : vector<8x32xf32>
    %400 = arith.divf %398, %399 : vector<8x32xf32>
    %401 = vector.extract_strided_slice %382 {offsets = [0, 64], sizes = [8, 32], strides = [1, 1]} : vector<8x96xf32> to vector<8x32xf32>
    %402 = vector.extract_strided_slice %384 {offsets = [0, 64], sizes = [8, 32], strides = [1, 1]} : vector<8x96xf32> to vector<8x32xf32>
    %403 = arith.addf %402, %21 : vector<8x32xf32>
    %404 = arith.mulf %392, %403 : vector<8x32xf32>
    %405 = arith.addf %401, %404 : vector<8x32xf32>
    %406 = math.tanh %405 : vector<8x32xf32>
    %cst_150 = arith.constant 1.000000e+00 : f32
    %407 = vector.broadcast %cst_150 : f32 to vector<8x32xf32>
    %408 = arith.subf %407, %400 : vector<8x32xf32>
    %409 = arith.mulf %408, %406 : vector<8x32xf32>
    %410 = arith.mulf %400, %340 : vector<8x32xf32>
    %411 = arith.addf %409, %410 : vector<8x32xf32>
    %c2_151 = arith.constant 2 : index
    %c0_152 = arith.constant 0 : index
    %c0_153 = arith.constant 0 : index
    %412 = vector.load %arg15[%c2_151, %c0_152, %c0_153] : memref<8x8x96xf32, #tpu.memory_space<vmem>>, vector<1x8x96xf32>
    %413 = vector.shape_cast %412 : vector<1x8x96xf32> to vector<8x96xf32>
    %c0_154 = arith.constant 0 : index
    %c0_155 = arith.constant 0 : index
    %414 = vector.load %arg7[%c0_154, %c0_155] : memref<32x96xf32, #tpu.memory_space<vmem>>, vector<32x96xf32>
    %cst_156 = arith.constant dense<0.000000e+00> : vector<8x96xf32>
    %415 = tpu.matmul %371, %414, %cst_156 {dimension_numbers = #tpu.dot_dimension_numbers<[1], [0], [0], [1], [0, 0, 1, 1], [], []>} : vector<8x32xf32>, vector<32x96xf32>, vector<8x96xf32> -> vector<8x96xf32>
    %416 = vector.extract_strided_slice %413 {offsets = [0, 0], sizes = [8, 32], strides = [1, 1]} : vector<8x96xf32> to vector<8x32xf32>
    %417 = vector.extract_strided_slice %415 {offsets = [0, 0], sizes = [8, 32], strides = [1, 1]} : vector<8x96xf32> to vector<8x32xf32>
    %418 = arith.addf %416, %417 : vector<8x32xf32>
    %419 = arith.negf %418 : vector<8x32xf32>
    %420 = math.exp %419 : vector<8x32xf32>
    %cst_157 = arith.constant 1.000000e+00 : f32
    %421 = vector.broadcast %cst_157 : f32 to vector<8x32xf32>
    %422 = arith.addf %421, %420 : vector<8x32xf32>
    %423 = arith.divf %421, %422 : vector<8x32xf32>
    %424 = vector.extract_strided_slice %413 {offsets = [0, 32], sizes = [8, 32], strides = [1, 1]} : vector<8x96xf32> to vector<8x32xf32>
    %425 = vector.extract_strided_slice %415 {offsets = [0, 32], sizes = [8, 32], strides = [1, 1]} : vector<8x96xf32> to vector<8x32xf32>
    %426 = arith.addf %424, %425 : vector<8x32xf32>
    %427 = arith.negf %426 : vector<8x32xf32>
    %428 = math.exp %427 : vector<8x32xf32>
    %cst_158 = arith.constant 1.000000e+00 : f32
    %429 = vector.broadcast %cst_158 : f32 to vector<8x32xf32>
    %430 = arith.addf %429, %428 : vector<8x32xf32>
    %431 = arith.divf %429, %430 : vector<8x32xf32>
    %432 = vector.extract_strided_slice %413 {offsets = [0, 64], sizes = [8, 32], strides = [1, 1]} : vector<8x96xf32> to vector<8x32xf32>
    %433 = vector.extract_strided_slice %415 {offsets = [0, 64], sizes = [8, 32], strides = [1, 1]} : vector<8x96xf32> to vector<8x32xf32>
    %434 = arith.addf %433, %24 : vector<8x32xf32>
    %435 = arith.mulf %423, %434 : vector<8x32xf32>
    %436 = arith.addf %432, %435 : vector<8x32xf32>
    %437 = math.tanh %436 : vector<8x32xf32>
    %cst_159 = arith.constant 1.000000e+00 : f32
    %438 = vector.broadcast %cst_159 : f32 to vector<8x32xf32>
    %439 = arith.subf %438, %431 : vector<8x32xf32>
    %440 = arith.mulf %439, %437 : vector<8x32xf32>
    %441 = arith.mulf %431, %371 : vector<8x32xf32>
    %442 = arith.addf %440, %441 : vector<8x32xf32>
    %c5_160 = arith.constant 5 : index
    %c0_161 = arith.constant 0 : index
    %c0_162 = arith.constant 0 : index
    %443 = vector.load %arg16[%c5_160, %c0_161, %c0_162] : memref<8x8x32xf32, #tpu.memory_space<vmem>>, vector<1x8x32xf32>
    %444 = vector.shape_cast %443 : vector<1x8x32xf32> to vector<8x32xf32>
    %445 = vector.shape_cast %442 : vector<8x32xf32> to vector<1x8x32xf32>
    tpu.vector_store %arg16[%c5_160, %c0_161, %c0_162], %445 {strides = array<i32>} : memref<8x8x32xf32, #tpu.memory_space<vmem>>, vector<1x8x32xf32>,
    %446 = arith.mulf %411, %18 : vector<8x32xf32>
    %cst_163 = arith.constant dense<0.000000e+00> : vector<8xf32>
    %447 = vector.multi_reduction <add>, %446, %cst_163 [1] : vector<8x32xf32> to vector<8xf32>
    %448 = vector.shape_cast %447 : vector<8xf32> to vector<8x1xf32>
    %c5_164 = arith.constant 5 : index
    %c0_165 = arith.constant 0 : index
    %c0_166 = arith.constant 0 : index
    %449 = vector.load %arg17[%c5_164, %c0_165, %c0_166] : memref<8x8x1xf32, #tpu.memory_space<vmem>>, vector<1x8x1xf32>
    %450 = vector.shape_cast %449 : vector<1x8x1xf32> to vector<8x1xf32>
    %451 = vector.shape_cast %448 : vector<8x1xf32> to vector<1x8x1xf32>
    tpu.vector_store %arg17[%c5_164, %c0_165, %c0_166], %451 {strides = array<i32>} : memref<8x8x1xf32, #tpu.memory_space<vmem>>, vector<1x8x1xf32>,
    %c1_167 = arith.constant 1 : index
    %c0_168 = arith.constant 0 : index
    %c0_169 = arith.constant 0 : index
    %452 = vector.load %arg14[%c1_167, %c0_168, %c0_169] : memref<8x8x96xf32, #tpu.memory_space<vmem>>, vector<1x8x96xf32>
    %453 = vector.shape_cast %452 : vector<1x8x96xf32> to vector<8x96xf32>
    %c0_170 = arith.constant 0 : index
    %c0_171 = arith.constant 0 : index
    %454 = vector.load %arg3[%c0_170, %c0_171] : memref<32x96xf32, #tpu.memory_space<vmem>>, vector<32x96xf32>
    %cst_172 = arith.constant dense<0.000000e+00> : vector<8x96xf32>
    %455 = tpu.matmul %411, %454, %cst_172 {dimension_numbers = #tpu.dot_dimension_numbers<[1], [0], [0], [1], [0, 0, 1, 1], [], []>} : vector<8x32xf32>, vector<32x96xf32>, vector<8x96xf32> -> vector<8x96xf32>
    %456 = vector.extract_strided_slice %453 {offsets = [0, 0], sizes = [8, 32], strides = [1, 1]} : vector<8x96xf32> to vector<8x32xf32>
    %457 = vector.extract_strided_slice %455 {offsets = [0, 0], sizes = [8, 32], strides = [1, 1]} : vector<8x96xf32> to vector<8x32xf32>
    %458 = arith.addf %456, %457 : vector<8x32xf32>
    %459 = arith.negf %458 : vector<8x32xf32>
    %460 = math.exp %459 : vector<8x32xf32>
    %cst_173 = arith.constant 1.000000e+00 : f32
    %461 = vector.broadcast %cst_173 : f32 to vector<8x32xf32>
    %462 = arith.addf %461, %460 : vector<8x32xf32>
    %463 = arith.divf %461, %462 : vector<8x32xf32>
    %464 = vector.extract_strided_slice %453 {offsets = [0, 32], sizes = [8, 32], strides = [1, 1]} : vector<8x96xf32> to vector<8x32xf32>
    %465 = vector.extract_strided_slice %455 {offsets = [0, 32], sizes = [8, 32], strides = [1, 1]} : vector<8x96xf32> to vector<8x32xf32>
    %466 = arith.addf %464, %465 : vector<8x32xf32>
    %467 = arith.negf %466 : vector<8x32xf32>
    %468 = math.exp %467 : vector<8x32xf32>
    %cst_174 = arith.constant 1.000000e+00 : f32
    %469 = vector.broadcast %cst_174 : f32 to vector<8x32xf32>
    %470 = arith.addf %469, %468 : vector<8x32xf32>
    %471 = arith.divf %469, %470 : vector<8x32xf32>
    %472 = vector.extract_strided_slice %453 {offsets = [0, 64], sizes = [8, 32], strides = [1, 1]} : vector<8x96xf32> to vector<8x32xf32>
    %473 = vector.extract_strided_slice %455 {offsets = [0, 64], sizes = [8, 32], strides = [1, 1]} : vector<8x96xf32> to vector<8x32xf32>
    %474 = arith.addf %473, %21 : vector<8x32xf32>
    %475 = arith.mulf %463, %474 : vector<8x32xf32>
    %476 = arith.addf %472, %475 : vector<8x32xf32>
    %477 = math.tanh %476 : vector<8x32xf32>
    %cst_175 = arith.constant 1.000000e+00 : f32
    %478 = vector.broadcast %cst_175 : f32 to vector<8x32xf32>
    %479 = arith.subf %478, %471 : vector<8x32xf32>
    %480 = arith.mulf %479, %477 : vector<8x32xf32>
    %481 = arith.mulf %471, %411 : vector<8x32xf32>
    %482 = arith.addf %480, %481 : vector<8x32xf32>
    %c1_176 = arith.constant 1 : index
    %c0_177 = arith.constant 0 : index
    %c0_178 = arith.constant 0 : index
    %483 = vector.load %arg15[%c1_176, %c0_177, %c0_178] : memref<8x8x96xf32, #tpu.memory_space<vmem>>, vector<1x8x96xf32>
    %484 = vector.shape_cast %483 : vector<1x8x96xf32> to vector<8x96xf32>
    %c0_179 = arith.constant 0 : index
    %c0_180 = arith.constant 0 : index
    %485 = vector.load %arg7[%c0_179, %c0_180] : memref<32x96xf32, #tpu.memory_space<vmem>>, vector<32x96xf32>
    %cst_181 = arith.constant dense<0.000000e+00> : vector<8x96xf32>
    %486 = tpu.matmul %442, %485, %cst_181 {dimension_numbers = #tpu.dot_dimension_numbers<[1], [0], [0], [1], [0, 0, 1, 1], [], []>} : vector<8x32xf32>, vector<32x96xf32>, vector<8x96xf32> -> vector<8x96xf32>
    %487 = vector.extract_strided_slice %484 {offsets = [0, 0], sizes = [8, 32], strides = [1, 1]} : vector<8x96xf32> to vector<8x32xf32>
    %488 = vector.extract_strided_slice %486 {offsets = [0, 0], sizes = [8, 32], strides = [1, 1]} : vector<8x96xf32> to vector<8x32xf32>
    %489 = arith.addf %487, %488 : vector<8x32xf32>
    %490 = arith.negf %489 : vector<8x32xf32>
    %491 = math.exp %490 : vector<8x32xf32>
    %cst_182 = arith.constant 1.000000e+00 : f32
    %492 = vector.broadcast %cst_182 : f32 to vector<8x32xf32>
    %493 = arith.addf %492, %491 : vector<8x32xf32>
    %494 = arith.divf %492, %493 : vector<8x32xf32>
    %495 = vector.extract_strided_slice %484 {offsets = [0, 32], sizes = [8, 32], strides = [1, 1]} : vector<8x96xf32> to vector<8x32xf32>
    %496 = vector.extract_strided_slice %486 {offsets = [0, 32], sizes = [8, 32], strides = [1, 1]} : vector<8x96xf32> to vector<8x32xf32>
    %497 = arith.addf %495, %496 : vector<8x32xf32>
    %498 = arith.negf %497 : vector<8x32xf32>
    %499 = math.exp %498 : vector<8x32xf32>
    %cst_183 = arith.constant 1.000000e+00 : f32
    %500 = vector.broadcast %cst_183 : f32 to vector<8x32xf32>
    %501 = arith.addf %500, %499 : vector<8x32xf32>
    %502 = arith.divf %500, %501 : vector<8x32xf32>
    %503 = vector.extract_strided_slice %484 {offsets = [0, 64], sizes = [8, 32], strides = [1, 1]} : vector<8x96xf32> to vector<8x32xf32>
    %504 = vector.extract_strided_slice %486 {offsets = [0, 64], sizes = [8, 32], strides = [1, 1]} : vector<8x96xf32> to vector<8x32xf32>
    %505 = arith.addf %504, %24 : vector<8x32xf32>
    %506 = arith.mulf %494, %505 : vector<8x32xf32>
    %507 = arith.addf %503, %506 : vector<8x32xf32>
    %508 = math.tanh %507 : vector<8x32xf32>
    %cst_184 = arith.constant 1.000000e+00 : f32
    %509 = vector.broadcast %cst_184 : f32 to vector<8x32xf32>
    %510 = arith.subf %509, %502 : vector<8x32xf32>
    %511 = arith.mulf %510, %508 : vector<8x32xf32>
    %512 = arith.mulf %502, %442 : vector<8x32xf32>
    %513 = arith.addf %511, %512 : vector<8x32xf32>
    %c6_185 = arith.constant 6 : index
    %c0_186 = arith.constant 0 : index
    %c0_187 = arith.constant 0 : index
    %514 = vector.load %arg16[%c6_185, %c0_186, %c0_187] : memref<8x8x32xf32, #tpu.memory_space<vmem>>, vector<1x8x32xf32>
    %515 = vector.shape_cast %514 : vector<1x8x32xf32> to vector<8x32xf32>
    %516 = vector.shape_cast %513 : vector<8x32xf32> to vector<1x8x32xf32>
    tpu.vector_store %arg16[%c6_185, %c0_186, %c0_187], %516 {strides = array<i32>} : memref<8x8x32xf32, #tpu.memory_space<vmem>>, vector<1x8x32xf32>,
    %517 = arith.mulf %482, %18 : vector<8x32xf32>
    %cst_188 = arith.constant dense<0.000000e+00> : vector<8xf32>
    %518 = vector.multi_reduction <add>, %517, %cst_188 [1] : vector<8x32xf32> to vector<8xf32>
    %519 = vector.shape_cast %518 : vector<8xf32> to vector<8x1xf32>
    %c6_189 = arith.constant 6 : index
    %c0_190 = arith.constant 0 : index
    %c0_191 = arith.constant 0 : index
    %520 = vector.load %arg17[%c6_189, %c0_190, %c0_191] : memref<8x8x1xf32, #tpu.memory_space<vmem>>, vector<1x8x1xf32>
    %521 = vector.shape_cast %520 : vector<1x8x1xf32> to vector<8x1xf32>
    %522 = vector.shape_cast %519 : vector<8x1xf32> to vector<1x8x1xf32>
    tpu.vector_store %arg17[%c6_189, %c0_190, %c0_191], %522 {strides = array<i32>} : memref<8x8x1xf32, #tpu.memory_space<vmem>>, vector<1x8x1xf32>,
    %c0_192 = arith.constant 0 : index
    %c0_193 = arith.constant 0 : index
    %c0_194 = arith.constant 0 : index
    %523 = vector.load %arg14[%c0_192, %c0_193, %c0_194] : memref<8x8x96xf32, #tpu.memory_space<vmem>>, vector<1x8x96xf32>
    %524 = vector.shape_cast %523 : vector<1x8x96xf32> to vector<8x96xf32>
    %c0_195 = arith.constant 0 : index
    %c0_196 = arith.constant 0 : index
    %525 = vector.load %arg3[%c0_195, %c0_196] : memref<32x96xf32, #tpu.memory_space<vmem>>, vector<32x96xf32>
    %cst_197 = arith.constant dense<0.000000e+00> : vector<8x96xf32>
    %526 = tpu.matmul %482, %525, %cst_197 {dimension_numbers = #tpu.dot_dimension_numbers<[1], [0], [0], [1], [0, 0, 1, 1], [], []>} : vector<8x32xf32>, vector<32x96xf32>, vector<8x96xf32> -> vector<8x96xf32>
    %527 = vector.extract_strided_slice %524 {offsets = [0, 0], sizes = [8, 32], strides = [1, 1]} : vector<8x96xf32> to vector<8x32xf32>
    %528 = vector.extract_strided_slice %526 {offsets = [0, 0], sizes = [8, 32], strides = [1, 1]} : vector<8x96xf32> to vector<8x32xf32>
    %529 = arith.addf %527, %528 : vector<8x32xf32>
    %530 = arith.negf %529 : vector<8x32xf32>
    %531 = math.exp %530 : vector<8x32xf32>
    %cst_198 = arith.constant 1.000000e+00 : f32
    %532 = vector.broadcast %cst_198 : f32 to vector<8x32xf32>
    %533 = arith.addf %532, %531 : vector<8x32xf32>
    %534 = arith.divf %532, %533 : vector<8x32xf32>
    %535 = vector.extract_strided_slice %524 {offsets = [0, 32], sizes = [8, 32], strides = [1, 1]} : vector<8x96xf32> to vector<8x32xf32>
    %536 = vector.extract_strided_slice %526 {offsets = [0, 32], sizes = [8, 32], strides = [1, 1]} : vector<8x96xf32> to vector<8x32xf32>
    %537 = arith.addf %535, %536 : vector<8x32xf32>
    %538 = arith.negf %537 : vector<8x32xf32>
    %539 = math.exp %538 : vector<8x32xf32>
    %cst_199 = arith.constant 1.000000e+00 : f32
    %540 = vector.broadcast %cst_199 : f32 to vector<8x32xf32>
    %541 = arith.addf %540, %539 : vector<8x32xf32>
    %542 = arith.divf %540, %541 : vector<8x32xf32>
    %543 = vector.extract_strided_slice %524 {offsets = [0, 64], sizes = [8, 32], strides = [1, 1]} : vector<8x96xf32> to vector<8x32xf32>
    %544 = vector.extract_strided_slice %526 {offsets = [0, 64], sizes = [8, 32], strides = [1, 1]} : vector<8x96xf32> to vector<8x32xf32>
    %545 = arith.addf %544, %21 : vector<8x32xf32>
    %546 = arith.mulf %534, %545 : vector<8x32xf32>
    %547 = arith.addf %543, %546 : vector<8x32xf32>
    %548 = math.tanh %547 : vector<8x32xf32>
    %cst_200 = arith.constant 1.000000e+00 : f32
    %549 = vector.broadcast %cst_200 : f32 to vector<8x32xf32>
    %550 = arith.subf %549, %542 : vector<8x32xf32>
    %551 = arith.mulf %550, %548 : vector<8x32xf32>
    %552 = arith.mulf %542, %482 : vector<8x32xf32>
    %553 = arith.addf %551, %552 : vector<8x32xf32>
    %c0_201 = arith.constant 0 : index
    %c0_202 = arith.constant 0 : index
    %c0_203 = arith.constant 0 : index
    %554 = vector.load %arg15[%c0_201, %c0_202, %c0_203] : memref<8x8x96xf32, #tpu.memory_space<vmem>>, vector<1x8x96xf32>
    %555 = vector.shape_cast %554 : vector<1x8x96xf32> to vector<8x96xf32>
    %c0_204 = arith.constant 0 : index
    %c0_205 = arith.constant 0 : index
    %556 = vector.load %arg7[%c0_204, %c0_205] : memref<32x96xf32, #tpu.memory_space<vmem>>, vector<32x96xf32>
    %cst_206 = arith.constant dense<0.000000e+00> : vector<8x96xf32>
    %557 = tpu.matmul %513, %556, %cst_206 {dimension_numbers = #tpu.dot_dimension_numbers<[1], [0], [0], [1], [0, 0, 1, 1], [], []>} : vector<8x32xf32>, vector<32x96xf32>, vector<8x96xf32> -> vector<8x96xf32>
    %558 = vector.extract_strided_slice %555 {offsets = [0, 0], sizes = [8, 32], strides = [1, 1]} : vector<8x96xf32> to vector<8x32xf32>
    %559 = vector.extract_strided_slice %557 {offsets = [0, 0], sizes = [8, 32], strides = [1, 1]} : vector<8x96xf32> to vector<8x32xf32>
    %560 = arith.addf %558, %559 : vector<8x32xf32>
    %561 = arith.negf %560 : vector<8x32xf32>
    %562 = math.exp %561 : vector<8x32xf32>
    %cst_207 = arith.constant 1.000000e+00 : f32
    %563 = vector.broadcast %cst_207 : f32 to vector<8x32xf32>
    %564 = arith.addf %563, %562 : vector<8x32xf32>
    %565 = arith.divf %563, %564 : vector<8x32xf32>
    %566 = vector.extract_strided_slice %555 {offsets = [0, 32], sizes = [8, 32], strides = [1, 1]} : vector<8x96xf32> to vector<8x32xf32>
    %567 = vector.extract_strided_slice %557 {offsets = [0, 32], sizes = [8, 32], strides = [1, 1]} : vector<8x96xf32> to vector<8x32xf32>
    %568 = arith.addf %566, %567 : vector<8x32xf32>
    %569 = arith.negf %568 : vector<8x32xf32>
    %570 = math.exp %569 : vector<8x32xf32>
    %cst_208 = arith.constant 1.000000e+00 : f32
    %571 = vector.broadcast %cst_208 : f32 to vector<8x32xf32>
    %572 = arith.addf %571, %570 : vector<8x32xf32>
    %573 = arith.divf %571, %572 : vector<8x32xf32>
    %574 = vector.extract_strided_slice %555 {offsets = [0, 64], sizes = [8, 32], strides = [1, 1]} : vector<8x96xf32> to vector<8x32xf32>
    %575 = vector.extract_strided_slice %557 {offsets = [0, 64], sizes = [8, 32], strides = [1, 1]} : vector<8x96xf32> to vector<8x32xf32>
    %576 = arith.addf %575, %24 : vector<8x32xf32>
    %577 = arith.mulf %565, %576 : vector<8x32xf32>
    %578 = arith.addf %574, %577 : vector<8x32xf32>
    %579 = math.tanh %578 : vector<8x32xf32>
    %cst_209 = arith.constant 1.000000e+00 : f32
    %580 = vector.broadcast %cst_209 : f32 to vector<8x32xf32>
    %581 = arith.subf %580, %573 : vector<8x32xf32>
    %582 = arith.mulf %581, %579 : vector<8x32xf32>
    %583 = arith.mulf %573, %513 : vector<8x32xf32>
    %584 = arith.addf %582, %583 : vector<8x32xf32>
    %c7_210 = arith.constant 7 : index
    %c0_211 = arith.constant 0 : index
    %c0_212 = arith.constant 0 : index
    %585 = vector.load %arg16[%c7_210, %c0_211, %c0_212] : memref<8x8x32xf32, #tpu.memory_space<vmem>>, vector<1x8x32xf32>
    %586 = vector.shape_cast %585 : vector<1x8x32xf32> to vector<8x32xf32>
    %587 = vector.shape_cast %584 : vector<8x32xf32> to vector<1x8x32xf32>
    tpu.vector_store %arg16[%c7_210, %c0_211, %c0_212], %587 {strides = array<i32>} : memref<8x8x32xf32, #tpu.memory_space<vmem>>, vector<1x8x32xf32>,
    %588 = arith.mulf %553, %18 : vector<8x32xf32>
    %cst_213 = arith.constant dense<0.000000e+00> : vector<8xf32>
    %589 = vector.multi_reduction <add>, %588, %cst_213 [1] : vector<8x32xf32> to vector<8xf32>
    %590 = vector.shape_cast %589 : vector<8xf32> to vector<8x1xf32>
    %c7_214 = arith.constant 7 : index
    %c0_215 = arith.constant 0 : index
    %c0_216 = arith.constant 0 : index
    %591 = vector.load %arg17[%c7_214, %c0_215, %c0_216] : memref<8x8x1xf32, #tpu.memory_space<vmem>>, vector<1x8x1xf32>
    %592 = vector.shape_cast %591 : vector<1x8x1xf32> to vector<8x1xf32>
    %593 = vector.shape_cast %590 : vector<8x1xf32> to vector<1x8x1xf32>
    tpu.vector_store %arg17[%c7_214, %c0_215, %c0_216], %593 {strides = array<i32>} : memref<8x8x1xf32, #tpu.memory_space<vmem>>, vector<1x8x1xf32>,
    %c0_217 = arith.constant 0 : index
    %c0_218 = arith.constant 0 : index
    %c0_219 = arith.constant 0 : index
    %594 = vector.load %arg17[%c0_217, %c0_218, %c0_219] : memref<8x8x1xf32, #tpu.memory_space<vmem>>, vector<8x8x1xf32>
    %cst_220 = arith.constant dense<0xFF800000> : vector<8x1xf32>
    %595 = vector.multi_reduction <maximumf>, %594, %cst_220 [0] : vector<8x8x1xf32> to vector<8x1xf32>
    %596 = vector.shape_cast %595 : vector<8x1xf32> to vector<1x8x1xf32>
    %597 = vector.broadcast %596 : vector<1x8x1xf32> to vector<8x8x1xf32>
    %598 = arith.subf %594, %597 : vector<8x8x1xf32>
    %599 = math.exp %598 : vector<8x8x1xf32>
    %cst_221 = arith.constant dense<0.000000e+00> : vector<8x1xf32>
    %600 = vector.multi_reduction <add>, %599, %cst_221 [0] : vector<8x8x1xf32> to vector<8x1xf32>
    %601 = vector.shape_cast %600 : vector<8x1xf32> to vector<1x8x1xf32>
    %602 = vector.broadcast %601 : vector<1x8x1xf32> to vector<8x8x1xf32>
    %603 = arith.divf %599, %602 : vector<8x8x1xf32>
    %c0_222 = arith.constant 0 : index
    %c0_223 = arith.constant 0 : index
    %c0_224 = arith.constant 0 : index
    %604 = vector.load %arg16[%c0_222, %c0_223, %c0_224] : memref<8x8x32xf32, #tpu.memory_space<vmem>>, vector<8x8x32xf32>
    %605 = vector.shape_cast %604 : vector<8x8x32xf32> to vector<64x32xf32>
    %c0_225 = arith.constant 0 : index
    %c0_226 = arith.constant 0 : index
    %606 = vector.load %arg11[%c0_225, %c0_226] : memref<32x32xf32, #tpu.memory_space<vmem>>, vector<32x32xf32>
    %cst_227 = arith.constant dense<0.000000e+00> : vector<64x32xf32>
    %607 = tpu.matmul %605, %606, %cst_227 {dimension_numbers = #tpu.dot_dimension_numbers<[1], [0], [0], [1], [0, 0, 1, 1], [], []>} : vector<64x32xf32>, vector<32x32xf32>, vector<64x32xf32> -> vector<64x32xf32>
    %c0_228 = arith.constant 0 : index
    %c0_229 = arith.constant 0 : index
    %608 = vector.load %arg12[%c0_228, %c0_229] : memref<1x32xf32, #tpu.memory_space<vmem>>, vector<1x32xf32>
    %609 = vector.broadcast %608 : vector<1x32xf32> to vector<64x32xf32>
    %610 = arith.addf %607, %609 : vector<64x32xf32>
    %611 = math.tanh %610 : vector<64x32xf32>
    %612 = vector.shape_cast %611 : vector<64x32xf32> to vector<8x8x32xf32>
    %613 = vector.broadcast %603 : vector<8x8x1xf32> to vector<8x8x32xf32>
    %614 = arith.mulf %613, %612 : vector<8x8x32xf32>
    %c0_230 = arith.constant 0 : index
    %c0_231 = arith.constant 0 : index
    %c0_232 = arith.constant 0 : index
    %615 = vector.load %arg1[%c0_230, %c0_231, %c0_232] : memref<8x8x32xf32, #tpu.memory_space<vmem>>, vector<8x8x32xf32>
    %616 = arith.mulf %614, %615 : vector<8x8x32xf32>
    %cst_233 = arith.constant dense<0.000000e+00> : vector<8x32xf32>
    %617 = vector.multi_reduction <add>, %616, %cst_233 [0] : vector<8x8x32xf32> to vector<8x32xf32>
    %c0_234 = arith.constant 0 : index
    %c0_235 = arith.constant 0 : index
    %618 = vector.load %arg13[%c0_234, %c0_235] : memref<8x32xf32, #tpu.memory_space<vmem>>, vector<8x32xf32>
    tpu.vector_store %arg13[%c0_234, %c0_235], %617 {strides = array<i32>} : memref<8x32xf32, #tpu.memory_space<vmem>>, vector<8x32xf32>,
    return
  }
  func.func @transform_0(%arg0: i32) -> (i32, i32, i32) {
    %c0_i32 = arith.constant 0 : i32
    %c0_i32_0 = arith.constant 0 : i32
    %c0_i32_1 = arith.constant 0 : i32
    return %c0_i32, %arg0, %c0_i32_0 : i32, i32, i32
  }
  func.func @transform_1(%arg0: i32) -> (i32, i32) {
    %c0_i32 = arith.constant 0 : i32
    %c0_i32_0 = arith.constant 0 : i32
    %c0_i32_1 = arith.constant 0 : i32
    return %c0_i32, %c0_i32_0 : i32, i32
  }
  func.func @transform_2(%arg0: i32) -> (i32, i32) {
    %c0_i32 = arith.constant 0 : i32
    %c0_i32_0 = arith.constant 0 : i32
    %c0_i32_1 = arith.constant 0 : i32
    return %c0_i32, %c0_i32_0 : i32, i32
  }
  func.func @transform_3(%arg0: i32) -> (i32, i32) {
    %c0_i32 = arith.constant 0 : i32
    %c0_i32_0 = arith.constant 0 : i32
    %c0_i32_1 = arith.constant 0 : i32
    return %c0_i32, %c0_i32_0 : i32, i32
  }
  func.func @transform_4(%arg0: i32) -> (i32, i32) {
    %c0_i32 = arith.constant 0 : i32
    %c0_i32_0 = arith.constant 0 : i32
    %c0_i32_1 = arith.constant 0 : i32
    return %c0_i32, %c0_i32_0 : i32, i32
  }
  func.func @transform_5(%arg0: i32) -> (i32, i32) {
    %c0_i32 = arith.constant 0 : i32
    %c0_i32_0 = arith.constant 0 : i32
    %c0_i32_1 = arith.constant 0 : i32
    return %c0_i32, %c0_i32_0 : i32, i32
  }
  func.func @transform_6(%arg0: i32) -> (i32, i32) {
    %c0_i32 = arith.constant 0 : i32
    %c0_i32_0 = arith.constant 0 : i32
    %c0_i32_1 = arith.constant 0 : i32
    return %c0_i32, %c0_i32_0 : i32, i32
  }
  func.func @transform_7(%arg0: i32) -> (i32, i32) {
    %c0_i32 = arith.constant 0 : i32
    %c0_i32_0 = arith.constant 0 : i32
    %c0_i32_1 = arith.constant 0 : i32
    return %c0_i32, %c0_i32_0 : i32, i32
  }
  func.func @transform_8(%arg0: i32) -> (i32, i32) {
    %c0_i32 = arith.constant 0 : i32
    %c0_i32_0 = arith.constant 0 : i32
    %c0_i32_1 = arith.constant 0 : i32
    return %c0_i32, %c0_i32_0 : i32, i32
  }
  func.func @transform_9(%arg0: i32) -> (i32, i32) {
    %c0_i32 = arith.constant 0 : i32
    %c0_i32_0 = arith.constant 0 : i32
    %c0_i32_1 = arith.constant 0 : i32
    return %c0_i32, %c0_i32_0 : i32, i32
  }
  func.func @transform_10(%arg0: i32) -> (i32, i32) {
    %c0_i32 = arith.constant 0 : i32
    %c0_i32_0 = arith.constant 0 : i32
    %c0_i32_1 = arith.constant 0 : i32
    return %c0_i32, %c0_i32_0 : i32, i32
  }
  func.func @transform_11(%arg0: i32) -> (i32, i32) {
    %c0_i32 = arith.constant 0 : i32
    %c0_i32_0 = arith.constant 0 : i32
    %c0_i32_1 = arith.constant 0 : i32
    return %c0_i32, %c0_i32_0 : i32, i32
  }
  func.func @transform_12(%arg0: i32) -> (i32, i32) {
    %c0_i32 = arith.constant 0 : i32
    %c0_i32_0 = arith.constant 0 : i32
    return %arg0, %c0_i32 : i32, i32
  }
}

</mosaic_0001>

<bundles_post_ra>
// kernel: tpu_custom_call.1
= control target key start
LH: loop header
LB: loop body
LE: loop exit
PB: predicated region body
PF: predicated region fallthrough
CT: control target
= control target key end

     0   :  { %17 = vsyncpa [#allocation7], 0  ;;  %s3864_s0 = inlined_call_operand.hbm [shape: f32[8,8,32], index: 0, kind: input, shape index: {}]   ;;  %s3865_s1 = inlined_call_operand.hbm [shape: f32[32,96], index: 1, kind: input, shape index: {}]   ;;  %s3866_s2 = inlined_call_operand.hbm [shape: f32[32,96], index: 2, kind: input, shape index: {}]   ;;  %s3867_s3 = inlined_call_operand.vmem [shape: f32[1,96], index: 3, kind: input, shape index: {}]   ;;  %s3868_s4 = inlined_call_operand.vmem [shape: f32[1,32], index: 4, kind: input, shape index: {}]   ;;  %s3869_s5 = inlined_call_operand.hbm [shape: f32[32,96], index: 5, kind: input, shape index: {}]   ;;  %s3870_s6 = inlined_call_operand.hbm [shape: f32[32,96], index: 6, kind: input, shape index: {}]   ;;  %s3871_s7 = inlined_call_operand.vmem [shape: f32[1,96], index: 7, kind: input, shape index: {}]   ;;  %s3872_s8 = inlined_call_operand.vmem [shape: f32[1,32], index: 8, kind: input, shape index: {}]   ;;  %s3873_s9 = inlined_call_operand.vmem [shape: f32[1,32], index: 9, kind: input, shape index: {}]   ;;  %s3874_s10 = inlined_call_operand.hbm [shape: f32[32,32], index: 10, kind: input, shape index: {}]   ;;  %s3875_s11 = inlined_call_operand.vmem [shape: f32[1,32], index: 11, kind: input, shape index: {}]   ;;  %s3876_s12 = inlined_call_operand.hbm [shape: f32[8,32], index: 12, kind: output, shape index: {}]  }
   0x1   :  { %18 = vsyncpa [#allocation10], 0 }
   0x2   :  { %19 = vsyncpa [#allocation13], 0 }
   0x3   :  { %20 = vsyncpa [#allocation16], 0 }
   0x4   :  { %21 = vsyncpa [#allocation8], 0  ;;  %s3300_s21 = smov [#allocation9]   ;;  %s3301_s23 = smov [#allocation12]  }
   0x5   :  { %s39_s22 = sshll.u32 %s3300_s21, 4  ;;  %s67_s24 = sshll.u32 %s3301_s23, 4  ;;  %s40_s22 = int_to_ptr.vmem [resolvable:$true] %s39_s22  ;;  %s68_s24 = int_to_ptr.vmem [resolvable:$true] %s67_s24 }
   0x6   :  { %s3158_s25 = scalar_lea.vmem %s40_s22, 512  ;;  %p3163_p1 = scmp.lt.s32.totalorder %s40_s22, %s40_s22 }
   0x7   :  { %p3159_p0 = scmp.ne.s32.totalorder %s40_s22, %s3158_s25  ;;  %p3164_p2 = scmp.lt.s32.totalorder %s3158_s25, %s3158_s25 }
   0x9   :  { %p3165_p3 = por %p3164_p2, %p3163_p1 }
   0xb   :  { %p3166_p4 = pnand %p3165_p3, %p3159_p0 }
   0xd   :  { %3169 = shalt.err (!%p3166_p4)
}
   0xe   :  { %s3302_s26 = smov 128   ;;  %s3303_s27 = smov 8  }
   0xf   :  { %45 = dma.hbm_to_vmem [thread:$0]  %s3865_s1, 512, %s40_s22, [#allocation10], %s3302_s26, %s3302_s26, %s3303_s27  }
  0x10   :  { %s3178_s30 = scalar_lea.vmem %s68_s24, 512  ;;  %p3183_p6 = scmp.lt.s32.totalorder %s68_s24, %s68_s24 }
  0x11   :  { %p3179_p5 = scmp.ne.s32.totalorder %s68_s24, %s3178_s30  ;;  %p3184_p7 = scmp.lt.s32.totalorder %s3178_s30, %s3178_s30 }
  0x13   :  { %p3185_p8 = por %p3184_p7, %p3183_p6 }
  0x15   :  { %p3186_p9 = pnand %p3185_p8, %p3179_p5 }
  0x17   :  { %3189 = shalt.err (!%p3186_p9)
}
  0x18   :  { %73 = dma.hbm_to_vmem [thread:$0]  %s3869_s5, 512, %s68_s24, [#allocation13], %s3302_s26, %s3302_s26, %s3303_s27  }
  0x19   :  { %s3304_s15 = smov [#allocation6]   ;;  %s3305_s17 = smov [#allocation11]  }
  0x1a   :  { %s27_s16 = sshll.u32 %s3304_s15, 4  ;;  %s51_s18 = sshll.u32 %s3305_s17, 4  ;;  %s28_s16 = int_to_ptr.vmem [resolvable:$true] %s27_s16  ;;  %s52_s18 = int_to_ptr.vmem [resolvable:$true] %s51_s18 }
  0x1b   :  { %s3198_s1 = scalar_lea.vmem %s28_s16, 1024  ;;  %p3203_p11 = scmp.lt.s32.totalorder %s28_s16, %s28_s16 }
  0x1c   :  { %p3199_p10 = scmp.ne.s32.totalorder %s28_s16, %s3198_s1  ;;  %p3204_p12 = scmp.lt.s32.totalorder %s3198_s1, %s3198_s1 }
  0x1e   :  { %p3205_p13 = por %p3204_p12, %p3203_p11 }
  0x20   :  { %p3206_p0 = pnand %p3205_p13, %p3199_p10 }
  0x22   :  { %3209 = shalt.err (!%p3206_p0)
}
  0x23   :  { %33 = dma.hbm_to_vmem [thread:$0]  %s3864_s0, 1024, %s28_s16, [#allocation7], %s3302_s26, %s3302_s26, %s3303_s27  }
  0x24   :  { %s3218_s5 = scalar_lea.vmem %s52_s18, 512  ;;  %p3223_p2 = scmp.lt.s32.totalorder %s52_s18, %s52_s18 }
  0x25   :  { %p3219_p1 = scmp.ne.s32.totalorder %s52_s18, %s3218_s5  ;;  %p3224_p3 = scmp.lt.s32.totalorder %s3218_s5, %s3218_s5 }
  0x27   :  { %p3225_p4 = por %p3224_p3, %p3223_p2 }
  0x29   :  { %p3226_p5 = pnand %p3225_p4, %p3219_p1 }
  0x2b   :  { %3229 = shalt.err (!%p3226_p5)
}
  0x2c   :  { %57 = dma.hbm_to_vmem [thread:$0]  %s3866_s2, 512, %s52_s18, [#allocation10], %s3302_s26, %s3302_s26, %s3303_s27  }
  0x2d   :  { %s3306_s23 = smov [#allocation14]   ;;  %s3307_s25 = smov [#allocation15]  }
  0x2e   :  { %s79_s24 = sshll.u32 %s3306_s23, 4  ;;  %s97_s28 = sshll.u32 %s3307_s25, 4  ;;  %s80_s24 = int_to_ptr.vmem [resolvable:$true] %s79_s24  ;;  %s98_s28 = int_to_ptr.vmem [resolvable:$true] %s97_s28 }
  0x2f   :  { %s3238_s0 = scalar_lea.vmem %s80_s24, 512  ;;  %p3243_p7 = scmp.lt.s32.totalorder %s80_s24, %s80_s24 }
  0x30   :  { %p3239_p6 = scmp.ne.s32.totalorder %s80_s24, %s3238_s0  ;;  %p3244_p8 = scmp.lt.s32.totalorder %s3238_s0, %s3238_s0 }
  0x32   :  { %p3245_p9 = por %p3244_p8, %p3243_p7 }
  0x34   :  { %p3246_p10 = pnand %p3245_p9, %p3239_p6 }
  0x36   :  { %3249 = shalt.err (!%p3246_p10)
}
  0x37   :  { %85 = dma.hbm_to_vmem [thread:$0]  %s3870_s6, 512, %s80_s24, [#allocation13], %s3302_s26, %s3302_s26, %s3303_s27  }
  0x38   :  { %s3258_s2 = scalar_lea.vmem %s98_s28, 512  ;;  %p3263_p12 = scmp.lt.s32.totalorder %s98_s28, %s98_s28 }
  0x39   :  { %p3259_p11 = scmp.ne.s32.totalorder %s98_s28, %s3258_s2  ;;  %p3264_p13 = scmp.lt.s32.totalorder %s3258_s2, %s3258_s2 }
  0x3b   :  { %p3265_p0 = por %p3264_p13, %p3263_p12 }
  0x3d   :  { %p3266_p1 = pnand %p3265_p0, %p3259_p11 }
  0x3f   :  { %3269 = shalt.err (!%p3266_p1)
}
  0x40   :  { %103 = dma.hbm_to_vmem [thread:$0]  %s3874_s10, 512, %s98_s28, [#allocation16], %s3302_s26, %s3302_s26, %s3303_s27  }
  0x41   :  { %3290 = dma.done.wait [#allocation7], 1024  }
  0x42   :  { %3291 = vsyncadd [#allocation7], 4294966272 }
  0x43   :  { %3292 = dma.done.wait [#allocation10], 1024  }
  0x44   :  { %3293 = vsyncadd [#allocation10], 4294966272 }
  0x45   :  { %3294 = dma.done.wait [#allocation13], 1024  }
  0x46   :  { %3295 = vsyncadd [#allocation13], 4294966272 }
  0x47   :  { %3296 = dma.done.wait [#allocation16], 512  }
  0x48   :  { %3297 = vsyncadd [#allocation16], 4294966784  ;;  %vm143_vm0 = vcmask 261120   ;;  %v135_v0 = vld [vmem:[#allocation9 + $0x18] sm:$0xff]  ;;  %v134_v1 = vld [vmem:[#allocation9 + $0x10] sm:$0xff]  ;;  %v3308_v15 = vmov 0.0  }
  0x49   :  { %2995 = vmatprep.subr.mxu1 %v135_v0  ;;  %2759 = vmatprep.subr.mxu0 %v135_v0  ;;  %v3416_v2 = vld [vmem:[#allocation6 + $0x20] sm:$0xff]  ;;  %v133_v3 = vld [vmem:[#allocation9 + $0x8] sm:$0xff]  ;;  %v285_v6 = vld [vmem:[#allocation12 + $0x18] sm:$0xff]  ;;  %vm3309_vm1 = vmmov 0   ;;  %s3310_s26 = smov 64   ;;  %vm273_vm2 = vcmask 785408  }
  0x4a   :  { %2999 = vmatpush3.msra.mxu1 %v135_v0  ;;  %2773 = vmatprep.mubr.msk.f32.mxu1 %vm143_vm0, %v3416_v2  ;;  %v132_v4 = vld [vmem:[#allocation9] sm:$0xff]  ;;  %v129_v5 = vld [vmem:[#allocation6 + $0x28] sm:$0xff]  ;;  %v130_v7 = vld [vmem:[#allocation6 + $0x30] sm:$0xff]  ;;  %s3312_s1 = smov 32   ;;  %vm655_vm3 = vcmask 7168  }
  0x4b   :  { %2996 = vmatprep.subr.mxu1 %v134_v1  ;;  %2760 = vmatpush3.msra.mxu0 %v135_v0  ;;  %v284_v8 = vld [vmem:[#allocation12 + $0x10] sm:$0xff]  ;;  %v124_v9 = vld [vmem:[#allocation6] sm:$0xff]  ;;  %v131_v10 = vld [vmem:[#allocation6 + $0x38] sm:$0xff] }
  0x4c   :  { %3000 = vmatpush3.msra.mxu1 %v134_v1  ;;  %2761 = vmatprep.subr.mxu0 %v134_v1  ;;  %v283_v11 = vld [vmem:[#allocation12 + $0x8] sm:$0xff]  ;;  %v282_v13 = vld [vmem:[#allocation12] sm:$0xff]  ;;  %v3425_v14 = vld [vmem:[#allocation11 + $0x18] sm:$0xff] }
  0x4d   :  { %2997 = vmatprep.subr.mxu1 %v133_v3  ;;  %2762 = vmatpush3.msra.mxu0 %v134_v1  ;;  %v125_v12 = vld [vmem:[#allocation6 + $0x8] sm:$0xff]  ;;  %v3429_v16 = vld [vmem:[#allocation14 + $0x18] sm:$0xff]  ;;  %v126_v17 = vld [vmem:[#allocation6 + $0x10] sm:$0xff] }
  0x4e   :  { %3001 = vmatpush3.msra.mxu1 %v133_v3  ;;  %2763 = vmatprep.subr.mxu0 %v133_v3  ;;  %v3433_v18 = vld [vmem:[#allocation11 + $0x10] sm:$0xff]  ;;  %v127_v19 = vld [vmem:[#allocation6 + $0x18] sm:$0xff]  ;;  %v3439_v20 = vld [vmem:[#allocation11 + $0x8] sm:$0xff] }
  0x4f   :  { %2998 = vmatprep.subr.mxu1 %v132_v4  ;;  %2764 = vmatpush3.msra.mxu0 %v133_v3  ;;  %v3445_v21 = vld [vmem:[#allocation14 + $0x10] sm:$0xff]  ;;  %v3447_v22 = vld [vmem:[#allocation11] sm:$0xff]  ;;  %v3459_v23 = vld [vmem:[#allocation14 + $0x8] sm:$0xff] }
  0x50   :  { %3002 = vmatpush3.msra.mxu1 %v132_v4  ;;  %2765 = vmatprep.subr.mxu0 %v132_v4  ;;  %v2603_v24 = vld [vmem:[%s3872_s8] ss:$0 sm:$0xff] }
  0x51   :  { %2774 = vmatmul.mubr.msk.f32.vlgmr.msra.gmra.mxu1 %vm143_vm0, %v129_v5  ;;  %2779 = vmatprep.subr.mxu1 %v285_v6  ;;  %v3469_v25 = vld [vmem:[#allocation14] sm:$0xff] }
  0x52   :  { %2780 = vmatpush3.msra.mxu1 %v285_v6  ;;  %2776 = vmatprep.mubr.msk.f32.mxu1 %vm143_vm0, %v130_v7  ;;  %v2602_v26 = vld [vmem:[%s3868_s4] ss:$0 sm:$0xff] }
  0x53   :  { %2781 = vmatprep.subr.mxu1 %v284_v8  ;;  %2766 = vmatpush3.msra.mxu0 %v132_v4  ;;  %v2583_v27 = vld [vmem:[%s3867_s3] ss:$0 sm:$0xff]  ;;  %s3311_s3 = smov 96  }
  0x54   :  { %2782 = vmatpush3.msra.mxu1 %v284_v8  ;;  %2767 = vmatprep.mubr.msk.f32.mxu0 %vm143_vm0, %v124_v9  ;;  %v2592_v37 = vld [vmem:[%s3871_s7] ss:$0 sm:$0xff] }
  0x55   :  { %2777 = vmatmul.mubr.msk.f32.gmra.mxu1 %vm143_vm0, %v131_v10  ;;  %2783 = vmatprep.subr.mxu1 %v283_v11 }
  0x56   :  { %2784 = vmatpush3.msra.mxu1 %v283_v11  ;;  %2768 = vmatmul.mubr.msk.f32.vlgmr.msra.gmra.mxu0 %vm143_vm0, %v125_v12 }
  0x57   :  { %2785 = vmatprep.subr.mxu1 %v282_v13  ;;  %2787 = vmatprep.mubr.msk.f32.mxu1 %vm143_vm0, %v124_v9 }
  0x58   :  { %2786 = vmatpush3.msra.mxu1 %v282_v13  ;;  %2799 = vmatprep.subr.mxu0 %v3308_v15 }
  0x59   :  { %2788 = vmatmul.mubr.msk.f32.vlgmr.msra.gmra.mxu1 %vm143_vm0, %v125_v12  ;;  %2800 = vmatpush3.msra.mxu0 %v3425_v14 }
  0x5a   :  { %2810 = vmatprep.subr.mxu1 %v3308_v15  ;;  %2801 = vmatprep.subr.mxu0 %v3308_v15 }
  0x5b   :  { %2811 = vmatpush3.msra.mxu1 %v3429_v16  ;;  %2770 = vmatprep.mubr.msk.f32.mxu0 %vm143_vm0, %v126_v17 }
  0x5c   :  { %2802 = vmatpush3.msra.mxu0 %v3433_v18  ;;  %2790 = vmatprep.mubr.msk.f32.mxu1 %vm143_vm0, %v126_v17 }
  0x5d   :  { %2771 = vmatmul.mubr.msk.f32.gmra.mxu0 %vm143_vm0, %v127_v19  ;;  %2803 = vmatprep.subr.mxu0 %v3308_v15 }
  0x5e   :  { %2791 = vmatmul.mubr.msk.f32.gmra.mxu1 %vm143_vm0, %v127_v19  ;;  %2804 = vmatpush3.msra.mxu0 %v3439_v20 }
  0x5f   :  { %2812 = vmatprep.subr.mxu1 %v3308_v15  ;;  %2805 = vmatprep.subr.mxu0 %v3308_v15 }
  0x60   :  { %2813 = vmatpush3.msra.mxu1 %v3445_v21  ;;  %2806 = vmatpush3.msra.mxu0 %v3447_v22 }
  0x61   :  { %2807 = vmatprep.mubr.msk.f32.mxu0 %vm3309_vm1, %v3308_v15  ;;  %2793 = vmatprep.mubr.msk.f32.mxu1 %vm143_vm0, %v3416_v2 }
  0x62   :  { %2808 = vmatmul.mubr.f32.vlgmr.msra.gmra.mxu0 %v3308_v15  ;;  %2794 = vmatmul.mubr.msk.f32.gmra.mxu1 %vm143_vm0, %v129_v5 }
  0x63   :  { %2814 = vmatprep.subr.mxu1 %v3308_v15  ;;  %2796 = vmatprep.mubr.msk.f32.mxu1 %vm143_vm0, %v130_v7 }
  0x64   :  { %2815 = vmatpush3.msra.mxu1 %v3459_v23  ;;  %616 = vrot.lane.b32.xlu0 %v2603_v24, %s3310_s26 }
  0x65   :  { %2816 = vmatprep.subr.mxu1 %v3308_v15  ;;  %2821 = vmatprep.subr.mxu0 %v3308_v15 }
  0x66   :  { %2797 = vmatmul.mubr.msk.f32.gmra.mxu1 %vm143_vm0, %v131_v10  ;;  %2822 = vmatpush3.msra.mxu0 %v3425_v14 }
  0x67   :  { %2817 = vmatpush3.msra.mxu1 %v3469_v25  ;;  %2818 = vmatprep.mubr.msk.f32.mxu1 %vm3309_vm1, %v3308_v15 }
  0x68   :  { %510 = vrot.lane.b32.xlu0 %v2602_v26, %s3310_s26  ;;  %2832 = vmatprep.subr.mxu1 %v3308_v15 }
  0x69   :  { %2823 = vmatprep.subr.mxu0 %v3308_v15  ;;  %2829 = vmatprep.mubr.msk.f32.mxu0 %vm3309_vm1, %v3308_v15 }
  0x6a   :  { %2819 = vmatmul.mubr.f32.vlgmr.msra.gmra.mxu1 %v3308_v15  ;;  %2824 = vmatpush3.msra.mxu0 %v3433_v18 }
  0x6b   :  { %2833 = vmatpush3.msra.mxu1 %v3429_v16  ;;  %2840 = vmatprep.mubr.msk.f32.mxu1 %vm3309_vm1, %v3308_v15 }
  0x6c   :  { %2834 = vmatprep.subr.mxu1 %v3308_v15  ;;  %2825 = vmatprep.subr.mxu0 %v3308_v15 }
  0x6d   :  { %2835 = vmatpush3.msra.mxu1 %v3445_v21  ;;  %2826 = vmatpush3.msra.mxu0 %v3439_v20 }
  0x6e   :  { %2836 = vmatprep.subr.mxu1 %v3308_v15  ;;  %2827 = vmatprep.subr.mxu0 %v3308_v15 }
  0x6f   :  { %2837 = vmatpush3.msra.mxu1 %v3459_v23  ;;  %2828 = vmatpush3.msra.mxu0 %v3447_v22 }
  0x70   :  { %2838 = vmatprep.subr.mxu1 %v3308_v15  ;;  %2843 = vmatprep.subr.mxu0 %v3308_v15 }
  0x71   :  { %2839 = vmatpush3.msra.mxu1 %v3469_v25 }
  0x72   :  { %2854 = vmatprep.subr.mxu1 %v3308_v15 }
  0xd6   :  { %v3522_v56 = vpop.permute.xlu0 %616 }
  0xda   :  { %v3527_v1 = vpop.permute.xlu0 %510 }
 0x111   :  { %v2775_v28 = vpop.f32.mrf.mxu1 }
 0x112   :  { %v260_v29 = vadd.f32 %v2775_v28, %v2583_v27 }
 0x113   :  { %v254_v30 = vpop.f32.mrf.mxu1 }
 0x114   :  { %279 = vst.msk [vmem:[#allocation2 + $0x28] sm:$0xff] %vm273_vm2, %v260_v29  ;;  %v255_v31 = vadd.f32 %v2583_v27, %v254_v30 }
 0x115   :  { %v2778_v32 = vpop.f32.mrf.mxu1 }
 0x116   :  { %278 = vst.msk [vmem:[#allocation2 + $0x20] sm:$0xff] %vm273_vm2, %v255_v31  ;;  %v270_v33 = vadd.f32 %v2778_v32, %v2583_v27  ;;  %v2769_v34 = vpop.f32.mrf.mxu0 }
 0x117   :  { %v264_v35 = vpop.f32.mrf.mxu1  ;;  %v240_v36 = vadd.f32 %v2769_v34, %v2583_v27 }
 0x118   :  { %281 = vst.msk [vmem:[#allocation2 + $0x38] sm:$0xff] %vm273_vm2, %v270_v33  ;;  %v265_v38 = vadd.f32 %v2583_v27, %v264_v35  ;;  %v234_v39 = vpop.f32.mrf.mxu0 }
 0x119   :  { %275 = vst.msk [vmem:[#allocation2 + $0x8] sm:$0xff] %vm273_vm2, %v240_v36  ;;  %v2789_v40 = vpop.f32.mrf.mxu1  ;;  %v235_v41 = vadd.f32 %v2583_v27, %v234_v39 }
 0x11a   :  { %280 = vst.msk [vmem:[#allocation2 + $0x30] sm:$0xff] %vm273_vm2, %v265_v38  ;;  %v365_v42 = vadd.f32 %v2789_v40, %v2592_v37 }
 0x11b   :  { %274 = vst.msk [vmem:[#allocation2] sm:$0xff] %vm273_vm2, %v235_v41  ;;  %v359_v43 = vpop.f32.mrf.mxu1 }
 0x11c   :  { %399 = vst.msk [vmem:[#allocation3 + $0x8] sm:$0xff] %vm273_vm2, %v365_v42  ;;  %v360_v44 = vadd.f32 %v2592_v37, %v359_v43 }
 0x11d   :  { %v2772_v45 = vpop.f32.mrf.mxu0 }
 0x11e   :  { %398 = vst.msk [vmem:[#allocation3] sm:$0xff] %vm273_vm2, %v360_v44  ;;  %v250_v46 = vadd.f32 %v2772_v45, %v2583_v27  ;;  %v2792_v47 = vpop.f32.mrf.mxu1 }
 0x11f   :  { %v375_v48 = vadd.f32 %v2792_v47, %v2592_v37  ;;  %v244_v49 = vpop.f32.mrf.mxu0  ;;  %v425_v7 = vld [vmem:[#allocation2 + $0x38] sm:$0xff] }
 0x120   :  { %277 = vst.msk [vmem:[#allocation2 + $0x18] sm:$0xff] %vm273_vm2, %v250_v46  ;;  %v245_v50 = vadd.f32 %v2583_v27, %v244_v49  ;;  %v369_v51 = vpop.f32.mrf.mxu1 }
 0x121   :  { %401 = vst.msk [vmem:[#allocation3 + $0x18] sm:$0xff] %vm273_vm2, %v375_v48  ;;  %v370_v52 = vadd.f32 %v2592_v37, %v369_v51 }
 0x122   :  { %276 = vst.msk [vmem:[#allocation2 + $0x10] sm:$0xff] %vm273_vm2, %v245_v50  ;;  %v499_v53 = vpop.f32.mrf.mxu0  ;;  %v2795_v54 = vpop.f32.mrf.mxu1 }
 0x123   :  { %400 = vst.msk [vmem:[#allocation3 + $0x10] sm:$0xff] %vm273_vm2, %v370_v52  ;;  %v385_v55 = vadd.f32 %v2795_v54, %v2592_v37  ;;  %v513_v4 = vadd.f32 %v3527_v1, %v499_v53  ;;  %v503_v8 = vadd.f32 %v499_v53, %v425_v7 }
 0x124   :  { %v379_v57 = vpop.f32.mrf.mxu1  ;;  %v2809_v58 = vpop.f32.mrf.mxu0 }
 0x125   :  { %403 = vst.msk [vmem:[#allocation3 + $0x28] sm:$0xff] %vm273_vm2, %v385_v55  ;;  %v380_v59 = vadd.f32 %v2592_v37, %v379_v57  ;;  %v2604_v10 = vmul.f32 -1.442695, %v503_v8  ;;  %v658_v57 = vld [vmem:[#allocation2 + $0x30] sm:$0xff] }
 0x126   :  { %v2798_v60 = vpop.f32.mrf.mxu1 }
 0x127   :  { %402 = vst.msk [vmem:[#allocation3 + $0x20] sm:$0xff] %vm273_vm2, %v380_v59  ;;  %v395_v61 = vadd.f32 %v2798_v60, %v2592_v37 }
 0x128   :  { %v389_v62 = vpop.f32.mrf.mxu1 }
 0x129   :  { %405 = vst.msk [vmem:[#allocation3 + $0x38] sm:$0xff] %vm273_vm2, %v395_v61  ;;  %v390_v63 = vadd.f32 %v2592_v37, %v389_v62 }
 0x12a   :  { %v605_v0 = vpop.f32.mrf.mxu1 }
 0x12b   :  { %404 = vst.msk [vmem:[#allocation3 + $0x30] sm:$0xff] %vm273_vm2, %v390_v63  ;;  %v619_v2 = vadd.f32 %v3522_v56, %v605_v0 }
 0x12c   :  { %v2820_v3 = vpop.f32.mrf.mxu1 }
 0x12d   :  { %621 = vrot.lane.b32.xlu1 %v619_v2, %s3310_s26 }
 0x130   :  { %v534_v5 = vld [vmem:[#allocation3 + $0x38] sm:$0xff] }
 0x131   :  { %515 = vrot.lane.b32.xlu1 %v513_v4, %s3310_s26  ;;  %v609_v6 = vadd.f32 %v605_v0, %v534_v5 }
 0x132   :  { %v766_v54 = vld [vmem:[#allocation3 + $0x30] sm:$0xff] }
 0x133   :  { %v2605_v9 = vmul.f32 -1.442695, %v609_v6 }
 0x135   :  { %3020 = vpow2.f32 %v2605_v9 }
 0x136   :  { %3022 = vpow2.f32 %v2604_v10 }
 0x142   :  { %v3021_v11 = vpop.eup %3020 }
 0x143   :  { %v613_v12 = vadd.f32 1.0, %v3021_v11  ;;  %v3023_v13 = vpop.eup %3022 }
 0x144   :  { %v507_v17 = vadd.f32 1.0, %v3023_v13 }
 0x145   :  { %3024 = vrcp.f32 %v613_v12 }
 0x146   :  { %3026 = vrcp.f32 %v507_v17 }
 0x152   :  { %v3025_v19 = vpop.eup %3024 }
 0x153   :  { %v3027_v27 = vpop.eup %3026  ;;  %v631_v36 = vsub.f32 1.0, %v3025_v19  ;;  %v637_v38 = vmul.f32 0.0, %v3025_v19 }
 0x154   :  { %v525_v41 = vsub.f32 1.0, %v3027_v27  ;;  %v531_v43 = vmul.f32 0.0, %v3027_v27 }
 0x19f   :  { %v622_v24 = vpop.permute.xlu1 %621 }
 0x1a0   :  { %v624_v26 = vmul.f32 %v3025_v19, %v622_v24 }
 0x1a2   :  { %626 = vrot.lane.b32.xlu0 %v624_v26, %s3310_s26 }
 0x1a3   :  { %v516_v28 = vpop.permute.xlu1 %515 }
 0x1a4   :  { %v518_v29 = vmul.f32 %v3027_v27, %v516_v28 }
 0x1a6   :  { %520 = vrot.lane.b32.xlu1 %v518_v29, %s3310_s26 }
 0x214   :  { %v627_v30 = vpop.permute.xlu0 %626 }
 0x215   :  { %v629_v31 = vadd.f32 %v627_v30, %v534_v5 }
 0x217   :  { %3028 = vtanh.f32 %v629_v31 }
 0x218   :  { %v521_v32 = vpop.permute.xlu1 %520 }
 0x219   :  { %v523_v33 = vadd.f32 %v521_v32, %v425_v7 }
 0x21b   :  { %3030 = vtanh.f32 %v523_v33 }
 0x224   :  { %v3029_v34 = vpop.eup %3028 }
 0x225   :  { %633 = vrot.lane.b32.xlu0 %v3029_v34, %s3311_s3 }
 0x228   :  { %v3031_v35 = vpop.eup %3030 }
 0x229   :  { %527 = vrot.lane.b32.xlu1 %v3031_v35, %s3311_s3 }
 0x297   :  { %v634_v37 = vpop.permute.xlu0 %633 }
 0x298   :  { %v636_v39 = vmul.f32 %v634_v37, %v631_v36 }
 0x29a   :  { %v3538_v40 = vadd.f32 %v637_v38, %v636_v39 }
 0x29b   :  { %v528_v42 = vpop.permute.xlu1 %527 }
 0x29c   :  { %v530_v44 = vmul.f32 %v528_v42, %v525_v41  ;;  %640 = vrot.lane.b32.xlu0 %v3538_v40, %s3311_s3  ;;  %v995_v41 = vld [vmem:[#allocation3 + $0x28] sm:$0xff] }
 0x29e   :  { %v3542_v45 = vadd.f32 %v531_v43, %v530_v44  ;;  %v887_v43 = vld [vmem:[#allocation2 + $0x28] sm:$0xff] }
 0x2a0   :  { %664 = vrot.lane.b32.xlu1 %v3542_v45, %s3311_s3 }
 0x30e   :  { %v641_v46 = vpop.permute.xlu0 %640 }
 0x30f   :  { %643 = vst.msk [vmem:[#allocation4] sm:$0xff] %vm143_vm0, %v641_v46  ;;  %2841 = vmatmul.mubr.msk.f32.vlgmr.msra.gmra.mxu1 %vm143_vm0, %v641_v46 }
 0x310   :  { %2855 = vmatpush3.msra.mxu1 %v3429_v16  ;;  %2862 = vmatprep.mubr.msk.f32.mxu1 %vm3309_vm1, %v3308_v15 }
 0x311   :  { %2856 = vmatprep.subr.mxu1 %v3308_v15 }
 0x312   :  { %v665_v47 = vpop.permute.xlu1 %664  ;;  %2857 = vmatpush3.msra.mxu1 %v3445_v21 }
 0x313   :  { %2830 = vmatmul.mubr.msk.f32.vlgmr.msra.gmra.mxu0 %vm143_vm0, %v665_v47  ;;  %2858 = vmatprep.subr.mxu1 %v3308_v15 }
 0x314   :  { %2844 = vmatpush3.msra.mxu0 %v3425_v14  ;;  %2859 = vmatpush3.msra.mxu1 %v3459_v23 }
 0x315   :  { %2845 = vmatprep.subr.mxu0 %v3308_v15  ;;  %2860 = vmatprep.subr.mxu1 %v3308_v15 }
 0x316   :  { %2861 = vmatpush3.msra.mxu1 %v3469_v25  ;;  %2846 = vmatpush3.msra.mxu0 %v3433_v18 }
 0x317   :  { %2847 = vmatprep.subr.mxu0 %v3308_v15  ;;  %2851 = vmatprep.mubr.msk.f32.mxu0 %vm3309_vm1, %v3308_v15 }
 0x318   :  { %2848 = vmatpush3.msra.mxu0 %v3439_v20  ;;  %2876 = vmatprep.subr.mxu1 %v3308_v15 }
 0x319   :  { %2849 = vmatprep.subr.mxu0 %v3308_v15 }
 0x31a   :  { %2850 = vmatpush3.msra.mxu0 %v3447_v22 }
 0x31b   :  { %2865 = vmatprep.subr.mxu0 %v3308_v15 }
 0x3cf   :  { %v839_v48 = vpop.f32.mrf.mxu1 }
 0x3d0   :  { %v850_v49 = vadd.f32 %v839_v48, %v3522_v56  ;;  %v843_v55 = vadd.f32 %v839_v48, %v766_v54 }
 0x3d1   :  { %v2842_v50 = vpop.f32.mrf.mxu1 }
 0x3d2   :  { %852 = vrot.lane.b32.xlu0 %v850_v49, %s3310_s26  ;;  %v2609_v58 = vmul.f32 -1.442695, %v843_v55 }
 0x3d3   :  { %v734_v51 = vpop.f32.mrf.mxu0 }
 0x3d4   :  { %v745_v52 = vadd.f32 %v734_v51, %v3527_v1  ;;  %v738_v59 = vadd.f32 %v734_v51, %v658_v57  ;;  %3032 = vpow2.f32 %v2609_v58 }
 0x3d5   :  { %v2831_v53 = vpop.f32.mrf.mxu0 }
 0x3d6   :  { %747 = vrot.lane.b32.xlu1 %v745_v52, %s3310_s26  ;;  %v2607_v60 = vmul.f32 -1.442695, %v738_v59 }
 0x3d8   :  { %3034 = vpow2.f32 %v2607_v60 }
 0x3e1   :  { %v3033_v61 = vpop.eup %3032 }
 0x3e2   :  { %v847_v62 = vadd.f32 1.0, %v3033_v61 }
 0x3e4   :  { %3036 = vrcp.f32 %v847_v62 }
 0x3e5   :  { %v3035_v63 = vpop.eup %3034 }
 0x3e6   :  { %v742_v0 = vadd.f32 1.0, %v3035_v63 }
 0x3e8   :  { %3038 = vrcp.f32 %v742_v0 }
 0x3f1   :  { %v3037_v2 = vpop.eup %3036 }
 0x3f2   :  { %v862_v17 = vsub.f32 1.0, %v3037_v2  ;;  %v868_v24 = vmul.f32 %v3037_v2, %v3538_v40 }
 0x3f5   :  { %v3039_v5 = vpop.eup %3038 }
 0x3f6   :  { %v757_v28 = vsub.f32 1.0, %v3039_v5  ;;  %v763_v30 = vmul.f32 %v3039_v5, %v3542_v45 }
 0x444   :  { %v853_v3 = vpop.permute.xlu0 %852 }
 0x445   :  { %v855_v4 = vmul.f32 %v3037_v2, %v853_v3 }
 0x447   :  { %857 = vrot.lane.b32.xlu0 %v855_v4, %s3310_s26 }
 0x448   :  { %v748_v6 = vpop.permute.xlu1 %747 }
 0x449   :  { %v750_v7 = vmul.f32 %v3039_v5, %v748_v6 }
 0x44b   :  { %752 = vrot.lane.b32.xlu1 %v750_v7, %s3310_s26 }
 0x4b9   :  { %v858_v8 = vpop.permute.xlu0 %857 }
 0x4ba   :  { %v860_v9 = vadd.f32 %v858_v8, %v766_v54 }
 0x4bc   :  { %3040 = vtanh.f32 %v860_v9 }
 0x4bd   :  { %v753_v10 = vpop.permute.xlu1 %752 }
 0x4be   :  { %v755_v11 = vadd.f32 %v753_v10, %v658_v57 }
 0x4c0   :  { %3042 = vtanh.f32 %v755_v11 }
 0x4c9   :  { %v3041_v12 = vpop.eup %3040 }
 0x4ca   :  { %864 = vrot.lane.b32.xlu0 %v3041_v12, %s3311_s3 }
 0x4cd   :  { %v3043_v13 = vpop.eup %3042 }
 0x4ce   :  { %759 = vrot.lane.b32.xlu1 %v3043_v13, %s3311_s3 }
 0x53c   :  { %v865_v19 = vpop.permute.xlu0 %864 }
 0x53d   :  { %v867_v26 = vmul.f32 %v865_v19, %v862_v17 }
 0x53f   :  { %v3578_v27 = vadd.f32 %v868_v24, %v867_v26 }
 0x540   :  { %v760_v29 = vpop.permute.xlu1 %759 }
 0x541   :  { %v762_v31 = vmul.f32 %v760_v29, %v757_v28  ;;  %871 = vrot.lane.b32.xlu0 %v3578_v27, %s3311_s3  ;;  %v1224_v29 = vld [vmem:[#allocation3 + $0x20] sm:$0xff] }
 0x543   :  { %v3583_v32 = vadd.f32 %v763_v30, %v762_v31  ;;  %v1116_v31 = vld [vmem:[#allocation2 + $0x20] sm:$0xff] }
 0x545   :  { %893 = vrot.lane.b32.xlu1 %v3583_v32, %s3311_s3 }
 0x5b3   :  { %v872_v33 = vpop.permute.xlu0 %871 }
 0x5b4   :  { %875 = vst.msk [vmem:[#allocation4 + $0x8] sm:$0xff] %vm143_vm0, %v872_v33  ;;  %2863 = vmatmul.mubr.msk.f32.vlgmr.msra.gmra.mxu1 %vm143_vm0, %v872_v33 }
 0x5b5   :  { %2877 = vmatpush3.msra.mxu1 %v3429_v16  ;;  %2884 = vmatprep.mubr.msk.f32.mxu1 %vm3309_vm1, %v3308_v15 }
 0x5b6   :  { %2878 = vmatprep.subr.mxu1 %v3308_v15 }
 0x5b7   :  { %v894_v34 = vpop.permute.xlu1 %893  ;;  %2879 = vmatpush3.msra.mxu1 %v3445_v21 }
 0x5b8   :  { %2852 = vmatmul.mubr.msk.f32.vlgmr.msra.gmra.mxu0 %vm143_vm0, %v894_v34  ;;  %2880 = vmatprep.subr.mxu1 %v3308_v15 }
 0x5b9   :  { %2866 = vmatpush3.msra.mxu0 %v3425_v14  ;;  %2881 = vmatpush3.msra.mxu1 %v3459_v23 }
 0x5ba   :  { %2867 = vmatprep.subr.mxu0 %v3308_v15  ;;  %2882 = vmatprep.subr.mxu1 %v3308_v15 }
 0x5bb   :  { %2883 = vmatpush3.msra.mxu1 %v3469_v25  ;;  %2868 = vmatpush3.msra.mxu0 %v3433_v18 }
 0x5bc   :  { %2869 = vmatprep.subr.mxu0 %v3308_v15  ;;  %2873 = vmatprep.mubr.msk.f32.mxu0 %vm3309_vm1, %v3308_v15 }
 0x5bd   :  { %2870 = vmatpush3.msra.mxu0 %v3439_v20  ;;  %2898 = vmatprep.subr.mxu1 %v3308_v15 }
 0x5be   :  { %2871 = vmatprep.subr.mxu0 %v3308_v15 }
 0x5bf   :  { %2872 = vmatpush3.msra.mxu0 %v3447_v22 }
 0x5c0   :  { %2887 = vmatprep.subr.mxu0 %v3308_v15 }
 0x674   :  { %v1068_v35 = vpop.f32.mrf.mxu1 }
 0x675   :  { %v1079_v36 = vadd.f32 %v1068_v35, %v3522_v56  ;;  %v1072_v42 = vadd.f32 %v1068_v35, %v995_v41 }
 0x676   :  { %v2864_v37 = vpop.f32.mrf.mxu1 }
 0x677   :  { %1081 = vrot.lane.b32.xlu0 %v1079_v36, %s3310_s26  ;;  %v2613_v44 = vmul.f32 -1.442695, %v1072_v42 }
 0x678   :  { %v963_v38 = vpop.f32.mrf.mxu0 }
 0x679   :  { %v974_v39 = vadd.f32 %v963_v38, %v3527_v1  ;;  %v967_v46 = vadd.f32 %v963_v38, %v887_v43  ;;  %3044 = vpow2.f32 %v2613_v44 }
 0x67a   :  { %v2853_v40 = vpop.f32.mrf.mxu0 }
 0x67b   :  { %976 = vrot.lane.b32.xlu1 %v974_v39, %s3310_s26  ;;  %v2611_v47 = vmul.f32 -1.442695, %v967_v46 }
 0x67d   :  { %3046 = vpow2.f32 %v2611_v47 }
 0x686   :  { %v3045_v48 = vpop.eup %3044 }
 0x687   :  { %v1076_v49 = vadd.f32 1.0, %v3045_v48 }
 0x689   :  { %3048 = vrcp.f32 %v1076_v49 }
 0x68a   :  { %v3047_v50 = vpop.eup %3046 }
 0x68b   :  { %v971_v51 = vadd.f32 1.0, %v3047_v50 }
 0x68d   :  { %3050 = vrcp.f32 %v971_v51 }
 0x696   :  { %v3049_v52 = vpop.eup %3048 }
 0x697   :  { %v1091_v2 = vsub.f32 1.0, %v3049_v52  ;;  %v1097_v4 = vmul.f32 %v3049_v52, %v3578_v27 }
 0x69a   :  { %v3051_v55 = vpop.eup %3050 }
 0x69b   :  { %v986_v7 = vsub.f32 1.0, %v3051_v55  ;;  %v992_v9 = vmul.f32 %v3051_v55, %v3583_v32 }
 0x6e9   :  { %v1082_v53 = vpop.permute.xlu0 %1081 }
 0x6ea   :  { %v1084_v54 = vmul.f32 %v3049_v52, %v1082_v53 }
 0x6ec   :  { %1086 = vrot.lane.b32.xlu0 %v1084_v54, %s3310_s26 }
 0x6ed   :  { %v977_v57 = vpop.permute.xlu1 %976 }
 0x6ee   :  { %v979_v58 = vmul.f32 %v3051_v55, %v977_v57 }
 0x6f0   :  { %981 = vrot.lane.b32.xlu1 %v979_v58, %s3310_s26 }
 0x75e   :  { %v1087_v59 = vpop.permute.xlu0 %1086 }
 0x75f   :  { %v1089_v60 = vadd.f32 %v1087_v59, %v995_v41 }
 0x761   :  { %3052 = vtanh.f32 %v1089_v60 }
 0x762   :  { %v982_v61 = vpop.permute.xlu1 %981 }
 0x763   :  { %v984_v62 = vadd.f32 %v982_v61, %v887_v43 }
 0x765   :  { %3054 = vtanh.f32 %v984_v62 }
 0x76e   :  { %v3053_v63 = vpop.eup %3052 }
 0x76f   :  { %1093 = vrot.lane.b32.xlu0 %v3053_v63, %s3311_s3 }
 0x772   :  { %v3055_v0 = vpop.eup %3054 }
 0x773   :  { %988 = vrot.lane.b32.xlu1 %v3055_v0, %s3311_s3 }
 0x7e1   :  { %v1094_v3 = vpop.permute.xlu0 %1093 }
 0x7e2   :  { %v1096_v5 = vmul.f32 %v1094_v3, %v1091_v2 }
 0x7e4   :  { %v3619_v6 = vadd.f32 %v1097_v4, %v1096_v5 }
 0x7e5   :  { %v989_v8 = vpop.permute.xlu1 %988 }
 0x7e6   :  { %v991_v10 = vmul.f32 %v989_v8, %v986_v7  ;;  %1100 = vrot.lane.b32.xlu0 %v3619_v6, %s3311_s3 }
 0x7e8   :  { %v3624_v11 = vadd.f32 %v992_v9, %v991_v10 }
 0x7ea   :  { %1122 = vrot.lane.b32.xlu1 %v3624_v11, %s3311_s3 }
 0x858   :  { %v1101_v12 = vpop.permute.xlu0 %1100 }
 0x859   :  { %1104 = vst.msk [vmem:[#allocation4 + $0x10] sm:$0xff] %vm143_vm0, %v1101_v12  ;;  %2885 = vmatmul.mubr.msk.f32.vlgmr.msra.gmra.mxu1 %vm143_vm0, %v1101_v12 }
 0x85a   :  { %2899 = vmatpush3.msra.mxu1 %v3429_v16  ;;  %2906 = vmatprep.mubr.msk.f32.mxu1 %vm3309_vm1, %v3308_v15 }
 0x85b   :  { %2900 = vmatprep.subr.mxu1 %v3308_v15 }
 0x85c   :  { %v1123_v13 = vpop.permute.xlu1 %1122  ;;  %2901 = vmatpush3.msra.mxu1 %v3445_v21 }
 0x85d   :  { %2874 = vmatmul.mubr.msk.f32.vlgmr.msra.gmra.mxu0 %vm143_vm0, %v1123_v13  ;;  %2902 = vmatprep.subr.mxu1 %v3308_v15 }
 0x85e   :  { %2888 = vmatpush3.msra.mxu0 %v3425_v14  ;;  %2903 = vmatpush3.msra.mxu1 %v3459_v23 }
 0x85f   :  { %2889 = vmatprep.subr.mxu0 %v3308_v15  ;;  %2904 = vmatprep.subr.mxu1 %v3308_v15 }
 0x860   :  { %2905 = vmatpush3.msra.mxu1 %v3469_v25  ;;  %2890 = vmatpush3.msra.mxu0 %v3433_v18 }
 0x861   :  { %2891 = vmatprep.subr.mxu0 %v3308_v15  ;;  %2895 = vmatprep.mubr.msk.f32.mxu0 %vm3309_vm1, %v3308_v15 }
 0x862   :  { %2892 = vmatpush3.msra.mxu0 %v3439_v20  ;;  %2920 = vmatprep.subr.mxu1 %v3308_v15 }
 0x863   :  { %2893 = vmatprep.subr.mxu0 %v3308_v15 }
 0x864   :  { %2894 = vmatpush3.msra.mxu0 %v3447_v22 }
 0x865   :  { %2909 = vmatprep.subr.mxu0 %v3308_v15 }
 0x919   :  { %v1297_v17 = vpop.f32.mrf.mxu1 }
 0x91a   :  { %v1308_v19 = vadd.f32 %v1297_v17, %v3522_v56  ;;  %v1301_v30 = vadd.f32 %v1297_v17, %v1224_v29 }
 0x91b   :  { %v2886_v24 = vpop.f32.mrf.mxu1 }
 0x91c   :  { %1310 = vrot.lane.b32.xlu0 %v1308_v19, %s3310_s26  ;;  %v2617_v33 = vmul.f32 -1.442695, %v1301_v30 }
 0x91d   :  { %v1192_v26 = vpop.f32.mrf.mxu0 }
 0x91e   :  { %v1203_v27 = vadd.f32 %v1192_v26, %v3527_v1  ;;  %v1196_v34 = vadd.f32 %v1192_v26, %v1116_v31  ;;  %3056 = vpow2.f32 %v2617_v33 }
 0x91f   :  { %v2875_v28 = vpop.f32.mrf.mxu0 }
 0x920   :  { %1205 = vrot.lane.b32.xlu1 %v1203_v27, %s3310_s26  ;;  %v2615_v35 = vmul.f32 -1.442695, %v1196_v34 }
 0x922   :  { %3058 = vpow2.f32 %v2615_v35 }
 0x92b   :  { %v3057_v36 = vpop.eup %3056 }
 0x92c   :  { %v1305_v37 = vadd.f32 1.0, %v3057_v36 }
 0x92e   :  { %3060 = vrcp.f32 %v1305_v37 }
 0x92f   :  { %v3059_v38 = vpop.eup %3058 }
 0x930   :  { %v1200_v39 = vadd.f32 1.0, %v3059_v38 }
 0x932   :  { %3062 = vrcp.f32 %v1200_v39 }
 0x93b   :  { %v3061_v40 = vpop.eup %3060 }
 0x93c   :  { %v1320_v53 = vsub.f32 1.0, %v3061_v40  ;;  %v1326_v55 = vmul.f32 %v3061_v40, %v3619_v6  ;;  %v1345_v6 = vld [vmem:[#allocation2 + $0x18] sm:$0xff] }
 0x93f   :  { %v3063_v43 = vpop.eup %3062 }
 0x940   :  { %v1215_v59 = vsub.f32 1.0, %v3063_v43  ;;  %v1221_v61 = vmul.f32 %v3063_v43, %v3624_v11 }
 0x98e   :  { %v1311_v41 = vpop.permute.xlu0 %1310 }
 0x98f   :  { %v1313_v42 = vmul.f32 %v3061_v40, %v1311_v41 }
 0x991   :  { %1315 = vrot.lane.b32.xlu0 %v1313_v42, %s3310_s26 }
 0x992   :  { %v1206_v44 = vpop.permute.xlu1 %1205 }
 0x993   :  { %v1208_v46 = vmul.f32 %v3063_v43, %v1206_v44 }
 0x995   :  { %1210 = vrot.lane.b32.xlu1 %v1208_v46, %s3310_s26 }
 0xa03   :  { %v1316_v47 = vpop.permute.xlu0 %1315 }
 0xa04   :  { %v1318_v48 = vadd.f32 %v1316_v47, %v1224_v29 }
 0xa06   :  { %3064 = vtanh.f32 %v1318_v48 }
 0xa07   :  { %v1211_v49 = vpop.permute.xlu1 %1210 }
 0xa08   :  { %v1213_v50 = vadd.f32 %v1211_v49, %v1116_v31 }
 0xa0a   :  { %3066 = vtanh.f32 %v1213_v50 }
 0xa13   :  { %v3065_v51 = vpop.eup %3064 }
 0xa14   :  { %1322 = vrot.lane.b32.xlu0 %v3065_v51, %s3311_s3 }
 0xa17   :  { %v3067_v52 = vpop.eup %3066 }
 0xa18   :  { %1217 = vrot.lane.b32.xlu1 %v3067_v52, %s3311_s3 }
 0xa86   :  { %v1323_v54 = vpop.permute.xlu0 %1322 }
 0xa87   :  { %v1325_v57 = vmul.f32 %v1323_v54, %v1320_v53 }
 0xa89   :  { %v3660_v58 = vadd.f32 %v1326_v55, %v1325_v57  ;;  %v1682_v55 = vld [vmem:[#allocation3 + $0x10] sm:$0xff] }
 0xa8a   :  { %v1218_v60 = vpop.permute.xlu1 %1217 }
 0xa8b   :  { %v1220_v62 = vmul.f32 %v1218_v60, %v1215_v59  ;;  %1329 = vrot.lane.b32.xlu0 %v3660_v58, %s3311_s3 }
 0xa8d   :  { %v3665_v63 = vadd.f32 %v1221_v61, %v1220_v62 }
 0xa8f   :  { %1351 = vrot.lane.b32.xlu1 %v3665_v63, %s3311_s3 }
 0xafd   :  { %v1330_v0 = vpop.permute.xlu0 %1329 }
 0xafe   :  { %1333 = vst.msk [vmem:[#allocation4 + $0x18] sm:$0xff] %vm143_vm0, %v1330_v0  ;;  %2907 = vmatmul.mubr.msk.f32.vlgmr.msra.gmra.mxu1 %vm143_vm0, %v1330_v0 }
 0xaff   :  { %2921 = vmatpush3.msra.mxu1 %v3429_v16  ;;  %2928 = vmatprep.mubr.msk.f32.mxu1 %vm3309_vm1, %v3308_v15 }
 0xb00   :  { %2922 = vmatprep.subr.mxu1 %v3308_v15 }
 0xb01   :  { %v1352_v2 = vpop.permute.xlu1 %1351  ;;  %2923 = vmatpush3.msra.mxu1 %v3445_v21 }
 0xb02   :  { %2896 = vmatmul.mubr.msk.f32.vlgmr.msra.gmra.mxu0 %vm143_vm0, %v1352_v2  ;;  %2924 = vmatprep.subr.mxu1 %v3308_v15 }
 0xb03   :  { %2910 = vmatpush3.msra.mxu0 %v3425_v14  ;;  %2925 = vmatpush3.msra.mxu1 %v3459_v23 }
 0xb04   :  { %2911 = vmatprep.subr.mxu0 %v3308_v15  ;;  %2926 = vmatprep.subr.mxu1 %v3308_v15 }
 0xb05   :  { %2927 = vmatpush3.msra.mxu1 %v3469_v25  ;;  %2912 = vmatpush3.msra.mxu0 %v3433_v18 }
 0xb06   :  { %2913 = vmatprep.subr.mxu0 %v3308_v15  ;;  %2917 = vmatprep.mubr.msk.f32.mxu0 %vm3309_vm1, %v3308_v15 }
 0xb07   :  { %2914 = vmatpush3.msra.mxu0 %v3439_v20  ;;  %2942 = vmatprep.subr.mxu1 %v3308_v15  ;;  %v1453_v20 = vld [vmem:[#allocation3 + $0x18] sm:$0xff] }
 0xb08   :  { %2915 = vmatprep.subr.mxu0 %v3308_v15 }
 0xb09   :  { %2916 = vmatpush3.msra.mxu0 %v3447_v22 }
 0xb0a   :  { %2931 = vmatprep.subr.mxu0 %v3308_v15 }
 0xbbe   :  { %v1526_v14 = vpop.f32.mrf.mxu1 }
 0xbbf   :  { %v1537_v16 = vadd.f32 %v1526_v14, %v3522_v56  ;;  %v1530_v5 = vadd.f32 %v1526_v14, %v1453_v20 }
 0xbc0   :  { %v2908_v21 = vpop.f32.mrf.mxu1 }
 0xbc1   :  { %1539 = vrot.lane.b32.xlu0 %v1537_v16, %s3310_s26  ;;  %v2621_v7 = vmul.f32 -1.442695, %v1530_v5 }
 0xbc2   :  { %v1421_v18 = vpop.f32.mrf.mxu0 }
 0xbc3   :  { %v1432_v3 = vadd.f32 %v1421_v18, %v3527_v1  ;;  %v1425_v8 = vadd.f32 %v1421_v18, %v1345_v6  ;;  %3068 = vpow2.f32 %v2621_v7 }
 0xbc4   :  { %v2897_v4 = vpop.f32.mrf.mxu0 }
 0xbc5   :  { %1434 = vrot.lane.b32.xlu1 %v1432_v3, %s3310_s26  ;;  %v2619_v22 = vmul.f32 -1.442695, %v1425_v8 }
 0xbc7   :  { %3070 = vpow2.f32 %v2619_v22  ;;  %v1915_v22 = vld [vmem:[#allocation14 + $0x18] sm:$0xff] }
 0xbd0   :  { %v3069_v9 = vpop.eup %3068 }
 0xbd1   :  { %v1534_v10 = vadd.f32 1.0, %v3069_v9  ;;  %v1914_v9 = vld [vmem:[#allocation14 + $0x10] sm:$0xff] }
 0xbd3   :  { %3072 = vrcp.f32 %v1534_v10  ;;  %v1807_v10 = vld [vmem:[#allocation11 + $0x18] sm:$0xff] }
 0xbd4   :  { %v3071_v12 = vpop.eup %3070 }
 0xbd5   :  { %v1429_v13 = vadd.f32 1.0, %v3071_v12 }
 0xbd7   :  { %3074 = vrcp.f32 %v1429_v13 }
 0xbe0   :  { %v3073_v17 = vpop.eup %3072 }
 0xbe1   :  { %v1549_v36 = vsub.f32 1.0, %v3073_v17  ;;  %v1555_v38 = vmul.f32 %v3073_v17, %v3660_v58  ;;  %v1574_v58 = vld [vmem:[#allocation2 + $0x10] sm:$0xff] }
 0xbe4   :  { %v3075_v26 = vpop.eup %3074 }
 0xbe5   :  { %v1444_v41 = vsub.f32 1.0, %v3075_v26  ;;  %v1450_v43 = vmul.f32 %v3075_v26, %v3665_v63 }
 0xc33   :  { %v1540_v19 = vpop.permute.xlu0 %1539 }
 0xc34   :  { %v1542_v24 = vmul.f32 %v3073_v17, %v1540_v19  ;;  %v1806_v17 = vld [vmem:[#allocation11 + $0x10] sm:$0xff]  ;;  %v1805_v19 = vld [vmem:[#allocation11 + $0x8] sm:$0xff] }
 0xc36   :  { %1544 = vrot.lane.b32.xlu0 %v1542_v24, %s3310_s26  ;;  %v1804_v24 = vld [vmem:[#allocation11] sm:$0xff] }
 0xc37   :  { %v1435_v27 = vpop.permute.xlu1 %1434 }
 0xc38   :  { %v1437_v28 = vmul.f32 %v3075_v26, %v1435_v27 }
 0xc3a   :  { %1439 = vrot.lane.b32.xlu1 %v1437_v28, %s3310_s26 }
 0xca8   :  { %v1545_v29 = vpop.permute.xlu0 %1544 }
 0xca9   :  { %v1547_v30 = vadd.f32 %v1545_v29, %v1453_v20 }
 0xcab   :  { %3076 = vtanh.f32 %v1547_v30 }
 0xcac   :  { %v1440_v31 = vpop.permute.xlu1 %1439 }
 0xcad   :  { %v1442_v33 = vadd.f32 %v1440_v31, %v1345_v6 }
 0xcaf   :  { %3078 = vtanh.f32 %v1442_v33 }
 0xcb8   :  { %v3077_v34 = vpop.eup %3076 }
 0xcb9   :  { %1551 = vrot.lane.b32.xlu0 %v3077_v34, %s3311_s3 }
 0xcbc   :  { %v3079_v35 = vpop.eup %3078 }
 0xcbd   :  { %1446 = vrot.lane.b32.xlu1 %v3079_v35, %s3311_s3 }
 0xd2b   :  { %v1552_v37 = vpop.permute.xlu0 %1551 }
 0xd2c   :  { %v1554_v39 = vmul.f32 %v1552_v37, %v1549_v36 }
 0xd2e   :  { %v3701_v40 = vadd.f32 %v1555_v38, %v1554_v39 }
 0xd2f   :  { %v1447_v42 = vpop.permute.xlu1 %1446 }
 0xd30   :  { %v1449_v44 = vmul.f32 %v1447_v42, %v1444_v41  ;;  %1558 = vrot.lane.b32.xlu0 %v3701_v40, %s3311_s3 }
 0xd32   :  { %v3706_v46 = vadd.f32 %v1450_v43, %v1449_v44  ;;  %v1911_v43 = vld [vmem:[#allocation3 + $0x8] sm:$0xff] }
 0xd34   :  { %1580 = vrot.lane.b32.xlu1 %v3706_v46, %s3311_s3 }
 0xda2   :  { %v1559_v47 = vpop.permute.xlu0 %1558 }
 0xda3   :  { %1562 = vst.msk [vmem:[#allocation4 + $0x20] sm:$0xff] %vm143_vm0, %v1559_v47  ;;  %2929 = vmatmul.mubr.msk.f32.vlgmr.msra.gmra.mxu1 %vm143_vm0, %v1559_v47  ;;  %v1803_v47 = vld [vmem:[#allocation2 + $0x8] sm:$0xff] }
 0xda4   :  { %2950 = vmatprep.mubr.msk.f32.mxu1 %vm3309_vm1, %v3308_v15  ;;  %2943 = vmatpush3.msra.mxu1 %v1915_v22 }
 0xda5   :  { %2944 = vmatprep.subr.mxu1 %v3308_v15 }
 0xda6   :  { %v1581_v48 = vpop.permute.xlu1 %1580  ;;  %2945 = vmatpush3.msra.mxu1 %v1914_v9 }
 0xda7   :  { %2918 = vmatmul.mubr.msk.f32.vlgmr.msra.gmra.mxu0 %vm143_vm0, %v1581_v48  ;;  %2946 = vmatprep.subr.mxu1 %v3308_v15 }
 0xda8   :  { %2939 = vmatprep.mubr.msk.f32.mxu0 %vm3309_vm1, %v3308_v15  ;;  %2932 = vmatpush3.msra.mxu0 %v1807_v10 }
 0xda9   :  { %2933 = vmatprep.subr.mxu0 %v3308_v15  ;;  %2947 = vmatpush3.msra.mxu1 %v3459_v23 }
 0xdaa   :  { %2948 = vmatprep.subr.mxu1 %v3308_v15  ;;  %2934 = vmatpush3.msra.mxu0 %v1806_v17 }
 0xdab   :  { %2949 = vmatpush3.msra.mxu1 %v3469_v25  ;;  %2935 = vmatprep.subr.mxu0 %v3308_v15 }
 0xdac   :  { %2964 = vmatprep.subr.mxu1 %v3308_v15  ;;  %2936 = vmatpush3.msra.mxu0 %v1805_v19 }
 0xdad   :  { %2937 = vmatprep.subr.mxu0 %v3308_v15 }
 0xdae   :  { %2938 = vmatpush3.msra.mxu0 %v1804_v24 }
 0xdaf   :  { %2953 = vmatprep.subr.mxu0 %v3308_v15 }
 0xe63   :  { %v1755_v49 = vpop.f32.mrf.mxu1 }
 0xe64   :  { %v1766_v50 = vadd.f32 %v1755_v49, %v3522_v56  ;;  %v1759_v57 = vadd.f32 %v1755_v49, %v1682_v55 }
 0xe65   :  { %v2930_v51 = vpop.f32.mrf.mxu1 }
 0xe66   :  { %1768 = vrot.lane.b32.xlu0 %v1766_v50, %s3310_s26  ;;  %v2625_v59 = vmul.f32 -1.442695, %v1759_v57 }
 0xe67   :  { %v1650_v52 = vpop.f32.mrf.mxu0 }
 0xe68   :  { %v1661_v53 = vadd.f32 %v1650_v52, %v3527_v1  ;;  %v1654_v60 = vadd.f32 %v1650_v52, %v1574_v58  ;;  %3080 = vpow2.f32 %v2625_v59 }
 0xe69   :  { %v2919_v54 = vpop.f32.mrf.mxu0 }
 0xe6a   :  { %1663 = vrot.lane.b32.xlu1 %v1661_v53, %s3310_s26  ;;  %v2623_v61 = vmul.f32 -1.442695, %v1654_v60 }
 0xe6c   :  { %3082 = vpow2.f32 %v2623_v61 }
 0xe75   :  { %v3081_v62 = vpop.eup %3080 }
 0xe76   :  { %v1763_v0 = vadd.f32 1.0, %v3081_v62 }
 0xe78   :  { %3084 = vrcp.f32 %v1763_v0 }
 0xe79   :  { %v3083_v2 = vpop.eup %3082 }
 0xe7a   :  { %v1658_v14 = vadd.f32 1.0, %v3083_v2 }
 0xe7c   :  { %3086 = vrcp.f32 %v1658_v14 }
 0xe85   :  { %v3085_v16 = vpop.eup %3084 }
 0xe86   :  { %v1778_v23 = vsub.f32 1.0, %v3085_v16  ;;  %v1784_v25 = vmul.f32 %v3085_v16, %v3701_v40 }
 0xe89   :  { %v3087_v3 = vpop.eup %3086 }
 0xe8a   :  { %v1673_v29 = vsub.f32 1.0, %v3087_v3  ;;  %v1679_v31 = vmul.f32 %v3087_v3, %v3706_v46 }
 0xed8   :  { %v1769_v21 = vpop.permute.xlu0 %1768 }
 0xed9   :  { %v1771_v18 = vmul.f32 %v3085_v16, %v1769_v21  ;;  %v2140_v16 = vld [vmem:[#allocation14 + $0x8] sm:$0xff]  ;;  %v2139_v21 = vld [vmem:[#allocation14] sm:$0xff] }
 0xedb   :  { %1773 = vrot.lane.b32.xlu0 %v1771_v18, %s3310_s26 }
 0xedc   :  { %v1664_v4 = vpop.permute.xlu1 %1663 }
 0xedd   :  { %v1666_v20 = vmul.f32 %v3087_v3, %v1664_v4  ;;  %v2340_v4 = vld [vmem:[#allocation15 + $0x18] sm:$0xff] }
 0xedf   :  { %1668 = vrot.lane.b32.xlu1 %v1666_v20, %s3310_s26 }
 0xf4d   :  { %v1774_v5 = vpop.permute.xlu0 %1773 }
 0xf4e   :  { %v1776_v6 = vadd.f32 %v1774_v5, %v1682_v55 }
 0xf50   :  { %3088 = vtanh.f32 %v1776_v6 }
 0xf51   :  { %v1669_v7 = vpop.permute.xlu1 %1668 }
 0xf52   :  { %v1671_v8 = vadd.f32 %v1669_v7, %v1574_v58 }
 0xf54   :  { %3090 = vtanh.f32 %v1671_v8 }
 0xf5d   :  { %v3089_v12 = vpop.eup %3088 }
 0xf5e   :  { %1780 = vrot.lane.b32.xlu0 %v3089_v12, %s3311_s3 }
 0xf61   :  { %v3091_v13 = vpop.eup %3090 }
 0xf62   :  { %1675 = vrot.lane.b32.xlu1 %v3091_v13, %s3311_s3 }
 0xfd0   :  { %v1781_v26 = vpop.permute.xlu0 %1780 }
 0xfd1   :  { %v1783_v27 = vmul.f32 %v1781_v26, %v1778_v23  ;;  %v2338_v23 = vld [vmem:[#allocation15 + $0x8] sm:$0xff]  ;;  %v2337_v26 = vld [vmem:[#allocation15] sm:$0xff] }
 0xfd3   :  { %v3736_v28 = vadd.f32 %v1784_v25, %v1783_v27  ;;  %v2330_v25 = vld [vmem:[#allocation4 + $0x8] sm:$0xff]  ;;  %v2331_v27 = vld [vmem:[#allocation4 + $0x10] sm:$0xff] }
 0xfd4   :  { %v1676_v30 = vpop.permute.xlu1 %1675 }
 0xfd5   :  { %v1678_v33 = vmul.f32 %v1676_v30, %v1673_v29  ;;  %1787 = vrot.lane.b32.xlu0 %v3736_v28, %s3311_s3  ;;  %v2333_v29 = vld [vmem:[#allocation4 + $0x20] sm:$0xff] }
 0xfd7   :  { %v3741_v34 = vadd.f32 %v1679_v31, %v1678_v33 }
 0xfd9   :  { %1809 = vrot.lane.b32.xlu1 %v3741_v34, %s3311_s3 }
0x1047   :  { %v1788_v35 = vpop.permute.xlu0 %1787 }
0x1048   :  { %1791 = vst.msk [vmem:[#allocation4 + $0x28] sm:$0xff] %vm143_vm0, %v1788_v35  ;;  %2951 = vmatmul.mubr.msk.f32.vlgmr.msra.gmra.mxu1 %vm143_vm0, %v1788_v35 }
0x1049   :  { %2965 = vmatpush3.msra.mxu1 %v1915_v22  ;;  %2972 = vmatprep.mubr.msk.f32.mxu1 %vm3309_vm1, %v3308_v15 }
0x104a   :  { %2966 = vmatprep.subr.mxu1 %v3308_v15 }
0x104b   :  { %v1810_v36 = vpop.permute.xlu1 %1809  ;;  %2967 = vmatpush3.msra.mxu1 %v1914_v9 }
0x104c   :  { %2940 = vmatmul.mubr.msk.f32.vlgmr.msra.gmra.mxu0 %vm143_vm0, %v1810_v36  ;;  %2968 = vmatprep.subr.mxu1 %v3308_v15 }
0x104d   :  { %2954 = vmatpush3.msra.mxu0 %v1807_v10  ;;  %2961 = vmatprep.mubr.msk.f32.mxu0 %vm3309_vm1, %v3308_v15 }
0x104e   :  { %2955 = vmatprep.subr.mxu0 %v3308_v15  ;;  %2969 = vmatpush3.msra.mxu1 %v2140_v16 }
0x104f   :  { %2956 = vmatpush3.msra.mxu0 %v1806_v17  ;;  %2970 = vmatprep.subr.mxu1 %v3308_v15  ;;  %v2334_v30 = vld [vmem:[#allocation4 + $0x28] sm:$0xff] }
0x1050   :  { %2957 = vmatprep.subr.mxu0 %v3308_v15  ;;  %2971 = vmatpush3.msra.mxu1 %v2139_v21 }
0x1051   :  { %2958 = vmatpush3.msra.mxu0 %v1805_v19  ;;  %v2339_v19 = vld [vmem:[#allocation15 + $0x10] sm:$0xff] }
0x1052   :  { %2959 = vmatprep.subr.mxu0 %v3308_v15 }
0x1053   :  { %2960 = vmatpush3.msra.mxu0 %v1804_v24  ;;  %v2329_v24 = vld [vmem:[#allocation4] sm:$0xff] }
0x1054   :  { %2975 = vmatprep.subr.mxu0 %v2340_v4 }
0x1108   :  { %v1984_v37 = vpop.f32.mrf.mxu1 }
0x1109   :  { %v1995_v38 = vadd.f32 %v1984_v37, %v3522_v56  ;;  %v1988_v44 = vadd.f32 %v1984_v37, %v1911_v43 }
0x110a   :  { %v2952_v39 = vpop.f32.mrf.mxu1 }
0x110b   :  { %1997 = vrot.lane.b32.xlu0 %v1995_v38, %s3310_s26  ;;  %v2629_v48 = vmul.f32 -1.442695, %v1988_v44 }
0x110c   :  { %v1879_v40 = vpop.f32.mrf.mxu0 }
0x110d   :  { %v1890_v41 = vadd.f32 %v1879_v40, %v3527_v1  ;;  %v1883_v49 = vadd.f32 %v1879_v40, %v1803_v47  ;;  %3092 = vpow2.f32 %v2629_v48  ;;  %v2138_v40 = vld [vmem:[#allocation3] sm:$0xff] }
0x110e   :  { %v2941_v42 = vpop.f32.mrf.mxu0 }
0x110f   :  { %1892 = vrot.lane.b32.xlu1 %v1890_v41, %s3310_s26  ;;  %v2627_v50 = vmul.f32 -1.442695, %v1883_v49  ;;  %v2031_v42 = vld [vmem:[#allocation2] sm:$0xff] }
0x1111   :  { %3094 = vpow2.f32 %v2627_v50 }
0x111a   :  { %v3093_v51 = vpop.eup %3092 }
0x111b   :  { %v1992_v52 = vadd.f32 1.0, %v3093_v51 }
0x111d   :  { %3096 = vrcp.f32 %v1992_v52 }
0x111e   :  { %v3095_v53 = vpop.eup %3094 }
0x111f   :  { %v1887_v54 = vadd.f32 1.0, %v3095_v53 }
0x1121   :  { %3098 = vrcp.f32 %v1887_v54 }
0x112a   :  { %v3097_v55 = vpop.eup %3096 }
0x112b   :  { %v2007_v20 = vsub.f32 1.0, %v3097_v55  ;;  %v2013_v6 = vmul.f32 %v3097_v55, %v3736_v28  ;;  %v2332_v28 = vld [vmem:[#allocation4 + $0x18] sm:$0xff] }
0x112e   :  { %v3099_v59 = vpop.eup %3098 }
0x112f   :  { %v1902_v22 = vsub.f32 1.0, %v3099_v59  ;;  %v1908_v15 = vmul.f32 %v3099_v59, %v3741_v34 }
0x117d   :  { %v1998_v57 = vpop.permute.xlu0 %1997 }
0x117e   :  { %v2000_v58 = vmul.f32 %v3097_v55, %v1998_v57 }
0x1180   :  { %2002 = vrot.lane.b32.xlu0 %v2000_v58, %s3310_s26 }
0x1181   :  { %v1893_v60 = vpop.permute.xlu1 %1892 }
0x1182   :  { %v1895_v61 = vmul.f32 %v3099_v59, %v1893_v60 }
0x1184   :  { %1897 = vrot.lane.b32.xlu1 %v1895_v61, %s3310_s26 }
0x11f2   :  { %v2003_v62 = vpop.permute.xlu0 %2002 }
0x11f3   :  { %v2005_v0 = vadd.f32 %v2003_v62, %v1911_v43  ;;  %v2601_v62 = vld [vmem:[%s3873_s9] ss:$0 sm:$0xff] }
0x11f5   :  { %3100 = vtanh.f32 %v2005_v0 }
0x11f6   :  { %v1898_v2 = vpop.permute.xlu1 %1897 }
0x11f7   :  { %v1900_v14 = vadd.f32 %v1898_v2, %v1803_v47 }
0x11f9   :  { %3102 = vtanh.f32 %v1900_v14 }
0x1202   :  { %v3101_v18 = vpop.eup %3100 }
0x1203   :  { %2009 = vrot.lane.b32.xlu0 %v3101_v18, %s3311_s3 }
0x1206   :  { %v3103_v3 = vpop.eup %3102 }
0x1207   :  { %1904 = vrot.lane.b32.xlu1 %v3103_v3, %s3311_s3 }
0x1275   :  { %v2010_v5 = vpop.permute.xlu0 %2009 }
0x1276   :  { %v2012_v7 = vmul.f32 %v2010_v5, %v2007_v20 }
0x1278   :  { %v3767_v8 = vadd.f32 %v2013_v6, %v2012_v7 }
0x1279   :  { %v1905_v9 = vpop.permute.xlu1 %1904 }
0x127a   :  { %v1907_v10 = vmul.f32 %v1905_v9, %v1902_v22  ;;  %2016 = vrot.lane.b32.xlu0 %v3767_v8, %s3311_s3 }
0x127c   :  { %v3772_v12 = vadd.f32 %v1908_v15, %v1907_v10 }
0x127e   :  { %2037 = vrot.lane.b32.xlu1 %v3772_v12, %s3311_s3 }
0x12ec   :  { %v2017_v13 = vpop.permute.xlu0 %2016 }
0x12ed   :  { %2020 = vst.msk [vmem:[#allocation4 + $0x30] sm:$0xff] %vm143_vm0, %v2017_v13  ;;  %2973 = vmatmul.mubr.msk.f32.vlgmr.msra.gmra.mxu1 %vm143_vm0, %v2017_v13 }
0x12f0   :  { %v2038_v17 = vpop.permute.xlu1 %2037 }
0x12f1   :  { %2962 = vmatmul.mubr.msk.f32.vlgmr.msra.gmra.mxu0 %vm143_vm0, %v2038_v17 }
0x12f2   :  { %2976 = vmatpush3.msra.mxu0 %v2340_v4  ;;  %2983 = vmatprep.mubr.msk.f32.mxu0 %vm143_vm0, %v2329_v24 }
0x12f3   :  { %2977 = vmatprep.subr.mxu0 %v2339_v19 }
0x12f4   :  { %2978 = vmatpush3.msra.mxu0 %v2339_v19  ;;  %v2335_v31 = vld [vmem:[#allocation4 + $0x30] sm:$0xff] }
0x12f5   :  { %2979 = vmatprep.subr.mxu0 %v2338_v23 }
0x12f6   :  { %2980 = vmatpush3.msra.mxu0 %v2338_v23 }
0x12f7   :  { %2981 = vmatprep.subr.mxu0 %v2337_v26 }
0x12f8   :  { %2982 = vmatpush3.msra.mxu0 %v2337_v26 }
0x12f9   :  { %2984 = vmatmul.mubr.msk.f32.vlgmr.msra.gmra.mxu0 %vm143_vm0, %v2330_v25 }
0x12fa   :  { %2986 = vmatprep.mubr.msk.f32.mxu0 %vm143_vm0, %v2331_v27 }
0x12fd   :  { %2987 = vmatmul.mubr.msk.f32.gmra.mxu0 %vm143_vm0, %v2332_v28 }
0x12fe   :  { %2989 = vmatprep.mubr.msk.f32.mxu0 %vm143_vm0, %v2333_v29 }
0x1301   :  { %2990 = vmatmul.mubr.msk.f32.gmra.mxu0 %vm143_vm0, %v2334_v30 }
0x1302   :  { %2992 = vmatprep.mubr.msk.f32.mxu0 %vm143_vm0, %v2335_v31 }
0x13ad   :  { %v2211_v33 = vpop.f32.mrf.mxu1 }
0x13ae   :  { %v2222_v35 = vadd.f32 %v2211_v33, %v3522_v56  ;;  %v2215_v41 = vadd.f32 %v2211_v33, %v2138_v40 }
0x13af   :  { %v2974_v36 = vpop.f32.mrf.mxu1 }
0x13b0   :  { %2224 = vrot.lane.b32.xlu0 %v2222_v35, %s3310_s26  ;;  %v2633_v43 = vmul.f32 -1.442695, %v2215_v41  ;;  %v3313_v36 = vmov 0  }
0x13b1   :  { %v2107_v37 = vpop.f32.mrf.mxu0  ;;  %3019 = vset.pattern.permute.xlu0 %v3313_v36  ;;  %3018 = vset.pattern.permute.xlu1 %v3313_v36 }
0x13b2   :  { %v2118_v38 = vadd.f32 %v2107_v37, %v3527_v1  ;;  %v2111_v44 = vadd.f32 %v2107_v37, %v2031_v42  ;;  %3104 = vpow2.f32 %v2633_v43 }
0x13b3   :  { %v2963_v39 = vpop.f32.mrf.mxu0 }
0x13b4   :  { %2120 = vrot.lane.b32.xlu1 %v2118_v38, %s3310_s26  ;;  %v2631_v47 = vmul.f32 -1.442695, %v2111_v44 }
0x13b6   :  { %3106 = vpow2.f32 %v2631_v47 }
0x13bf   :  { %v3105_v48 = vpop.eup %3104 }
0x13c0   :  { %v2219_v49 = vadd.f32 1.0, %v3105_v48 }
0x13c2   :  { %3108 = vrcp.f32 %v2219_v49 }
0x13c3   :  { %v3107_v56 = vpop.eup %3106 }
0x13c4   :  { %v2115_v50 = vadd.f32 1.0, %v3107_v56 }
0x13c6   :  { %3110 = vrcp.f32 %v2115_v50 }
0x13cf   :  { %v3109_v51 = vpop.eup %3108 }
0x13d0   :  { %v2234_v14 = vsub.f32 1.0, %v3109_v51  ;;  %v2240_v4 = vmul.f32 %v3109_v51, %v3767_v8 }
0x13d3   :  { %v3111_v53 = vpop.eup %3110 }
0x13d4   :  { %v2130_v7 = vsub.f32 1.0, %v3111_v53  ;;  %v2136_v8 = vmul.f32 %v3111_v53, %v3772_v12 }
0x1422   :  { %v2225_v52 = vpop.permute.xlu0 %2224 }
0x1423   :  { %v2227_v1 = vmul.f32 %v3109_v51, %v2225_v52 }
0x1425   :  { %2229 = vrot.lane.b32.xlu0 %v2227_v1, %s3310_s26 }
0x1426   :  { %v2121_v54 = vpop.permute.xlu1 %2120 }
0x1427   :  { %v2123_v55 = vmul.f32 %v3111_v53, %v2121_v54 }
0x1429   :  { %2125 = vrot.lane.b32.xlu1 %v2123_v55, %s3310_s26 }
0x1497   :  { %v2230_v57 = vpop.permute.xlu0 %2229 }
0x1498   :  { %v2232_v58 = vadd.f32 %v2230_v57, %v2138_v40 }
0x149a   :  { %3112 = vtanh.f32 %v2232_v58 }
0x149b   :  { %v2126_v59 = vpop.permute.xlu1 %2125 }
0x149c   :  { %v2128_v60 = vadd.f32 %v2126_v59, %v2031_v42 }
0x149e   :  { %3114 = vtanh.f32 %v2128_v60 }
0x14a7   :  { %v3113_v61 = vpop.eup %3112 }
0x14a8   :  { %2236 = vrot.lane.b32.xlu0 %v3113_v61, %s3311_s3 }
0x14ab   :  { %v3115_v0 = vpop.eup %3114 }
0x14ac   :  { %644 = vrot.lane.b32.xlu0 %v2601_v62, %s3312_s1  ;;  %2132 = vrot.lane.b32.xlu1 %v3115_v0, %s3311_s3 }
0x151a   :  { %v2237_v2 = vpop.permute.xlu0 %2236 }
0x151b   :  { %v2239_v21 = vmul.f32 %v2237_v2, %v2234_v14 }
0x151d   :  { %v2241_v20 = vadd.f32 %v2240_v4, %v2239_v21 }
0x151e   :  { %v645_v16 = vpop.permute.xlu0 %644  ;;  %v2133_v6 = vpop.permute.xlu1 %2132 }
0x151f   :  { %v647_v18 = vmul.f32 %v645_v16, %v3542_v45  ;;  %v876_v3 = vmul.f32 %v3583_v32, %v645_v16  ;;  %v1105_v5 = vmul.f32 %v3624_v11, %v645_v16  ;;  %v2135_v22 = vmul.f32 %v2133_v6, %v2130_v7 }
0x1520   :  { %v1563_v45 = vmul.f32 %v3706_v46, %v645_v16  ;;  %v1334_v32 = vmul.f32 %v3665_v63, %v645_v16  ;;  %v2021_v11 = vmul.f32 %v3772_v12, %v645_v16  ;;  %v1792_v15 = vmul.f32 %v3741_v34, %v645_v16 }
0x1521   :  { %649 = vrot.lane.b32.xlu0 %v647_v18, %s3311_s3  ;;  %878 = vrot.lane.b32.xlu1 %v876_v3, %s3311_s3  ;;  %v2137_v9 = vadd.f32 %v2136_v8, %v2135_v22 }
0x1523   :  { %v2248_v10 = vmul.f32 %v2137_v9, %v645_v16 }
0x1525   :  { %1107 = vrot.lane.b32.xlu0 %v1105_v5, %s3311_s3  ;;  %2243 = vrot.lane.b32.xlu1 %v2241_v20, %s3311_s3 }
0x1529   :  { %1565 = vrot.lane.b32.xlu0 %v1563_v45, %s3311_s3  ;;  %1336 = vrot.lane.b32.xlu1 %v1334_v32, %s3311_s3 }
0x152d   :  { %2023 = vrot.lane.b32.xlu0 %v2021_v11, %s3311_s3  ;;  %1794 = vrot.lane.b32.xlu1 %v1792_v15, %s3311_s3 }
0x1531   :  { %2250 = vrot.lane.b32.xlu1 %v2248_v10, %s3311_s3 }
0x1593   :  { %v650_v46 = vpop.permute.xlu0 %649  ;;  %v879_v63 = vpop.permute.xlu1 %878 }
0x1594   :  { %v652_v13 = vsel %vm143_vm0, %v650_v46, 0.0  ;;  %v881_v17 = vsel %vm143_vm0, %v879_v63, 0.0 }
0x1595   :  { %653 = vadd.xlane.f32.xlu0 %v652_v13  ;;  %882 = vadd.xlane.f32.xlu1 %v881_v17 }
0x1597   :  { %v1108_v19 = vpop.permute.xlu0 %1107  ;;  %v2244_v24 = vpop.permute.xlu1 %2243 }
0x1598   :  { %2247 = vst.msk [vmem:[#allocation4 + $0x38] sm:$0xff] %vm143_vm0, %v2244_v24  ;;  %v1110_v34 = vsel %vm143_vm0, %v1108_v19, 0.0 }
0x1599   :  { %1111 = vadd.xlane.f32.xlu0 %v1110_v34 }
0x159b   :  { %v1566_v12 = vpop.permute.xlu0 %1565  ;;  %v1337_v23 = vpop.permute.xlu1 %1336 }
0x159c   :  { %v1568_v26 = vsel %vm143_vm0, %v1566_v12, 0.0  ;;  %v1339_v25 = vsel %vm143_vm0, %v1337_v23, 0.0 }
0x159d   :  { %1569 = vadd.xlane.f32.xlu1 %v1568_v26  ;;  %1340 = vadd.xlane.f32.xlu0 %v1339_v25 }
0x159f   :  { %v2024_v27 = vpop.permute.xlu0 %2023  ;;  %v1795_v28 = vpop.permute.xlu1 %1794  ;;  %v2336_v29 = vld [vmem:[#allocation4 + $0x38] sm:$0xff] }
0x15a0   :  { %2993 = vmatmul.mubr.msk.f32.gmra.mxu0 %vm143_vm0, %v2336_v29  ;;  %v2026_v30 = vsel %vm143_vm0, %v2024_v27, 0.0  ;;  %v1797_v31 = vsel %vm143_vm0, %v1795_v28, 0.0 }
0x15a1   :  { %2027 = vadd.xlane.f32.xlu1 %v2026_v30  ;;  %1798 = vadd.xlane.f32.xlu0 %v1797_v31 }
0x15a3   :  { %v2251_v33 = vpop.permute.xlu1 %2250 }
0x15a4   :  { %v2253_v35 = vsel %vm143_vm0, %v2251_v33, 0.0 }
0x15a5   :  { %2254 = vadd.xlane.f32.xlu0 %v2253_v35 }
0x161e   :  { %v654_v37 = vpop.xlane.xlu0 %653  ;;  %v883_v38 = vpop.xlane.xlu1 %882 }
0x161f   :  { %656 = vst.msk [vmem:[#allocation5] sm:$0xff] %vm655_vm3, %v654_v37  ;;  %885 = vst.msk [vmem:[#allocation5 + $0x8] sm:$0xff] %vm655_vm3, %v883_v38 }
0x1622   :  { %v1112_v39 = vpop.xlane.xlu0 %1111 }
0x1623   :  { %1114 = vst.msk [vmem:[#allocation5 + $0x10] sm:$0xff] %vm655_vm3, %v1112_v39 }
0x1626   :  { %v1341_v40 = vpop.xlane.xlu0 %1340  ;;  %v1570_v41 = vpop.xlane.xlu1 %1569  ;;  %v2259_v47 = vld [vmem:[#allocation5 + $0x8] sm:$0xff]  ;;  %v2258_v51 = vld [vmem:[#allocation5] sm:$0xff] }
0x1627   :  { %1343 = vst.msk [vmem:[#allocation5 + $0x18] sm:$0xff] %vm655_vm3, %v1341_v40  ;;  %1572 = vst.msk [vmem:[#allocation5 + $0x20] sm:$0xff] %vm655_vm3, %v1570_v41  ;;  %v2267_v53 = vsel %vm655_vm3, %v2259_v47, -inf  ;;  %v2266_v59 = vsel %vm655_vm3, %v2258_v51, -inf }
0x162a   :  { %v1799_v42 = vpop.xlane.xlu0 %1798  ;;  %v2028_v43 = vpop.xlane.xlu1 %2027  ;;  %v2260_v52 = vld [vmem:[#allocation5 + $0x10] sm:$0xff] }
0x162b   :  { %1801 = vst.msk [vmem:[#allocation5 + $0x28] sm:$0xff] %vm655_vm3, %v1799_v42  ;;  %2030 = vst.msk [vmem:[#allocation5 + $0x30] sm:$0xff] %vm655_vm3, %v2028_v43  ;;  %v2268_v60 = vsel %vm655_vm3, %v2260_v52, -inf }
0x162e   :  { %v2255_v44 = vpop.xlane.xlu0 %2254  ;;  %v2262_v48 = vld [vmem:[#allocation5 + $0x20] sm:$0xff]  ;;  %v2261_v1 = vld [vmem:[#allocation5 + $0x18] sm:$0xff] }
0x162f   :  { %2257 = vst.msk [vmem:[#allocation5 + $0x38] sm:$0xff] %vm655_vm3, %v2255_v44  ;;  %v2270_v54 = vsel %vm655_vm3, %v2262_v48, -inf  ;;  %v2269_v61 = vsel %vm655_vm3, %v2261_v1, -inf }
0x1630   :  { %v2271_v0 = vmax.f32 %v2266_v59, %v2270_v54 }
0x1632   :  { %v2263_v49 = vld [vmem:[#allocation5 + $0x28] sm:$0xff]  ;;  %v2264_v56 = vld [vmem:[#allocation5 + $0x30] sm:$0xff] }
0x1633   :  { %v2272_v50 = vsel %vm655_vm3, %v2263_v49, -inf  ;;  %v2274_v55 = vsel %vm655_vm3, %v2264_v56, -inf }
0x1634   :  { %v2273_v58 = vmax.f32 %v2267_v53, %v2272_v50  ;;  %v2275_v2 = vmax.f32 %v2268_v60, %v2274_v55 }
0x1636   :  { %v2265_v57 = vld [vmem:[#allocation5 + $0x38] sm:$0xff]  ;;  %v2278_v16 = vmax.f32 %v2271_v0, %v2273_v58 }
0x1637   :  { %v2276_v62 = vsel %vm655_vm3, %v2265_v57, -inf }
0x1638   :  { %v2277_v14 = vmax.f32 %v2269_v61, %v2276_v62 }
0x163a   :  { %v2279_v21 = vmax.f32 %v2275_v2, %v2277_v14 }
0x163c   :  { %v2280_v18 = vmax.f32 %v2278_v16, %v2279_v21 }
0x163e   :  { %v2281_v3 = vsub.f32 %v2258_v51, %v2280_v18  ;;  %v2282_v4 = vsub.f32 %v2259_v47, %v2280_v18  ;;  %v2283_v20 = vsub.f32 %v2260_v52, %v2280_v18  ;;  %v2284_v5 = vsub.f32 %v2261_v1, %v2280_v18  ;;  %v2985_v1 = vpop.f32.mrf.mxu0 }
0x163f   :  { %v2285_v6 = vsub.f32 %v2262_v48, %v2280_v18  ;;  %v2286_v32 = vsub.f32 %v2263_v49, %v2280_v18  ;;  %v2287_v9 = vsub.f32 %v2264_v56, %v2280_v18  ;;  %v2288_v15 = vsub.f32 %v2265_v57, %v2280_v18  ;;  %v2634_v57 = vld [vmem:[%s3875_s11] ss:$0 sm:$0xff]  ;;  %s3314_s11 = smov [#allocation17]  }
0x1640   :  { %v2289_v7 = vmul.f32 1.442695, %v2281_v3  ;;  %v2291_v22 = vmul.f32 1.442695, %v2282_v4  ;;  %v2293_v45 = vmul.f32 1.442695, %v2283_v20  ;;  %v2438_v53 = vpop.f32.mrf.mxu0  ;;  %v2444_v58 = vadd.f32 %v2985_v1, %v2634_v57 }
0x1641   :  { %v2295_v8 = vmul.f32 1.442695, %v2284_v5  ;;  %v2297_v11 = vmul.f32 1.442695, %v2285_v6  ;;  %v2299_v10 = vmul.f32 1.442695, %v2286_v32  ;;  %v2439_v60 = vadd.f32 %v2634_v57, %v2438_v53 }
0x1642   :  { %3116 = vpow2.f32 %v2289_v7  ;;  %v2301_v46 = vmul.f32 1.442695, %v2287_v9  ;;  %v2303_v63 = vmul.f32 1.442695, %v2288_v15  ;;  %v2988_v54 = vpop.f32.mrf.mxu0  ;;  %v2533_v9 = vld [vmem:[#allocation6] sm:$0xff]  ;;  %s2571_s20 = sshll.u32 %s3314_s11, 4  ;;  %s2572_s20 = int_to_ptr.vmem [resolvable:$true] %s2571_s20 }
0x1643   :  { %3118 = vpow2.f32 %v2291_v22  ;;  %v2454_v0 = vadd.f32 %v2988_v54, %v2634_v57  ;;  %s3270_s5 = scalar_lea.vmem %s2572_s20, 128  ;;  %p3275_p3 = scmp.lt.s32.totalorder %s2572_s20, %s2572_s20 }
0x1644   :  { %3120 = vpow2.f32 %v2293_v45  ;;  %v2448_v55 = vpop.f32.mrf.mxu0  ;;  %p3271_p2 = scmp.ne.s32.totalorder %s2572_s20, %s3270_s5  ;;  %p3276_p4 = scmp.lt.s32.totalorder %s3270_s5, %s3270_s5 }
0x1645   :  { %3122 = vpow2.f32 %v2295_v8  ;;  %v2449_v61 = vadd.f32 %v2634_v57, %v2448_v55  ;;  %v2534_v8 = vld [vmem:[#allocation6 + $0x8] sm:$0xff] }
0x1646   :  { %3124 = vpow2.f32 %v2297_v11  ;;  %v2991_v59 = vpop.f32.mrf.mxu0  ;;  %p3277_p5 = por %p3276_p4, %p3275_p3 }
0x1647   :  { %3126 = vpow2.f32 %v2299_v10  ;;  %v2464_v16 = vadd.f32 %v2991_v59, %v2634_v57 }
0x1648   :  { %3128 = vpow2.f32 %v2301_v46  ;;  %v2458_v62 = vpop.f32.mrf.mxu0  ;;  %v2535_v46 = vld [vmem:[#allocation6 + $0x10] sm:$0xff]  ;;  %p3278_p6 = pnand %p3277_p5, %p3271_p2 }
0x1649   :  { %3130 = vpow2.f32 %v2303_v63  ;;  %v2459_v2 = vadd.f32 %v2634_v57, %v2458_v62 }
0x164f   :  { %v3117_v13 = vpop.eup %3116 }
0x1650   :  { %v3119_v17 = vpop.eup %3118  ;;  %v2305_v19 = vsel %vm655_vm3, %v3117_v13, 0.0 }
0x1651   :  { %v3121_v24 = vpop.eup %3120  ;;  %v2306_v34 = vsel %vm655_vm3, %v3119_v17, 0.0 }
0x1652   :  { %v3123_v12 = vpop.eup %3122  ;;  %v2307_v23 = vadd.f32 %v2306_v34, %v2305_v19  ;;  %v2308_v26 = vsel %vm655_vm3, %v3121_v24, 0.0 }
0x1653   :  { %v3125_v25 = vpop.eup %3124  ;;  %v2310_v28 = vsel %vm655_vm3, %v3123_v12, 0.0 }
0x1654   :  { %v2309_v27 = vadd.f32 %v2308_v26, %v2307_v23  ;;  %v3127_v29 = vpop.eup %3126  ;;  %v2312_v31 = vsel %vm655_vm3, %v3125_v25, 0.0  ;;  %v2537_v26 = vld [vmem:[#allocation6 + $0x20] sm:$0xff] }
0x1655   :  { %v3129_v33 = vpop.eup %3128  ;;  %v2314_v36 = vsel %vm655_vm3, %v3127_v29, 0.0 }
0x1656   :  { %v2311_v30 = vadd.f32 %v2310_v28, %v2309_v27  ;;  %v3131_v37 = vpop.eup %3130  ;;  %v2316_v39 = vsel %vm655_vm3, %v3129_v33, 0.0 }
0x1657   :  { %v2318_v41 = vsel %vm655_vm3, %v3131_v37, 0.0 }
0x1658   :  { %v2313_v35 = vadd.f32 %v2312_v31, %v2311_v30  ;;  %v2538_v30 = vld [vmem:[#allocation6 + $0x28] sm:$0xff] }
0x165a   :  { %v2315_v38 = vadd.f32 %v2314_v36, %v2313_v35 }
0x165c   :  { %v2317_v40 = vadd.f32 %v2316_v39, %v2315_v38 }
0x165e   :  { %v2319_v42 = vadd.f32 %v2318_v41, %v2317_v40 }
0x1660   :  { %3132 = vrcp.f32 %v2319_v42  ;;  %v2994_v14 = vpop.f32.mrf.mxu0  ;;  %v2539_v42 = vld [vmem:[#allocation6 + $0x30] sm:$0xff] }
0x1661   :  { %3134 = vtanh.f32 %v2444_v58  ;;  %v2474_v7 = vadd.f32 %v2994_v14, %v2634_v57 }
0x1662   :  { %3136 = vtanh.f32 %v2439_v60  ;;  %v2468_v21 = vpop.f32.mrf.mxu0 }
0x1663   :  { %3138 = vtanh.f32 %v2449_v61  ;;  %v2469_v3 = vadd.f32 %v2634_v57, %v2468_v21 }
0x1664   :  { %3140 = vtanh.f32 %v2454_v0 }
0x1665   :  { %3142 = vtanh.f32 %v2459_v2 }
0x1666   :  { %3144 = vtanh.f32 %v2464_v16 }
0x1667   :  { %3146 = vtanh.f32 %v2469_v3 }
0x1668   :  { %3148 = vtanh.f32 %v2474_v7 }
0x166d   :  { %v3133_v43 = vpop.eup %3132 }
0x166e   :  { %v2322_v44 = vmul.f32 %v3133_v43, %v3119_v17  ;;  %v2321_v47 = vmul.f32 %v3133_v43, %v3117_v13  ;;  %v2323_v48 = vmul.f32 %v3133_v43, %v3121_v24  ;;  %v2324_v49 = vmul.f32 %v3133_v43, %v3123_v12  ;;  %v3135_v5 = vpop.eup %3134  ;;  %v2536_v24 = vld [vmem:[#allocation6 + $0x18] sm:$0xff] }
0x166f   :  { %v2325_v56 = vmul.f32 %v3133_v43, %v3125_v25  ;;  %v2326_v50 = vmul.f32 %v3133_v43, %v3127_v29  ;;  %v2327_v51 = vmul.f32 %v3133_v43, %v3129_v33  ;;  %v2328_v52 = vmul.f32 %v3133_v43, %v3131_v37  ;;  %v3137_v6 = vpop.eup %3136 }
0x1670   :  { %2492 = vperm.xlu0 %3019, %v2322_v44   ;;  %2487 = vperm.xlu1 %3018, %v2321_v47   ;;  %v3139_v32 = vpop.eup %3138 }
0x1671   :  { %v3141_v10 = vpop.eup %3140 }
0x1672   :  { %v3143_v19 = vpop.eup %3142 }
0x1673   :  { %v3145_v29 = vpop.eup %3144 }
0x1674   :  { %2497 = vperm.xlu1 %3018, %v2323_v48   ;;  %v3147_v40 = vpop.eup %3146 }
0x1678   :  { %2502 = vperm.xlu1 %3018, %v2324_v49  }
0x167c   :  { %2507 = vperm.xlu1 %3018, %v2325_v56  }
0x1680   :  { %2512 = vperm.xlu1 %3018, %v2326_v50   ;;  %v3149_v50 = vpop.eup %3148 }
0x1684   :  { %2517 = vperm.xlu1 %3018, %v2327_v51  }
0x1688   :  { %2522 = vperm.xlu1 %3018, %v2328_v52   ;;  %v2540_v52 = vld [vmem:[#allocation6 + $0x38] sm:$0xff] }
0x16eb   :  { %v2488_v18 = vpop.permute.xlu1 %2487  ;;  %v2493_v4 = vpop.permute.xlu0 %2492 }
0x16ec   :  { %v2526_v22 = vmul.f32 %v3135_v5, %v2493_v4  ;;  %v2525_v45 = vmul.f32 %v3137_v6, %v2488_v18 }
0x16ee   :  { %v2542_v63 = vmul.f32 %v2534_v8, %v2526_v22  ;;  %v2541_v13 = vmul.f32 %v2533_v9, %v2525_v45 }
0x16ef   :  { %v2498_v20 = vpop.permute.xlu1 %2497 }
0x16f0   :  { %v2527_v15 = vmul.f32 %v3139_v32, %v2498_v20  ;;  %v2550_v25 = vsel %vm143_vm0, %v2542_v63, 0.0  ;;  %v2549_v27 = vsel %vm143_vm0, %v2541_v13, 0.0 }
0x16f1   :  { %v2551_v37 = vadd.f32 %v2550_v25, %v2549_v27 }
0x16f2   :  { %v2543_v12 = vmul.f32 %v2535_v46, %v2527_v15 }
0x16f3   :  { %v2503_v11 = vpop.permute.xlu1 %2502 }
0x16f4   :  { %v2528_v17 = vmul.f32 %v3141_v10, %v2503_v11  ;;  %v2552_v33 = vsel %vm143_vm0, %v2543_v12, 0.0 }
0x16f5   :  { %v2553_v41 = vadd.f32 %v2552_v33, %v2551_v37 }
0x16f6   :  { %v2544_v28 = vmul.f32 %v2536_v24, %v2528_v17 }
0x16f7   :  { %v2508_v34 = vpop.permute.xlu1 %2507 }
0x16f8   :  { %v2529_v23 = vmul.f32 %v3143_v19, %v2508_v34  ;;  %v2554_v38 = vsel %vm143_vm0, %v2544_v28, 0.0 }
0x16f9   :  { %v2555_v48 = vadd.f32 %v2554_v38, %v2553_v41 }
0x16fa   :  { %v2545_v35 = vmul.f32 %v2537_v26, %v2529_v23 }
0x16fb   :  { %v2513_v31 = vpop.permute.xlu1 %2512 }
0x16fc   :  { %v2530_v36 = vmul.f32 %v3145_v29, %v2513_v31  ;;  %v2556_v44 = vsel %vm143_vm0, %v2545_v35, 0.0 }
0x16fd   :  { %v2557_v51 = vadd.f32 %v2556_v44, %v2555_v48 }
0x16fe   :  { %v2546_v39 = vmul.f32 %v2538_v30, %v2530_v36 }
0x16ff   :  { %v2518_v43 = vpop.permute.xlu1 %2517 }
0x1700   :  { %v2531_v47 = vmul.f32 %v3147_v40, %v2518_v43  ;;  %v2558_v49 = vsel %vm143_vm0, %v2546_v39, 0.0 }
0x1701   :  { %v2559_v55 = vadd.f32 %v2558_v49, %v2557_v51 }
0x1702   :  { %v2547_v56 = vmul.f32 %v2539_v42, %v2531_v47 }
0x1703   :  { %v2523_v1 = vpop.permute.xlu1 %2522 }
0x1704   :  { %v2560_v53 = vsel %vm143_vm0, %v2547_v56, 0.0  ;;  %v2532_v54 = vmul.f32 %v3149_v50, %v2523_v1 }
0x1705   :  { %v2561_v58 = vadd.f32 %v2560_v53, %v2559_v55 }
0x1706   :  { %v2548_v57 = vmul.f32 %v2540_v52, %v2532_v54 }
0x1708   :  { %v2562_v59 = vsel %vm143_vm0, %v2548_v57, 0.0 }
0x1709   :  { %v2563_v60 = vadd.f32 %v2562_v59, %v2561_v58 }
0x170b   :  { %2564 = vst.msk [vmem:[#allocation17] sm:$0xff] %vm143_vm0, %v2563_v60 }
0x170c   :  { %3281 = shalt.err (!%p3278_p6)
}
0x170d   :  { %2574 = dma.vmem_to_hbm [thread:$0]  %s2572_s20, 128, %s3876_s12, [#allocation8]  }
0x170e   :  { %3298 = dma.done.wait [#allocation8], 128  }
0x170f   :  { %3299 = vsyncadd [#allocation8], 4294967168 }
0x1710   :  { %2578 = vsyncpa [#allocation7], 1 }
0x1711   :  { %2579 = vsyncpa [#allocation10], 1 }
0x1712   :  { %2580 = vsyncpa [#allocation13], 1 }
0x1713   :  { %2581 = vsyncpa [#allocation16], 1 }
0x1714   :  { %2582 = vsyncpa [#allocation8], 1 }

</bundles_post_ra>
